<compile_context>
chip_gen: v7x
topology: tpu7x:2x2x1
jax: 0.10.0
libtpu: 0.0.40
codegen_flags: <defaults>
</compile_context>

<pallas_src>
import math

import jax
import jax.numpy as jnp
from jax.experimental import pallas as pl
from jax.experimental.pallas import tpu as pltpu

_EPS = 1e-5  # nn.LayerNorm default eps


def _layernorm(x, gamma, beta):
    mu = jnp.mean(x, axis=-1, keepdims=True)
    var = jnp.mean((x - mu) ** 2, axis=-1, keepdims=True)
    return (x - mu) * jax.lax.rsqrt(var + _EPS) * gamma + beta


def _attention_model_kernel(
    # inputs
    nodes_ref, graph_ref,
    w_init_ref, b_init_ref, e_base_ref, e_delta_ref,
    w_node_ref, b_node_ref, w_edge_ref, b_edge_ref,
    lnh_g_ref, lnh_b_ref, lne_g_ref, lne_b_ref,
    w_hid_ref, b_hid_ref, w_val_ref, b_val_ref,
    # outputs
    value_ref, nl_ref,
    # scratch (carried across the layer grid axis)
    h_scr, e_scr,
):
    layer = pl.program_id(1)
    n_layers = pl.num_programs(1)
    Bt, V, H = h_scr.shape
    node_dim = nodes_ref.shape[-1]
    cd = w_init_ref.dtype                    # matmul compute dtype (f32 or bf16)

    g = graph_ref[...]                       # (Bt, V, V)

    # ---------------- layer 0: init_embed + edge embedding ----------------
    @pl.when(layer == 0)
    def _init():
        x = nodes_ref[...].reshape(Bt * V, node_dim)
        h0 = (jnp.dot(x.astype(cd), w_init_ref[...],
                      preferred_element_type=jnp.float32) + b_init_ref[...])
        h_scr[...] = h0.reshape(Bt, V, H)
        # e_ij = edge_emb[0] + adj_ij * (edge_emb[1] - edge_emb[0])
        e_scr[...] = e_base_ref[...] + g[..., None] * e_delta_ref[...]

    # ---------------- one gated-GCN layer (runs every grid step) ----------
    h_in = h_scr[...]                        # (Bt, V, H)
    e_in = e_scr[...]                        # (Bt, V, V, H)

    # fused node projections: [U | V | A | B] in one (H, 4H) matmul
    proj = (jnp.dot(h_in.reshape(Bt * V, H).astype(cd), w_node_ref[0],
                    preferred_element_type=jnp.float32)
            + b_node_ref[0]).reshape(Bt, V, 4 * H)
    Uh = proj[..., 0 * H:1 * H]
    Vh = proj[..., 1 * H:2 * H]
    Ah = proj[..., 2 * H:3 * H]
    Bh = proj[..., 3 * H:4 * H]

    # edge projection C e_ij (dominant matmul: M = Bt*V*V)
    Ce = (jnp.dot(e_in.reshape(Bt * V * V, H).astype(cd), w_edge_ref[0],
                  preferred_element_type=jnp.float32)
          + b_edge_ref[0]).reshape(Bt, V, V, H)

    # e'_ij = A h_j + B h_i + C e_ij ; gates = sigmoid(e') (f32)
    e_new = Ah[:, None, :, :] + Bh[:, :, None, :] + Ce
    gates = jax.nn.sigmoid(e_new)

    # gated sum aggregation over neighbors j
    agg = jnp.sum(gates * (Vh[:, None, :, :] * g[..., None]), axis=2)   # (Bt,V,H)

    h_new = _layernorm(Uh + agg, lnh_g_ref[0], lnh_b_ref[0])
    e_ln = _layernorm(e_new, lne_g_ref[0], lne_b_ref[0])

    h_scr[...] = h_in + jax.nn.relu(h_new)
    e_scr[...] = e_in + jax.nn.relu(e_ln)

    # ---------------- last layer: heads + output store --------------------
    @pl.when(layer == n_layers - 1)
    def _final():
        H2 = w_hid_ref.shape[1]
        h = h_scr[...].reshape(Bt * V, H)
        flow = jax.nn.sigmoid(
            jnp.dot(h.astype(cd), w_hid_ref[...],
                    preferred_element_type=jnp.float32) + b_hid_ref[...])
        flow = flow.reshape(Bt, V, H2)
        graph_emb = jnp.mean(flow, axis=1)                   # (Bt, H2)
        nl = jnp.mean(flow, axis=2)                          # (Bt, V) lane-dense
        value = jax.nn.relu(
            jnp.dot(graph_emb.astype(cd), w_val_ref[...],
                    preferred_element_type=jnp.float32) + b_val_ref[...])  # (Bt,1)
        value_ref[...] = value.reshape(Bt, 1, 1)
        nl_ref[...] = nl.reshape(Bt, 1, V)


def attention_model_forward(nodes, graph, params, n_layers, *,
                            compute_dtype=jnp.float32, batch_block=None):
    B, V, node_dim = nodes.shape
    assert graph.shape == (B, V, V)
    H = params["w_init"].shape[1]
    L = n_layers
    cd = compute_dtype

    Bt = batch_block if batch_block is not None else math.gcd(B, 8)
    assert B % Bt == 0

    # ---- wrapper-side parameter prep (fusion / blend delta / dtype) ----
    w_node = jnp.concatenate([params["Wn"][:, i] for i in range(4)],
                             axis=-1).astype(cd)                    # (L, H, 4H)
    b_node = jnp.concatenate([params["bn"][:, i] for i in range(4)],
                             axis=-1)                               # (L, 1, 4H)
    w_edge = params["Wn"][:, 4].astype(cd)                          # (L, H, H)
    b_edge = params["bn"][:, 4]                                     # (L, 1, H)
    e_base = params["edge_emb"][0:1]                                # (1, H)
    e_delta = params["edge_emb"][1:2] - params["edge_emb"][0:1]     # (1, H)
    w_init = params["w_init"].astype(cd)
    w_hid = params["w_hid"].astype(cd)
    w_val = params["w_val"].astype(cd)

    inputs = [
        nodes, graph,
        w_init, params["b_init"], e_base, e_delta,
        w_node, b_node, w_edge, b_edge,
        params["lnh_g"], params["lnh_b"], params["lne_g"], params["lne_b"],
        w_hid, params["b_hid"], w_val, params["b_val"],
    ]

    def invariant(arr):
        nd = arr.ndim
        return pl.BlockSpec(arr.shape, lambda b, l, nd=nd: (0,) * nd)

    def per_layer(arr):
        nd = arr.ndim
        return pl.BlockSpec((1,) + arr.shape[1:],
                            lambda b, l, nd=nd: (l,) + (0,) * (nd - 1))

    in_specs = [
        pl.BlockSpec((Bt, V, node_dim), lambda b, l: (b, 0, 0)),
        pl.BlockSpec((Bt, V, V), lambda b, l: (b, 0, 0)),
        invariant(w_init), invariant(params["b_init"]),
        invariant(e_base), invariant(e_delta),
        per_layer(w_node), per_layer(b_node),
        per_layer(w_edge), per_layer(b_edge),
        per_layer(params["lnh_g"]), per_layer(params["lnh_b"]),
        per_layer(params["lne_g"]), per_layer(params["lne_b"]),
        invariant(w_hid), invariant(params["b_hid"]),
        invariant(w_val), invariant(params["b_val"]),
    ]

    out_specs = (pl.BlockSpec((Bt, 1, 1), lambda b, l: (b, 0, 0)),
                 pl.BlockSpec((Bt, 1, V), lambda b, l: (b, 0, 0)))
    out_shape = (jax.ShapeDtypeStruct((B, 1, 1), jnp.float32),
                 jax.ShapeDtypeStruct((B, 1, V), jnp.float32))

    value, nl = pl.pallas_call(
        _attention_model_kernel,
        grid_spec=pltpu.PrefetchScalarGridSpec(
            num_scalar_prefetch=0,
            grid=(B // Bt, L),
            in_specs=in_specs,
            out_specs=out_specs,
            scratch_shapes=[pltpu.VMEM((Bt, V, H), jnp.float32),
                            pltpu.VMEM((Bt, V, V, H), jnp.float32)]),
        out_shape=out_shape,
        compiler_params=pltpu.CompilerParams(
            dimension_semantics=("parallel", "arbitrary")),
    )(*inputs)

    return value.reshape(B, 1), nl.reshape(B, V, 1)


def init_params(key, H, L, node_dim=7):
    H2 = H // 2
    ks = jax.random.split(key, 9)
    s = 0.1
    return {
        "w_init":   s * jax.random.normal(ks[0], (node_dim, H), jnp.float32),
        "b_init":   s * jax.random.normal(ks[1], (1, H), jnp.float32),
        "edge_emb": s * jax.random.normal(ks[2], (2, H), jnp.float32),
        "Wn":       s * jax.random.normal(ks[3], (L, 5, H, H), jnp.float32),
        "bn":       s * jax.random.normal(ks[4], (L, 5, 1, H), jnp.float32),
        "lnh_g":    jnp.ones((L, 1, H), jnp.float32),
        "lnh_b":    jnp.zeros((L, 1, H), jnp.float32),
        "lne_g":    jnp.ones((L, 1, H), jnp.float32),
        "lne_b":    jnp.zeros((L, 1, H), jnp.float32),
        "w_hid":    s * jax.random.normal(ks[5], (H, H2), jnp.float32),
        "b_hid":    s * jax.random.normal(ks[6], (1, H2), jnp.float32),
        "w_val":    s * jax.random.normal(ks[7], (H2, 1), jnp.float32),
        "b_val":    s * jax.random.normal(ks[8], (1, 1), jnp.float32),
    }


def reference_forward(nodes, graph, p, n_layers):
    """Pure-JAX reference mirroring the PyTorch semantics."""
    g = graph
    h = nodes @ p["w_init"] + p["b_init"][0]
    e = g[..., None] * p["edge_emb"][1] + (1.0 - g)[..., None] * p["edge_emb"][0]
    for l in range(n_layers):
        h_in, e_in = h, e
        Wu, Wv, Wa, Wb, Wc = (p["Wn"][l, i] for i in range(5))
        bu, bv, ba, bb, bc = (p["bn"][l, i, 0] for i in range(5))
        Uh, Vh, Ah, Bh = h @ Wu + bu, h @ Wv + bv, h @ Wa + ba, h @ Wb + bb
        Ce = e @ Wc + bc
        e_new = Ah[:, None, :, :] + Bh[:, :, None, :] + Ce
        gates = jax.nn.sigmoid(e_new)
        agg = jnp.sum(gates * Vh[:, None, :, :] * g[..., None], axis=2)
        h_new = _layernorm(Uh + agg, p["lnh_g"][l, 0], p["lnh_b"][l, 0])
        e_norm = _layernorm(e_new, p["lne_g"][l, 0], p["lne_b"][l, 0])
        h = h_in + jax.nn.relu(h_new)
        e = e_in + jax.nn.relu(e_norm)
    flow = jax.nn.sigmoid(h @ p["w_hid"] + p["b_hid"][0])
    graph_emb = jnp.mean(flow, axis=1)
    nl = jnp.mean(flow, axis=2, keepdims=True)
    value = jax.nn.relu(graph_emb @ p["w_val"] + p["b_val"][0])
    return value, nl


if __name__ == "__main__":
    B, V, H, L = 2, 8, 32, 2          # batch, nodes, embedding_dim, n_encode_layers
    key = jax.random.PRNGKey(0)
    k_nodes, k_graph, k_params = jax.random.split(key, 3)

    nodes = jax.random.normal(k_nodes, (B, V, 7), jnp.float32)
    graph = (jax.random.uniform(k_graph, (B, V, V)) < 0.5).astype(jnp.float32)
    params = init_params(k_params, H, L)

    # f32 path (exact semantics)
    value, node_likelihood = attention_model_forward(nodes, graph, params, L)
    jax.block_until_ready((value, node_likelihood))

    v_ref, nl_ref = reference_forward(nodes, graph, params, L)
    assert value.shape == (B, 1)
    assert node_likelihood.shape == (B, V, 1)
    assert jnp.allclose(value, v_ref, atol=1e-4, rtol=1e-4)
    assert jnp.allclose(node_likelihood, nl_ref, atol=1e-4, rtol=1e-4)

    # bf16 MXU path (v6e/v7x fast path), f32 accumulation — looser tolerance
    v_bf16, nl_bf16 = attention_model_forward(nodes, graph, params, L,
                                              compute_dtype=jnp.bfloat16)
    jax.block_until_ready((v_bf16, nl_bf16))
    assert jnp.allclose(v_bf16, v_ref, atol=5e-2, rtol=5e-2)
    assert jnp.allclose(nl_bf16, nl_ref, atol=5e-2, rtol=5e-2)

    print("KERNEL_OK")
</pallas_src>

<mosaic_0001>
module attributes {stable_mosaic.version = 11 : i64} {
  func.func @_attention_model_kernel(%arg0: i32, %arg1: i32, %arg2: memref<2x8x7xf32, #tpu.memory_space<vmem>>, %arg3: memref<2x8x8xf32, #tpu.memory_space<vmem>>, %arg4: memref<7x32xf32, #tpu.memory_space<vmem>>, %arg5: memref<1x32xf32, #tpu.memory_space<vmem>>, %arg6: memref<1x32xf32, #tpu.memory_space<vmem>>, %arg7: memref<1x32xf32, #tpu.memory_space<vmem>>, %arg8: memref<1x32x128xf32, #tpu.memory_space<vmem>>, %arg9: memref<1x1x128xf32, #tpu.memory_space<vmem>>, %arg10: memref<1x32x32xf32, #tpu.memory_space<vmem>>, %arg11: memref<1x1x32xf32, #tpu.memory_space<vmem>>, %arg12: memref<1x1x32xf32, #tpu.memory_space<vmem>>, %arg13: memref<1x1x32xf32, #tpu.memory_space<vmem>>, %arg14: memref<1x1x32xf32, #tpu.memory_space<vmem>>, %arg15: memref<1x1x32xf32, #tpu.memory_space<vmem>>, %arg16: memref<32x16xf32, #tpu.memory_space<vmem>>, %arg17: memref<1x16xf32, #tpu.memory_space<vmem>>, %arg18: memref<16x1xf32, #tpu.memory_space<vmem>>, %arg19: memref<1x1xf32, #tpu.memory_space<vmem>>, %arg20: memref<2x1x1xf32, #tpu.memory_space<vmem>>, %arg21: memref<2x1x8xf32, #tpu.memory_space<vmem>>, %arg22: memref<2x8x32xf32, #tpu.memory_space<vmem>>, %arg23: memref<2x8x8x32xf32, #tpu.memory_space<vmem>>) attributes {dimension_semantics = [#tpu.dimension_semantics<parallel>, #tpu.dimension_semantics<arbitrary>], iteration_bounds = array<i64: 1, 2>, scalar_prefetch = 0 : i64, scratch_operands = 2 : i64, tpu.core_type = #tpu.core_type<tc>, window_params = [{transform_indices = @transform_0, window_bounds = array<i64: 2, 8, 7>}, {transform_indices = @transform_1, window_bounds = array<i64: 2, 8, 8>}, {pipeline_mode = #tpu.pipeline_mode<synchronous>, transform_indices = @transform_2, window_bounds = array<i64: 7, 32>}, {pipeline_mode = #tpu.pipeline_mode<synchronous>, transform_indices = @transform_3, window_bounds = array<i64: 1, 32>}, {pipeline_mode = #tpu.pipeline_mode<synchronous>, transform_indices = @transform_4, window_bounds = array<i64: 1, 32>}, {pipeline_mode = #tpu.pipeline_mode<synchronous>, transform_indices = @transform_5, window_bounds = array<i64: 1, 32>}, {transform_indices = @transform_6, window_bounds = array<i64: 1, 32, 128>}, {transform_indices = @transform_7, window_bounds = array<i64: 1, 1, 128>}, {transform_indices = @transform_8, window_bounds = array<i64: 1, 32, 32>}, {transform_indices = @transform_9, window_bounds = array<i64: 1, 1, 32>}, {transform_indices = @transform_10, window_bounds = array<i64: 1, 1, 32>}, {transform_indices = @transform_11, window_bounds = array<i64: 1, 1, 32>}, {transform_indices = @transform_12, window_bounds = array<i64: 1, 1, 32>}, {transform_indices = @transform_13, window_bounds = array<i64: 1, 1, 32>}, {pipeline_mode = #tpu.pipeline_mode<synchronous>, transform_indices = @transform_14, window_bounds = array<i64: 32, 16>}, {pipeline_mode = #tpu.pipeline_mode<synchronous>, transform_indices = @transform_15, window_bounds = array<i64: 1, 16>}, {pipeline_mode = #tpu.pipeline_mode<synchronous>, transform_indices = @transform_16, window_bounds = array<i64: 16, 1>}, {pipeline_mode = #tpu.pipeline_mode<synchronous>, transform_indices = @transform_17, window_bounds = array<i64: 1, 1>}, {transform_indices = @transform_18, window_bounds = array<i64: 2, 1, 1>}, {transform_indices = @transform_19, window_bounds = array<i64: 2, 1, 8>}]} {
    %c0 = arith.constant 0 : index
    %c0_0 = arith.constant 0 : index
    %c0_1 = arith.constant 0 : index
    %0 = vector.load %arg3[%c0, %c0_0, %c0_1] : memref<2x8x8xf32, #tpu.memory_space<vmem>>, vector<2x8x8xf32>
    %c0_i32 = arith.constant 0 : i32
    %1 = arith.cmpi eq, %arg1, %c0_i32 : i32
    %2 = arith.extui %1 : i1 to i32
    %c0_i32_2 = arith.constant 0 : i32
    %3 = arith.cmpi ne, %2, %c0_i32_2 : i32
    scf.if %3 {
      %c0_57 = arith.constant 0 : index
      %c0_58 = arith.constant 0 : index
      %c0_59 = arith.constant 0 : index
      %114 = vector.load %arg2[%c0_57, %c0_58, %c0_59] : memref<2x8x7xf32, #tpu.memory_space<vmem>>, vector<2x8x7xf32>
      %115 = vector.shape_cast %114 : vector<2x8x7xf32> to vector<16x7xf32>
      %c0_60 = arith.constant 0 : index
      %c0_61 = arith.constant 0 : index
      %116 = vector.load %arg4[%c0_60, %c0_61] : memref<7x32xf32, #tpu.memory_space<vmem>>, vector<7x32xf32>
      %cst_62 = arith.constant dense<0.000000e+00> : vector<16x32xf32>
      %117 = tpu.matmul %115, %116, %cst_62 {dimension_numbers = #tpu.dot_dimension_numbers<[1], [0], [0], [1], [0, 0, 1, 1], [], []>} : vector<16x7xf32>, vector<7x32xf32>, vector<16x32xf32> -> vector<16x32xf32>
      %c0_63 = arith.constant 0 : index
      %c0_64 = arith.constant 0 : index
      %118 = vector.load %arg5[%c0_63, %c0_64] : memref<1x32xf32, #tpu.memory_space<vmem>>, vector<1x32xf32>
      %119 = vector.broadcast %118 : vector<1x32xf32> to vector<16x32xf32>
      %120 = arith.addf %117, %119 : vector<16x32xf32>
      %121 = vector.shape_cast %120 : vector<16x32xf32> to vector<2x8x32xf32>
      %c0_65 = arith.constant 0 : index
      %c0_66 = arith.constant 0 : index
      %c0_67 = arith.constant 0 : index
      %122 = vector.load %arg22[%c0_65, %c0_66, %c0_67] : memref<2x8x32xf32, #tpu.memory_space<vmem>>, vector<2x8x32xf32>
      tpu.vector_store %arg22[%c0_65, %c0_66, %c0_67], %121 {strides = array<i32>} : memref<2x8x32xf32, #tpu.memory_space<vmem>>, vector<2x8x32xf32>,
      %c0_68 = arith.constant 0 : index
      %c0_69 = arith.constant 0 : index
      %123 = vector.load %arg6[%c0_68, %c0_69] : memref<1x32xf32, #tpu.memory_space<vmem>>, vector<1x32xf32>
      %124 = vector.shape_cast %0 : vector<2x8x8xf32> to vector<2x8x8x1xf32>
      %c0_70 = arith.constant 0 : index
      %c0_71 = arith.constant 0 : index
      %125 = vector.load %arg7[%c0_70, %c0_71] : memref<1x32xf32, #tpu.memory_space<vmem>>, vector<1x32xf32>
      %126 = vector.shape_cast %125 : vector<1x32xf32> to vector<1x1x1x32xf32>
      %127 = vector.broadcast %124 : vector<2x8x8x1xf32> to vector<2x8x8x32xf32>
      %128 = vector.broadcast %126 : vector<1x1x1x32xf32> to vector<2x8x8x32xf32>
      %129 = arith.mulf %127, %128 : vector<2x8x8x32xf32>
      %130 = vector.shape_cast %123 : vector<1x32xf32> to vector<1x1x1x32xf32>
      %131 = vector.broadcast %130 : vector<1x1x1x32xf32> to vector<2x8x8x32xf32>
      %132 = arith.addf %131, %129 : vector<2x8x8x32xf32>
      %c0_72 = arith.constant 0 : index
      %c0_73 = arith.constant 0 : index
      %c0_74 = arith.constant 0 : index
      %c0_75 = arith.constant 0 : index
      %133 = vector.load %arg23[%c0_72, %c0_73, %c0_74, %c0_75] : memref<2x8x8x32xf32, #tpu.memory_space<vmem>>, vector<2x8x8x32xf32>
      tpu.vector_store %arg23[%c0_72, %c0_73, %c0_74, %c0_75], %132 {strides = array<i32>} : memref<2x8x8x32xf32, #tpu.memory_space<vmem>>, vector<2x8x8x32xf32>,
    } else {
    }
    %c0_3 = arith.constant 0 : index
    %c0_4 = arith.constant 0 : index
    %c0_5 = arith.constant 0 : index
    %4 = vector.load %arg22[%c0_3, %c0_4, %c0_5] : memref<2x8x32xf32, #tpu.memory_space<vmem>>, vector<2x8x32xf32>
    %c0_6 = arith.constant 0 : index
    %c0_7 = arith.constant 0 : index
    %c0_8 = arith.constant 0 : index
    %c0_9 = arith.constant 0 : index
    %5 = vector.load %arg23[%c0_6, %c0_7, %c0_8, %c0_9] : memref<2x8x8x32xf32, #tpu.memory_space<vmem>>, vector<2x8x8x32xf32>
    %6 = vector.shape_cast %4 : vector<2x8x32xf32> to vector<16x32xf32>
    %c0_10 = arith.constant 0 : index
    %c0_11 = arith.constant 0 : index
    %c0_12 = arith.constant 0 : index
    %7 = vector.load %arg8[%c0_10, %c0_11, %c0_12] : memref<1x32x128xf32, #tpu.memory_space<vmem>>, vector<1x32x128xf32>
    %8 = vector.shape_cast %7 : vector<1x32x128xf32> to vector<32x128xf32>
    %cst = arith.constant dense<0.000000e+00> : vector<16x128xf32>
    %9 = tpu.matmul %6, %8, %cst {dimension_numbers = #tpu.dot_dimension_numbers<[1], [0], [0], [1], [0, 0, 1, 1], [], []>} : vector<16x32xf32>, vector<32x128xf32>, vector<16x128xf32> -> vector<16x128xf32>
    %c0_13 = arith.constant 0 : index
    %c0_14 = arith.constant 0 : index
    %c0_15 = arith.constant 0 : index
    %10 = vector.load %arg9[%c0_13, %c0_14, %c0_15] : memref<1x1x128xf32, #tpu.memory_space<vmem>>, vector<1x1x128xf32>
    %11 = vector.shape_cast %10 : vector<1x1x128xf32> to vector<1x128xf32>
    %12 = vector.broadcast %11 : vector<1x128xf32> to vector<16x128xf32>
    %13 = arith.addf %9, %12 : vector<16x128xf32>
    %14 = vector.shape_cast %13 : vector<16x128xf32> to vector<2x8x128xf32>
    %15 = vector.extract_strided_slice %14 {offsets = [0, 0, 0], sizes = [2, 8, 32], strides = [1, 1, 1]} : vector<2x8x128xf32> to vector<2x8x32xf32>
    %16 = vector.extract_strided_slice %14 {offsets = [0, 0, 32], sizes = [2, 8, 32], strides = [1, 1, 1]} : vector<2x8x128xf32> to vector<2x8x32xf32>
    %17 = vector.extract_strided_slice %14 {offsets = [0, 0, 64], sizes = [2, 8, 32], strides = [1, 1, 1]} : vector<2x8x128xf32> to vector<2x8x32xf32>
    %18 = vector.extract_strided_slice %14 {offsets = [0, 0, 96], sizes = [2, 8, 32], strides = [1, 1, 1]} : vector<2x8x128xf32> to vector<2x8x32xf32>
    %19 = vector.shape_cast %5 : vector<2x8x8x32xf32> to vector<128x32xf32>
    %c0_16 = arith.constant 0 : index
    %c0_17 = arith.constant 0 : index
    %c0_18 = arith.constant 0 : index
    %20 = vector.load %arg10[%c0_16, %c0_17, %c0_18] : memref<1x32x32xf32, #tpu.memory_space<vmem>>, vector<1x32x32xf32>
    %21 = vector.shape_cast %20 : vector<1x32x32xf32> to vector<32x32xf32>
    %cst_19 = arith.constant dense<0.000000e+00> : vector<128x32xf32>
    %22 = tpu.matmul %19, %21, %cst_19 {dimension_numbers = #tpu.dot_dimension_numbers<[1], [0], [0], [1], [0, 0, 1, 1], [], []>} : vector<128x32xf32>, vector<32x32xf32>, vector<128x32xf32> -> vector<128x32xf32>
    %c0_20 = arith.constant 0 : index
    %c0_21 = arith.constant 0 : index
    %c0_22 = arith.constant 0 : index
    %23 = vector.load %arg11[%c0_20, %c0_21, %c0_22] : memref<1x1x32xf32, #tpu.memory_space<vmem>>, vector<1x1x32xf32>
    %24 = vector.shape_cast %23 : vector<1x1x32xf32> to vector<1x32xf32>
    %25 = vector.broadcast %24 : vector<1x32xf32> to vector<128x32xf32>
    %26 = arith.addf %22, %25 : vector<128x32xf32>
    %27 = vector.shape_cast %26 : vector<128x32xf32> to vector<2x8x8x32xf32>
    %28 = vector.shape_cast %17 : vector<2x8x32xf32> to vector<2x1x8x32xf32>
    %29 = vector.shape_cast %18 : vector<2x8x32xf32> to vector<2x8x1x32xf32>
    %30 = vector.broadcast %28 : vector<2x1x8x32xf32> to vector<2x8x8x32xf32>
    %31 = vector.broadcast %29 : vector<2x8x1x32xf32> to vector<2x8x8x32xf32>
    %32 = arith.addf %30, %31 : vector<2x8x8x32xf32>
    %33 = arith.addf %32, %27 : vector<2x8x8x32xf32>
    %34 = arith.negf %33 : vector<2x8x8x32xf32>
    %35 = math.exp %34 : vector<2x8x8x32xf32>
    %cst_23 = arith.constant 1.000000e+00 : f32
    %36 = vector.broadcast %cst_23 : f32 to vector<2x8x8x32xf32>
    %37 = arith.addf %36, %35 : vector<2x8x8x32xf32>
    %38 = arith.divf %36, %37 : vector<2x8x8x32xf32>
    %39 = vector.shape_cast %16 : vector<2x8x32xf32> to vector<2x1x8x32xf32>
    %40 = vector.shape_cast %0 : vector<2x8x8xf32> to vector<2x8x8x1xf32>
    %41 = vector.broadcast %39 : vector<2x1x8x32xf32> to vector<2x8x8x32xf32>
    %42 = vector.broadcast %40 : vector<2x8x8x1xf32> to vector<2x8x8x32xf32>
    %43 = arith.mulf %41, %42 : vector<2x8x8x32xf32>
    %44 = arith.mulf %38, %43 : vector<2x8x8x32xf32>
    %cst_24 = arith.constant dense<0.000000e+00> : vector<2x8x32xf32>
    %45 = vector.multi_reduction <add>, %44, %cst_24 [2] : vector<2x8x8x32xf32> to vector<2x8x32xf32>
    %46 = arith.addf %15, %45 : vector<2x8x32xf32>
    %c0_25 = arith.constant 0 : index
    %c0_26 = arith.constant 0 : index
    %c0_27 = arith.constant 0 : index
    %47 = vector.load %arg12[%c0_25, %c0_26, %c0_27] : memref<1x1x32xf32, #tpu.memory_space<vmem>>, vector<1x1x32xf32>
    %48 = vector.shape_cast %47 : vector<1x1x32xf32> to vector<1x32xf32>
    %c0_28 = arith.constant 0 : index
    %c0_29 = arith.constant 0 : index
    %c0_30 = arith.constant 0 : index
    %49 = vector.load %arg13[%c0_28, %c0_29, %c0_30] : memref<1x1x32xf32, #tpu.memory_space<vmem>>, vector<1x1x32xf32>
    %50 = vector.shape_cast %49 : vector<1x1x32xf32> to vector<1x32xf32>
    %cst_31 = arith.constant dense<0.000000e+00> : vector<2x8xf32>
    %51 = vector.multi_reduction <add>, %46, %cst_31 [2] : vector<2x8x32xf32> to vector<2x8xf32>
    %52 = vector.shape_cast %51 : vector<2x8xf32> to vector<2x8x1xf32>
    %cst_32 = arith.constant 3.200000e+01 : f32
    %53 = vector.broadcast %cst_32 : f32 to vector<2x8x1xf32>
    %54 = arith.divf %52, %53 : vector<2x8x1xf32>
    %55 = vector.broadcast %54 : vector<2x8x1xf32> to vector<2x8x32xf32>
    %56 = arith.subf %46, %55 : vector<2x8x32xf32>
    %57 = arith.mulf %56, %56 : vector<2x8x32xf32>
    %cst_33 = arith.constant dense<0.000000e+00> : vector<2x8xf32>
    %58 = vector.multi_reduction <add>, %57, %cst_33 [2] : vector<2x8x32xf32> to vector<2x8xf32>
    %59 = vector.shape_cast %58 : vector<2x8xf32> to vector<2x8x1xf32>
    %cst_34 = arith.constant 3.200000e+01 : f32
    %60 = vector.broadcast %cst_34 : f32 to vector<2x8x1xf32>
    %61 = arith.divf %59, %60 : vector<2x8x1xf32>
    %62 = vector.broadcast %54 : vector<2x8x1xf32> to vector<2x8x32xf32>
    %63 = arith.subf %46, %62 : vector<2x8x32xf32>
    %cst_35 = arith.constant 9.99999974E-6 : f32
    %64 = vector.broadcast %cst_35 : f32 to vector<2x8x1xf32>
    %65 = arith.addf %61, %64 : vector<2x8x1xf32>
    %66 = math.rsqrt %65 : vector<2x8x1xf32>
    %67 = vector.broadcast %66 : vector<2x8x1xf32> to vector<2x8x32xf32>
    %68 = arith.mulf %63, %67 : vector<2x8x32xf32>
    %69 = vector.shape_cast %48 : vector<1x32xf32> to vector<1x1x32xf32>
    %70 = vector.broadcast %69 : vector<1x1x32xf32> to vector<2x8x32xf32>
    %71 = arith.mulf %68, %70 : vector<2x8x32xf32>
    %72 = vector.shape_cast %50 : vector<1x32xf32> to vector<1x1x32xf32>
    %73 = vector.broadcast %72 : vector<1x1x32xf32> to vector<2x8x32xf32>
    %74 = arith.addf %71, %73 : vector<2x8x32xf32>
    %c0_36 = arith.constant 0 : index
    %c0_37 = arith.constant 0 : index
    %c0_38 = arith.constant 0 : index
    %75 = vector.load %arg14[%c0_36, %c0_37, %c0_38] : memref<1x1x32xf32, #tpu.memory_space<vmem>>, vector<1x1x32xf32>
    %76 = vector.shape_cast %75 : vector<1x1x32xf32> to vector<1x32xf32>
    %c0_39 = arith.constant 0 : index
    %c0_40 = arith.constant 0 : index
    %c0_41 = arith.constant 0 : index
    %77 = vector.load %arg15[%c0_39, %c0_40, %c0_41] : memref<1x1x32xf32, #tpu.memory_space<vmem>>, vector<1x1x32xf32>
    %78 = vector.shape_cast %77 : vector<1x1x32xf32> to vector<1x32xf32>
    %cst_42 = arith.constant dense<0.000000e+00> : vector<2x8x8xf32>
    %79 = vector.multi_reduction <add>, %33, %cst_42 [3] : vector<2x8x8x32xf32> to vector<2x8x8xf32>
    %80 = vector.shape_cast %79 : vector<2x8x8xf32> to vector<2x8x8x1xf32>
    %cst_43 = arith.constant 3.200000e+01 : f32
    %81 = vector.broadcast %cst_43 : f32 to vector<2x8x8x1xf32>
    %82 = arith.divf %80, %81 : vector<2x8x8x1xf32>
    %83 = vector.broadcast %82 : vector<2x8x8x1xf32> to vector<2x8x8x32xf32>
    %84 = arith.subf %33, %83 : vector<2x8x8x32xf32>
    %85 = arith.mulf %84, %84 : vector<2x8x8x32xf32>
    %cst_44 = arith.constant dense<0.000000e+00> : vector<2x8x8xf32>
    %86 = vector.multi_reduction <add>, %85, %cst_44 [3] : vector<2x8x8x32xf32> to vector<2x8x8xf32>
    %87 = vector.shape_cast %86 : vector<2x8x8xf32> to vector<2x8x8x1xf32>
    %cst_45 = arith.constant 3.200000e+01 : f32
    %88 = vector.broadcast %cst_45 : f32 to vector<2x8x8x1xf32>
    %89 = arith.divf %87, %88 : vector<2x8x8x1xf32>
    %90 = vector.broadcast %82 : vector<2x8x8x1xf32> to vector<2x8x8x32xf32>
    %91 = arith.subf %33, %90 : vector<2x8x8x32xf32>
    %cst_46 = arith.constant 9.99999974E-6 : f32
    %92 = vector.broadcast %cst_46 : f32 to vector<2x8x8x1xf32>
    %93 = arith.addf %89, %92 : vector<2x8x8x1xf32>
    %94 = math.rsqrt %93 : vector<2x8x8x1xf32>
    %95 = vector.broadcast %94 : vector<2x8x8x1xf32> to vector<2x8x8x32xf32>
    %96 = arith.mulf %91, %95 : vector<2x8x8x32xf32>
    %97 = vector.shape_cast %76 : vector<1x32xf32> to vector<1x1x1x32xf32>
    %98 = vector.broadcast %97 : vector<1x1x1x32xf32> to vector<2x8x8x32xf32>
    %99 = arith.mulf %96, %98 : vector<2x8x8x32xf32>
    %100 = vector.shape_cast %78 : vector<1x32xf32> to vector<1x1x1x32xf32>
    %101 = vector.broadcast %100 : vector<1x1x1x32xf32> to vector<2x8x8x32xf32>
    %102 = arith.addf %99, %101 : vector<2x8x8x32xf32>
    %cst_47 = arith.constant 0.000000e+00 : f32
    %103 = vector.broadcast %cst_47 : f32 to vector<2x8x32xf32>
    %104 = arith.maximumf %74, %103 : vector<2x8x32xf32>
    %105 = arith.addf %4, %104 : vector<2x8x32xf32>
    %c0_48 = arith.constant 0 : index
    %c0_49 = arith.constant 0 : index
    %c0_50 = arith.constant 0 : index
    %106 = vector.load %arg22[%c0_48, %c0_49, %c0_50] : memref<2x8x32xf32, #tpu.memory_space<vmem>>, vector<2x8x32xf32>
    tpu.vector_store %arg22[%c0_48, %c0_49, %c0_50], %105 {strides = array<i32>} : memref<2x8x32xf32, #tpu.memory_space<vmem>>, vector<2x8x32xf32>,
    %cst_51 = arith.constant 0.000000e+00 : f32
    %107 = vector.broadcast %cst_51 : f32 to vector<2x8x8x32xf32>
    %108 = arith.maximumf %102, %107 : vector<2x8x8x32xf32>
    %109 = arith.addf %5, %108 : vector<2x8x8x32xf32>
    %c0_52 = arith.constant 0 : index
    %c0_53 = arith.constant 0 : index
    %c0_54 = arith.constant 0 : index
    %c0_55 = arith.constant 0 : index
    %110 = vector.load %arg23[%c0_52, %c0_53, %c0_54, %c0_55] : memref<2x8x8x32xf32, #tpu.memory_space<vmem>>, vector<2x8x8x32xf32>
    tpu.vector_store %arg23[%c0_52, %c0_53, %c0_54, %c0_55], %109 {strides = array<i32>} : memref<2x8x8x32xf32, #tpu.memory_space<vmem>>, vector<2x8x8x32xf32>,
    %c1_i32 = arith.constant 1 : i32
    %111 = arith.cmpi eq, %arg1, %c1_i32 : i32
    %112 = arith.extui %111 : i1 to i32
    %c0_i32_56 = arith.constant 0 : i32
    %113 = arith.cmpi ne, %112, %c0_i32_56 : i32
    scf.if %113 {
      %c0_57 = arith.constant 0 : index
      %c0_58 = arith.constant 0 : index
      %c0_59 = arith.constant 0 : index
      %114 = vector.load %arg22[%c0_57, %c0_58, %c0_59] : memref<2x8x32xf32, #tpu.memory_space<vmem>>, vector<2x8x32xf32>
      %115 = vector.shape_cast %114 : vector<2x8x32xf32> to vector<16x32xf32>
      %c0_60 = arith.constant 0 : index
      %c0_61 = arith.constant 0 : index
      %116 = vector.load %arg16[%c0_60, %c0_61] : memref<32x16xf32, #tpu.memory_space<vmem>>, vector<32x16xf32>
      %cst_62 = arith.constant dense<0.000000e+00> : vector<16x16xf32>
      %117 = tpu.matmul %115, %116, %cst_62 {dimension_numbers = #tpu.dot_dimension_numbers<[1], [0], [0], [1], [0, 0, 1, 1], [], []>} : vector<16x32xf32>, vector<32x16xf32>, vector<16x16xf32> -> vector<16x16xf32>
      %c0_63 = arith.constant 0 : index
      %c0_64 = arith.constant 0 : index
      %118 = vector.load %arg17[%c0_63, %c0_64] : memref<1x16xf32, #tpu.memory_space<vmem>>, vector<1x16xf32>
      %119 = vector.broadcast %118 : vector<1x16xf32> to vector<16x16xf32>
      %120 = arith.addf %117, %119 : vector<16x16xf32>
      %121 = arith.negf %120 : vector<16x16xf32>
      %122 = math.exp %121 : vector<16x16xf32>
      %cst_65 = arith.constant 1.000000e+00 : f32
      %123 = vector.broadcast %cst_65 : f32 to vector<16x16xf32>
      %124 = arith.addf %123, %122 : vector<16x16xf32>
      %125 = arith.divf %123, %124 : vector<16x16xf32>
      %126 = vector.shape_cast %125 : vector<16x16xf32> to vector<2x8x16xf32>
      %cst_66 = arith.constant dense<0.000000e+00> : vector<2x16xf32>
      %127 = vector.multi_reduction <add>, %126, %cst_66 [1] : vector<2x8x16xf32> to vector<2x16xf32>
      %cst_67 = arith.constant 8.000000e+00 : f32
      %128 = vector.broadcast %cst_67 : f32 to vector<2x16xf32>
      %129 = arith.divf %127, %128 : vector<2x16xf32>
      %cst_68 = arith.constant dense<0.000000e+00> : vector<2x8xf32>
      %130 = vector.multi_reduction <add>, %126, %cst_68 [2] : vector<2x8x16xf32> to vector<2x8xf32>
      %cst_69 = arith.constant 1.600000e+01 : f32
      %131 = vector.broadcast %cst_69 : f32 to vector<2x8xf32>
      %132 = arith.divf %130, %131 : vector<2x8xf32>
      %c0_70 = arith.constant 0 : index
      %c0_71 = arith.constant 0 : index
      %133 = vector.load %arg18[%c0_70, %c0_71] : memref<16x1xf32, #tpu.memory_space<vmem>>, vector<16x1xf32>
      %cst_72 = arith.constant dense<0.000000e+00> : vector<2x1xf32>
      %134 = tpu.matmul %129, %133, %cst_72 {dimension_numbers = #tpu.dot_dimension_numbers<[1], [0], [0], [1], [0, 0, 1, 1], [], []>} : vector<2x16xf32>, vector<16x1xf32>, vector<2x1xf32> -> vector<2x1xf32>
      %c0_73 = arith.constant 0 : index
      %c0_74 = arith.constant 0 : index
      %135 = vector.load %arg19[%c0_73, %c0_74] : memref<1x1xf32, #tpu.memory_space<vmem>>, vector<1x1xf32>
      %136 = vector.broadcast %135 : vector<1x1xf32> to vector<2x1xf32>
      %137 = arith.addf %134, %136 : vector<2x1xf32>
      %cst_75 = arith.constant 0.000000e+00 : f32
      %138 = vector.broadcast %cst_75 : f32 to vector<2x1xf32>
      %139 = arith.maximumf %137, %138 : vector<2x1xf32>
      %140 = vector.shape_cast %139 : vector<2x1xf32> to vector<2x1x1xf32>
      %c0_76 = arith.constant 0 : index
      %c0_77 = arith.constant 0 : index
      %c0_78 = arith.constant 0 : index
      %141 = vector.load %arg20[%c0_76, %c0_77, %c0_78] : memref<2x1x1xf32, #tpu.memory_space<vmem>>, vector<2x1x1xf32>
      tpu.vector_store %arg20[%c0_76, %c0_77, %c0_78], %140 {strides = array<i32>} : memref<2x1x1xf32, #tpu.memory_space<vmem>>, vector<2x1x1xf32>,
      %142 = vector.shape_cast %132 : vector<2x8xf32> to vector<2x1x8xf32>
      %c0_79 = arith.constant 0 : index
      %c0_80 = arith.constant 0 : index
      %c0_81 = arith.constant 0 : index
      %143 = vector.load %arg21[%c0_79, %c0_80, %c0_81] : memref<2x1x8xf32, #tpu.memory_space<vmem>>, vector<2x1x8xf32>
      tpu.vector_store %arg21[%c0_79, %c0_80, %c0_81], %142 {strides = array<i32>} : memref<2x1x8xf32, #tpu.memory_space<vmem>>, vector<2x1x8xf32>,
    } else {
    }
    return
  }
  func.func @transform_0(%arg0: i32, %arg1: i32) -> (i32, i32, i32) {
    %c0_i32 = arith.constant 0 : i32
    %c0_i32_0 = arith.constant 0 : i32
    %c0_i32_1 = arith.constant 0 : i32
    return %arg0, %c0_i32, %c0_i32_0 : i32, i32, i32
  }
  func.func @transform_1(%arg0: i32, %arg1: i32) -> (i32, i32, i32) {
    %c0_i32 = arith.constant 0 : i32
    %c0_i32_0 = arith.constant 0 : i32
    %c0_i32_1 = arith.constant 0 : i32
    return %arg0, %c0_i32, %c0_i32_0 : i32, i32, i32
  }
  func.func @transform_2(%arg0: i32, %arg1: i32) -> (i32, i32) {
    %c0_i32 = arith.constant 0 : i32
    %c0_i32_0 = arith.constant 0 : i32
    %c0_i32_1 = arith.constant 0 : i32
    return %c0_i32, %c0_i32_0 : i32, i32
  }
  func.func @transform_3(%arg0: i32, %arg1: i32) -> (i32, i32) {
    %c0_i32 = arith.constant 0 : i32
    %c0_i32_0 = arith.constant 0 : i32
    %c0_i32_1 = arith.constant 0 : i32
    return %c0_i32, %c0_i32_0 : i32, i32
  }
  func.func @transform_4(%arg0: i32, %arg1: i32) -> (i32, i32) {
    %c0_i32 = arith.constant 0 : i32
    %c0_i32_0 = arith.constant 0 : i32
    %c0_i32_1 = arith.constant 0 : i32
    return %c0_i32, %c0_i32_0 : i32, i32
  }
  func.func @transform_5(%arg0: i32, %arg1: i32) -> (i32, i32) {
    %c0_i32 = arith.constant 0 : i32
    %c0_i32_0 = arith.constant 0 : i32
    %c0_i32_1 = arith.constant 0 : i32
    return %c0_i32, %c0_i32_0 : i32, i32
  }
  func.func @transform_6(%arg0: i32, %arg1: i32) -> (i32, i32, i32) {
    %c0_i32 = arith.constant 0 : i32
    %c0_i32_0 = arith.constant 0 : i32
    %c0_i32_1 = arith.constant 0 : i32
    return %arg1, %c0_i32, %c0_i32_0 : i32, i32, i32
  }
  func.func @transform_7(%arg0: i32, %arg1: i32) -> (i32, i32, i32) {
    %c0_i32 = arith.constant 0 : i32
    %c0_i32_0 = arith.constant 0 : i32
    %c0_i32_1 = arith.constant 0 : i32
    return %arg1, %c0_i32, %c0_i32_0 : i32, i32, i32
  }
  func.func @transform_8(%arg0: i32, %arg1: i32) -> (i32, i32, i32) {
    %c0_i32 = arith.constant 0 : i32
    %c0_i32_0 = arith.constant 0 : i32
    %c0_i32_1 = arith.constant 0 : i32
    return %arg1, %c0_i32, %c0_i32_0 : i32, i32, i32
  }
  func.func @transform_9(%arg0: i32, %arg1: i32) -> (i32, i32, i32) {
    %c0_i32 = arith.constant 0 : i32
    %c0_i32_0 = arith.constant 0 : i32
    %c0_i32_1 = arith.constant 0 : i32
    return %arg1, %c0_i32, %c0_i32_0 : i32, i32, i32
  }
  func.func @transform_10(%arg0: i32, %arg1: i32) -> (i32, i32, i32) {
    %c0_i32 = arith.constant 0 : i32
    %c0_i32_0 = arith.constant 0 : i32
    %c0_i32_1 = arith.constant 0 : i32
    return %arg1, %c0_i32, %c0_i32_0 : i32, i32, i32
  }
  func.func @transform_11(%arg0: i32, %arg1: i32) -> (i32, i32, i32) {
    %c0_i32 = arith.constant 0 : i32
    %c0_i32_0 = arith.constant 0 : i32
    %c0_i32_1 = arith.constant 0 : i32
    return %arg1, %c0_i32, %c0_i32_0 : i32, i32, i32
  }
  func.func @transform_12(%arg0: i32, %arg1: i32) -> (i32, i32, i32) {
    %c0_i32 = arith.constant 0 : i32
    %c0_i32_0 = arith.constant 0 : i32
    %c0_i32_1 = arith.constant 0 : i32
    return %arg1, %c0_i32, %c0_i32_0 : i32, i32, i32
  }
  func.func @transform_13(%arg0: i32, %arg1: i32) -> (i32, i32, i32) {
    %c0_i32 = arith.constant 0 : i32
    %c0_i32_0 = arith.constant 0 : i32
    %c0_i32_1 = arith.constant 0 : i32
    return %arg1, %c0_i32, %c0_i32_0 : i32, i32, i32
  }
  func.func @transform_14(%arg0: i32, %arg1: i32) -> (i32, i32) {
    %c0_i32 = arith.constant 0 : i32
    %c0_i32_0 = arith.constant 0 : i32
    %c0_i32_1 = arith.constant 0 : i32
    return %c0_i32, %c0_i32_0 : i32, i32
  }
  func.func @transform_15(%arg0: i32, %arg1: i32) -> (i32, i32) {
    %c0_i32 = arith.constant 0 : i32
    %c0_i32_0 = arith.constant 0 : i32
    %c0_i32_1 = arith.constant 0 : i32
    return %c0_i32, %c0_i32_0 : i32, i32
  }
  func.func @transform_16(%arg0: i32, %arg1: i32) -> (i32, i32) {
    %c0_i32 = arith.constant 0 : i32
    %c0_i32_0 = arith.constant 0 : i32
    %c0_i32_1 = arith.constant 0 : i32
    return %c0_i32, %c0_i32_0 : i32, i32
  }
  func.func @transform_17(%arg0: i32, %arg1: i32) -> (i32, i32) {
    %c0_i32 = arith.constant 0 : i32
    %c0_i32_0 = arith.constant 0 : i32
    %c0_i32_1 = arith.constant 0 : i32
    return %c0_i32, %c0_i32_0 : i32, i32
  }
  func.func @transform_18(%arg0: i32, %arg1: i32) -> (i32, i32, i32) {
    %c0_i32 = arith.constant 0 : i32
    %c0_i32_0 = arith.constant 0 : i32
    %c0_i32_1 = arith.constant 0 : i32
    return %arg0, %c0_i32, %c0_i32_0 : i32, i32, i32
  }
  func.func @transform_19(%arg0: i32, %arg1: i32) -> (i32, i32, i32) {
    %c0_i32 = arith.constant 0 : i32
    %c0_i32_0 = arith.constant 0 : i32
    %c0_i32_1 = arith.constant 0 : i32
    return %arg0, %c0_i32, %c0_i32_0 : i32, i32, i32
  }
}

</mosaic_0001>

<bundles_post_ra>
// kernel: tpu_custom_call.1
= control target key start
LH: loop header
LB: loop body
LE: loop exit
PB: predicated region body
PF: predicated region fallthrough
CT: control target
= control target key end

     0   :  { %s5527_s0 = inlined_call_operand.vmem [shape: f32[2,8,7], index: 0, kind: input, shape index: {}]   ;;  %s5528_s1 = inlined_call_operand.hbm [shape: f32[2,8,8], index: 1, kind: input, shape index: {}]   ;;  %s5529_s2 = inlined_call_operand.hbm [shape: f32[7,32], index: 2, kind: input, shape index: {}]   ;;  %s5530_s3 = inlined_call_operand.hbm [shape: f32[1,32], index: 3, kind: input, shape index: {}]   ;;  %s5531_s4 = inlined_call_operand.hbm [shape: f32[1,32], index: 4, kind: input, shape index: {}]   ;;  %s5532_s5 = inlined_call_operand.hbm [shape: f32[1,32], index: 5, kind: input, shape index: {}]   ;;  %s5533_s6 = inlined_call_operand.vmem [shape: f32[2,32,128], index: 6, kind: input, shape index: {}]   ;;  %s5534_s7 = inlined_call_operand.hbm [shape: f32[2,1,128], index: 7, kind: input, shape index: {}]   ;;  %s5535_s8 = inlined_call_operand.vmem [shape: f32[2,32,32], index: 8, kind: input, shape index: {}]   ;;  %s5536_s9 = inlined_call_operand.hbm [shape: f32[2,1,32], index: 9, kind: input, shape index: {}]   ;;  %s5537_s10 = inlined_call_operand.hbm [shape: f32[2,1,32], index: 10, kind: input, shape index: {}]   ;;  %s5538_s11 = inlined_call_operand.hbm [shape: f32[2,1,32], index: 11, kind: input, shape index: {}]   ;;  %s5539_s12 = inlined_call_operand.hbm [shape: f32[2,1,32], index: 12, kind: input, shape index: {}]   ;;  %s5540_s13 = inlined_call_operand.vmem [shape: f32[2,1,32], index: 13, kind: input, shape index: {}]   ;;  %s5541_s14 = inlined_call_operand.vmem [shape: f32[32,16], index: 14, kind: input, shape index: {}]   ;;  %s5542_s15 = inlined_call_operand.vmem [shape: f32[1,16], index: 15, kind: input, shape index: {}]   ;;  %s5543_s16 = inlined_call_operand.vmem [shape: f32[16,1], index: 16, kind: input, shape index: {}]   ;;  %s5544_s17 = inlined_call_operand.<no memory space> [shape: f32[1,1], index: 17, kind: input, shape index: {}]   ;;  %s5545_s18 = inlined_call_operand.vmem [shape: f32[2,1,1], index: 18, kind: output, shape index: {0}]   ;;  %s5546_s19 = inlined_call_operand.hbm [shape: f32[2,1,8], index: 19, kind: output, shape index: {1}]  }
   0x1   :  { %5579 = sst [smem:[#allocation39_spill]] %s5527_s0  ;;  %v25_v0 = vstv %s5544_s17 }
   0x2   :  { %5580 = sst [smem:[#allocation40_spill]] %s5528_s1  ;;  %26 = vst [vmem:[#allocation4] sm:$0x1] %v25_v0 }
   0x3   :  { %5581 = sst [smem:[#allocation41_spill]] %s5529_s2 }
   0x4   :  { %5582 = sst [smem:[#allocation42_spill]] %s5530_s3 }
   0x5   :  { %5583 = sst [smem:[#allocation43_spill]] %s5531_s4 }
   0x6   :  { %5584 = sst [smem:[#allocation44_spill]] %s5533_s6 }
   0x7   :  { %5585 = sst [smem:[#allocation45_spill]] %s5534_s7 }
   0x8   :  { %5586 = sst [smem:[#allocation46_spill]] %s5535_s8 }
   0x9   :  { %5587 = sst [smem:[#allocation47_spill]] %s5537_s10 }
   0xa   :  { %5588 = sst [smem:[#allocation48_spill]] %s5540_s13 }
   0xb   :  { %5589 = sst [smem:[#allocation49_spill]] %s5541_s14 }
   0xc   :  { %5590 = sst [smem:[#allocation50_spill]] %s5542_s15 }
   0xd   :  { %5591 = sst [smem:[#allocation51_spill]] %s5543_s16 }
   0xe   :  { %5592 = sst [smem:[#allocation52_spill]] %s5545_s18 }
   0xf   :  { %5593 = sst [smem:[#allocation53_spill]] %s5546_s19 }
  0x10   :  { %27 = vsyncpa [#allocation6], 0 }
  0x11   :  { %28 = vsyncpa [#allocation9], 0 }
  0x12   :  { %29 = vsyncpa [#allocation12], 0 }
  0x13   :  { %30 = vsyncpa [#allocation15], 0 }
  0x14   :  { %32 = vsyncpa [#allocation15 + $0x1], 0 }
  0x15   :  { %33 = vsyncpa [#allocation18], 0 }
  0x16   :  { %35 = vsyncpa [#allocation18 + $0x1], 0 }
  0x17   :  { %36 = vsyncpa [#allocation21], 0 }
  0x18   :  { %38 = vsyncpa [#allocation21 + $0x1], 0 }
  0x19   :  { %39 = vsyncpa [#allocation7], 0  ;;  %s4371_s20 = smov 0   ;;  %s4373_s21 = smov 0  }
  0x1a   :  { %s4375_s1 = smov 0   ;;  %s4377_s22 = smov 0  }
  0x1b   :  { %s4379_s17 = smov 0   ;;  %s4381_s2 = smov 0  }
  0x1c LB: > { %5594 = sst [smem:[#allocation30_spill]] %s4228_s21  ;;  %s4400_s23 = sadd.s32 4294967295, %s4244_s2   ;;  %s4244_s2 = sphi %s4381_s2, %s45_s2   ;;  %s4240_s17 = sphi %s4379_s17, %s5656_s17   ;;  %s4236_s22 = sphi %s4377_s22, %s5655_s22   ;;  %s4232_s1 = sphi %s4375_s1, %s5654_s1   ;;  %s4228_s21 = sphi %s4373_s21, %s5653_s21   ;;  %s4224_s20 = sphi %s4371_s20, %s5652_s20  }
  0x1d   : > { %5595 = sst [smem:[#allocation31_spill]] %s4232_s1  ;;  %p239_p0 = scmp.ne.s32.totalorder %s4228_s21, %s4224_s20 }
  0x1e   : > { %5596 = sst [smem:[#allocation32_spill]] %s4236_s22  ;;  %p5555_p1 = scmp.eq.s32.totalorder %s4400_s23, 0 }
  0x1f   : > { %5597 = sst [smem:[#allocation33_spill]] %s4240_s17  ;;  %p3363_p2 = scmp.ge.s32.totalorder %s4244_s2, 1 }
  0x20   : > { %5598 = sst [smem:[#allocation34_spill]] %s4244_s2  ;;  %p542_p3 = scmp.lt.s32.totalorder %s4244_s2, 3 }
  0x21   : > { %5599 = sst [smem:[#allocation35_spill]] %s4400_s23  ;;  %p4408_p4 = por %p5555_p1, %p239_p0 }
  0x22   : > { %p4412_p5 = pnand %p3363_p2, %p542_p3  ;;  %s4246_s3 = smov [#allocation8]  }
  0x23   : > { %s5600_s24 = scalar_select %p4408_p4, 1, 0 }
  0x24   : > { %s5602_s25 = scalar_select %p4412_p5, 1, 0 }
  0x25   : > { %5601 = sst [smem:[#allocation36_spill]] %s5600_s24  ;;  %s580_s26 = sshll.u32 %s4246_s3, 4  ;;  %s581_s26 = int_to_ptr.vmem [resolvable:$true] %s580_s26 }
  0x26   : > { %p3618_p6 = pneg %p4412_p5  ;;  %s4247_s27 = smov [#allocation11]  }
  0x27   : > { %s602_s28 = sshll.u32 %s4247_s27, 4  ;;  %s5604_s20 = sld [smem:[#allocation41_spill]]  ;;  %s4424_s28 = int_to_ptr.vmem [resolvable:$true] %s602_s28 }
  0x28   : > { %p4420_p7 = pnand %p3618_p6, %p5555_p1 }
  0x2a   : > { %s5603_s29 = scalar_select %p4420_p7, 1, 0 }
  0x2b   : > { %p4434_p9 = pneg %p4420_p7 }
  0x2d   : > { %s5605_s19 = smov %s5604_s20  ;;  %s3854_s18 = scalar_lea.hbm %s5604_s20, 128 }
  0x2e   : > { %p3855_p8 = scmp.ne.s32.totalorder %s5605_s19, %s3854_s18  ;;  %p3861_p12 = scmp.lt.u32.totalorder %s3854_s18, %s5605_s19 }
  0x2f   : > { %s5606_s3 = scalar_select %p4434_p9, 1, 0 }
  0x30   : > { %p3857_p10 = pnand %p4434_p9, %p3855_p8 }
  0x32   : > { %p3858_p11 = pneg %p3857_p10 }
  0x34   : > { %p3863_p13 = pnand %p3861_p12, %p3858_p11 }
  0x36   : > { %3866 = shalt.err (!%p3863_p13)
}
  0x37   : > { %s3867_s0 = scalar_lea.vmem %s581_s26, 128  ;;  %p3875_p6 = scmp.lt.s32.totalorder %s581_s26, %s581_s26 }
  0x38   : > { %p3868_p0 = scmp.ne.s32.totalorder %s581_s26, %s3867_s0  ;;  %p3876_p1 = scmp.lt.s32.totalorder %s3867_s0, %s3867_s0 }
  0x3a   : > { %p3870_p2 = pnand %p3868_p0, %p4434_p9  ;;  %p3877_p4 = por %p3876_p1, %p3875_p6 }
  0x3c   : > { %p3871_p3 = pneg %p3870_p2 }
  0x3e   : > { %p3878_p5 = pnand %p3877_p4, %p3871_p3 }
  0x40   : > { %3881 = shalt.err (!%p3878_p5)
}
  0x41   : > { %3624 = dma.hbm_to_vmem [thread:$0]  (!%p4420_p7), %s5605_s19, 128, %s581_s26, [#allocation9]  }
  0x42   : > { %s5607_s4 = sld [smem:[#allocation43_spill]] }
  0x48   : > { %s3882_s30 = scalar_lea.hbm %s5607_s4, 16 }
  0x49   : > { %p3883_p8 = scmp.ne.s32.totalorder %s5607_s4, %s3882_s30  ;;  %p3889_p4 = scmp.lt.u32.totalorder %s3882_s30, %s5607_s4 }
  0x4b   : > { %p3885_p10 = pnand %p3883_p8, %p4434_p9 }
  0x4d   : > { %p3886_p1 = pneg %p3885_p10 }
  0x4f   : > { %p3891_p5 = pnand %p3889_p4, %p3886_p1 }
  0x51   : > { %3894 = shalt.err (!%p3891_p5)
}
  0x52   : > { %s3895_s26 = scalar_lea.vmem %s4424_s28, 16  ;;  %s3902_s15 = scalar_lea.vmem %s4424_s28, 32 }
  0x53   : > { %p3896_p11 = scmp.ne.s32.totalorder %s4424_s28, %s3895_s26  ;;  %p3903_p0 = scmp.lt.s32.totalorder %s4424_s28, %s4424_s28 }
  0x54   : > { %p3904_p2 = scmp.lt.s32.totalorder %s3902_s15, %s3895_s26 }
  0x55   : > { %p3898_p12 = pnand %p3896_p11, %p4434_p9 }
  0x56   : > { %p3905_p3 = por %p3904_p2, %p3903_p0 }
  0x57   : > { %p3899_p13 = pneg %p3898_p12 }
  0x59   : > { %p3906_p6 = pnand %p3905_p3, %p3899_p13 }
  0x5b   : > { %3909 = shalt.err (!%p3906_p6)
}
  0x5c   : > { %3630 = dma.hbm_to_vmem [thread:$0]  (!%p4420_p7), %s5607_s4, 16, %s4424_s28, [#allocation12]  }
  0x5d   : > { %s54_s14 = sadd.s32 1, %s4240_s17  ;;  %s226_s18 = sadd.s32 1, %s4232_s1 }
  0x5e   : > { %p55_p8 = scmp.ge.s32.totalorder %s54_s14, 2  ;;  %p233_p10 = scmp.ne.s32.totalorder %s4232_s1, %s4228_s21 }
  0x5f   : > { %p234_p1 = scmp.eq.s32.totalorder %s4244_s2, 0  ;;  %p3655_p4 = scmp.lt.s32.totalorder %s4244_s2, 2 }
  0x60   : > { %s5658_s14 = smov (%p55_p8, %s54_s14), 0  ;;  %s4486_s27 = sand.u32 1, %s4232_s1  }
  0x61   : > { %5608 = sst [smem:[#allocation37_spill]] %s5658_s14  ;;  %p235_p5 = por %p234_p1, %p233_p10 }
  0x62   : > { %s223_s20 = ssub.s32 %s4240_s17, %s5658_s14  ;;  %s4489_s0 = sshll.u32 %s4240_s17, 4 }
  0x63   : > { %p224_p11 = scmp.eq.s32.totalorder %s223_s20, 0  ;;  %s5610_s7 = sld [smem:[#allocation45_spill]] }
  0x64   : > { %s647_s16 = scalar_lea.vmem [#allocation14], %s4486_s27  ;;  %p4505_p12 = pnand %p3655_p4, %p235_p5 }
  0x65   : > { %s4492_s28 = scalar_select %p224_p11, %s4232_s1, %s226_s18  }
  0x66   : > { %s654_s20 = sshll.u32 %s647_s16, 4  ;;  %s5612_s10 = sld [smem:[#allocation47_spill]]  ;;  %s4501_s20 = int_to_ptr.vmem [resolvable:$true] %s654_s20 }
  0x67   : > { %5609 = sst [smem:[#allocation38_spill]] %s4492_s28  ;;  %s5613_s15 = sand.u32 1, %s4244_s2  }
  0x68   : > { %s5611_s30 = scalar_select %p4505_p12, 1, 0 }
  0x69   : > { %s4498_s8 = scalar_lea.hbm %s5610_s7, %s4489_s0  ;;  %s4517_s19 = scalar_lea.sflag [#allocation15], %s5613_s15 }
  0x6a   : > { %s3910_s14 = scalar_lea.hbm %s4498_s8, 16  ;;  %p4523_p0 = pneg %p4505_p12 }
  0x6b   : > { %p3911_p13 = scmp.ne.s32.totalorder %s4498_s8, %s3910_s14  ;;  %s3915_s4 = scalar_lea.hbm %s5610_s7, 32 }
  0x6c   : > { %s4513_s26 = scalar_lea.hbm %s5612_s10, %s4489_s0  ;;  %p3916_p6 = scmp.lt.u32.totalorder %s4498_s8, %s5610_s7 }
  0x6d   : > { %s5614_s16 = scalar_select %p4523_p0, 1, 0 }
  0x6e   : > { %p3913_p2 = pnand %p4523_p0, %p3911_p13  ;;  %p3917_p8 = scmp.lt.u32.totalorder %s3915_s4, %s3910_s14 }
  0x6f   : > { %p3919_p1 = scmp.lt.u32.totalorder %s3910_s14, %s4498_s8 }
  0x70   : > { %p3914_p3 = pneg %p3913_p2  ;;  %p3918_p10 = por %p3917_p8, %p3916_p6 }
  0x72   : > { %p3920_p4 = por %p3919_p1, %p3918_p10 }
  0x74   : > { %p3921_p5 = pnand %p3920_p4, %p3914_p3 }
  0x76   : > { %3924 = shalt.err (!%p3921_p5)
}
  0x77   : > { %s3925_s15 = scalar_lea.vmem %s4501_s20, 16  ;;  %s4248_s17 = smov [#allocation14]  }
  0x78   : > { %p3926_p11 = scmp.ne.s32.totalorder %s4501_s20, %s3925_s15  ;;  %s3930_s28 = sshll.u32 %s4248_s17, 4  ;;  %s3931_s28 = int_to_ptr.vmem [resolvable:$false] %s3930_s28 }
  0x79   : > { %s3932_s1 = scalar_lea.vmem %s3931_s28, 32  ;;  %p3933_p7 = scmp.lt.s32.totalorder %s4501_s20, %s3931_s28 }
  0x7a   : > { %p3928_p13 = pnand %p3926_p11, %p4523_p0  ;;  %p3934_p9 = scmp.lt.s32.totalorder %s3932_s1, %s3925_s15 }
  0x7c   : > { %p3929_p2 = pneg %p3928_p13  ;;  %p3935_p6 = por %p3934_p9, %p3933_p7 }
  0x7e   : > { %p3936_p8 = pnand %p3935_p6, %p3929_p2 }
  0x80   : > { %3939 = shalt.err (!%p3936_p8)
}
  0x81   : > { %3637 = dma.hbm_to_vmem [thread:$0]  (!%p4505_p12), %s4498_s8, 16, %s4501_s20, %s4517_s19  }
  0x82   : > { %s689_s14 = scalar_lea.vmem [#allocation17], %s4486_s27  ;;  %s5615_s18 = sand.u32 1, %s4244_s2  }
  0x83   : > { %s696_s4 = sshll.u32 %s689_s14, 4  ;;  %s4550_s15 = scalar_lea.sflag [#allocation18], %s5615_s18  ;;  %s697_s4 = int_to_ptr.vmem [resolvable:$true] %s696_s4 }
  0x84   : > { %s3940_s17 = scalar_lea.hbm %s4513_s26, 16  ;;  %s3945_s7 = scalar_lea.hbm %s5612_s10, 32 }
  0x85   : > { %p3941_p7 = scmp.ne.s32.totalorder %s4513_s26, %s3940_s17  ;;  %p3946_p10 = scmp.lt.u32.totalorder %s4513_s26, %s5612_s10 }
  0x86   : > { %p3947_p1 = scmp.lt.u32.totalorder %s3945_s7, %s3940_s17  ;;  %p3949_p5 = scmp.lt.u32.totalorder %s3940_s17, %s4513_s26 }
  0x87   : > { %p3943_p9 = pnand %p3941_p7, %p4523_p0 }
  0x88   : > { %p3948_p4 = por %p3947_p1, %p3946_p10 }
  0x89   : > { %p3944_p3 = pneg %p3943_p9 }
  0x8a   : > { %p3950_p11 = por %p3949_p5, %p3948_p4 }
  0x8c   : > { %p3951_p13 = pnand %p3950_p11, %p3944_p3 }
  0x8e   : > { %3954 = shalt.err (!%p3951_p13)
}
  0x8f   : > { %s3955_s8 = scalar_lea.vmem %s697_s4, 16  ;;  %s4249_s20 = smov [#allocation17]  }
  0x90   : > { %p3956_p2 = scmp.ne.s32.totalorder %s697_s4, %s3955_s8  ;;  %s3960_s14 = sshll.u32 %s4249_s20, 4  ;;  %s3961_s14 = int_to_ptr.vmem [resolvable:$false] %s3960_s14 }
  0x91   : > { %s3962_s18 = scalar_lea.vmem %s3961_s14, 32  ;;  %p3963_p7 = scmp.lt.s32.totalorder %s697_s4, %s3961_s14 }
  0x92   : > { %p3958_p6 = pnand %p3956_p2, %p4523_p0  ;;  %p3964_p9 = scmp.lt.s32.totalorder %s3962_s18, %s3955_s8 }
  0x94   : > { %p3959_p8 = pneg %p3958_p6  ;;  %p3965_p12 = por %p3964_p9, %p3963_p7 }
  0x96   : > { %p3966_p1 = pnand %p3965_p12, %p3959_p8 }
  0x98   : > { %3969 = shalt.err (!%p3966_p1)
}
  0x99   : > { %p5616_p10 = scmp.ne.s32.totalorder %s5611_s30, 0  ;;  %s4250_s6 = smov [#allocation5]  }
  0x9a   : > { %s566_s7 = sshll.u32 %s4250_s6, 4  ;;  %s5617_s28 = sld [smem:[#allocation40_spill]]  ;;  %s567_s7 = int_to_ptr.vmem [resolvable:$true] %s566_s7 }
  0x9b   : > { %3643 = dma.hbm_to_vmem [thread:$0]  (!%p5616_p10), %s4513_s26, 16, %s697_s4, %s4550_s15  }
  0x9c   : > { %p5618_p4 = scmp.ne.s32.totalorder %s5606_s3, 0 }
  0xa0   : > { %s3970_s1 = scalar_lea.hbm %s5617_s28, 256 }
  0xa1   : > { %p3971_p3 = scmp.ne.s32.totalorder %s5617_s28, %s3970_s1  ;;  %p3977_p11 = scmp.lt.u32.totalorder %s3970_s1, %s5617_s28 }
  0xa3   : > { %p3973_p12 = pnand %p3971_p3, %p5618_p4 }
  0xa5   : > { %p3974_p5 = pneg %p3973_p12 }
  0xa7   : > { %p3979_p13 = pnand %p3977_p11, %p3974_p5 }
  0xa9   : > { %3982 = shalt.err (!%p3979_p13)
}
  0xaa   : > { %s3983_s26 = scalar_lea.vmem %s567_s7, 256  ;;  %p3991_p7 = scmp.lt.s32.totalorder %s567_s7, %s567_s7 }
  0xab   : > { %p3984_p2 = scmp.ne.s32.totalorder %s567_s7, %s3983_s26  ;;  %p3992_p9 = scmp.lt.s32.totalorder %s3983_s26, %s3983_s26 }
  0xad   : > { %p3986_p6 = pnand %p3984_p2, %p5618_p4  ;;  %p3993_p1 = por %p3992_p9, %p3991_p7 }
  0xaf   : > { %p3987_p8 = pneg %p3986_p6 }
  0xb1   : > { %p3994_p10 = pnand %p3993_p1, %p3987_p8 }
  0xb3   : > { %3997 = shalt.err (!%p3994_p10)
}
  0xb4   : > { %s4251_s10 = smov 128   ;;  %s4252_s4 = smov 8  }
  0xb5   : > { %p5619_p3 = scmp.ne.s32.totalorder %s5603_s29, 0  ;;  %s4253_s13 = smov [#allocation10]  }
  0xb6   : > { %s591_s17 = sshll.u32 %s4253_s13, 4  ;;  %s4254_s1 = smov [#allocation13]   ;;  %s592_s17 = int_to_ptr.vmem [resolvable:$true] %s591_s17 }
  0xb7   : > { %3621 = dma.hbm_to_vmem [thread:$0]  (!%p5619_p3), %s5617_s28, 256, %s567_s7, [#allocation6], %s4251_s10, %s4251_s10, %s4252_s4  }
  0xb8   : > { %s613_s20 = sshll.u32 %s4254_s1, 4  ;;  %s5620_s26 = sld [smem:[#allocation42_spill]]  ;;  %s614_s20 = int_to_ptr.vmem [resolvable:$true] %s613_s20 }
  0xbe   : > { %s3998_s2 = scalar_lea.hbm %s5620_s26, 16 }
  0xbf   : > { %p3999_p10 = scmp.ne.s32.totalorder %s5620_s26, %s3998_s2  ;;  %p4005_p11 = scmp.lt.u32.totalorder %s3998_s2, %s5620_s26 }
  0xc1   : > { %p4001_p12 = pnand %p3999_p10, %p5618_p4 }
  0xc3   : > { %p4002_p5 = pneg %p4001_p12 }
  0xc5   : > { %p4007_p13 = pnand %p4005_p11, %p4002_p5 }
  0xc7   : > { %4010 = shalt.err (!%p4007_p13)
}
  0xc8   : > { %s4011_s7 = scalar_lea.vmem %s592_s17, 16  ;;  %s4018_s10 = scalar_lea.vmem %s592_s17, 32 }
  0xc9   : > { %p4012_p2 = scmp.ne.s32.totalorder %s592_s17, %s4011_s7  ;;  %p4019_p7 = scmp.lt.s32.totalorder %s592_s17, %s592_s17 }
  0xca   : > { %p4020_p9 = scmp.lt.s32.totalorder %s4018_s10, %s4011_s7 }
  0xcb   : > { %p4014_p6 = pnand %p4012_p2, %p5618_p4 }
  0xcc   : > { %p4021_p1 = por %p4020_p9, %p4019_p7 }
  0xcd   : > { %p4015_p8 = pneg %p4014_p6 }
  0xcf   : > { %p4022_p0 = pnand %p4021_p1, %p4015_p8 }
  0xd1   : > { %4025 = shalt.err (!%p4022_p0)
}
  0xd2   : > { %3627 = dma.hbm_to_vmem [thread:$0]  (!%p5619_p3), %s5620_s26, 16, %s592_s17, [#allocation9]  }
  0xd3   : > { %s4026_s23 = scalar_lea.hbm %s5532_s5, 16 }
  0xd4   : > { %p4027_p10 = scmp.ne.s32.totalorder %s5532_s5, %s4026_s23  ;;  %p4033_p0 = scmp.lt.u32.totalorder %s4026_s23, %s5532_s5 }
  0xd6   : > { %p4029_p12 = pnand %p4027_p10, %p5618_p4 }
  0xd8   : > { %p4030_p5 = pneg %p4029_p12 }
  0xda   : > { %p4035_p11 = pnand %p4033_p0, %p4030_p5 }
  0xdc   : > { %4038 = shalt.err (!%p4035_p11)
}
  0xdd   : > { %s4039_s1 = scalar_lea.vmem %s614_s20, 16  ;;  %s4046_s17 = scalar_lea.vmem %s614_s20, 32 }
  0xde   : > { %p4040_p13 = scmp.ne.s32.totalorder %s614_s20, %s4039_s1  ;;  %p4047_p8 = scmp.lt.s32.totalorder %s614_s20, %s614_s20 }
  0xdf   : > { %p4048_p7 = scmp.lt.s32.totalorder %s4046_s17, %s4039_s1 }
  0xe0   : > { %p4042_p2 = pnand %p4040_p13, %p5618_p4 }
  0xe1   : > { %p4049_p9 = por %p4048_p7, %p4047_p8 }
  0xe2   : > { %p4043_p6 = pneg %p4042_p2 }
  0xe4   : > { %p4050_p1 = pnand %p4049_p9, %p4043_p6 }
  0xe6   : > { %4053 = shalt.err (!%p4050_p1)
}
  0xe7   : > { %3633 = dma.hbm_to_vmem [thread:$0]  (!%p5619_p3), %s5532_s5, 16, %s614_s20, [#allocation12]  }
  0xe8   : > { %s4628_s3 = scalar_lea.hbm %s5536_s9, %s4489_s0  ;;  %s672_s22 = scalar_lea.vmem [#allocation16], %s4486_s27 }
  0xe9   : > { %s679_s24 = sshll.u32 %s672_s22, 4  ;;  %s4054_s29 = scalar_lea.hbm %s4628_s3, 16  ;;  %s680_s24 = int_to_ptr.vmem [resolvable:$true] %s679_s24 }
  0xea   : > { %p4055_p4 = scmp.ne.s32.totalorder %s4628_s3, %s4054_s29  ;;  %p5621_p10 = scmp.ne.s32.totalorder %s5614_s16, 0 }
  0xeb   : > { %s4059_s20 = scalar_lea.hbm %s5536_s9, 32  ;;  %p4060_p3 = scmp.lt.u32.totalorder %s4628_s3, %s5536_s9 }
  0xec   : > { %p4057_p12 = pnand %p4055_p4, %p5621_p10  ;;  %p4061_p0 = scmp.lt.u32.totalorder %s4059_s20, %s4054_s29 }
  0xed   : > { %p4063_p13 = scmp.lt.u32.totalorder %s4054_s29, %s4628_s3 }
  0xee   : > { %p4058_p5 = pneg %p4057_p12  ;;  %p4062_p11 = por %p4061_p0, %p4060_p3 }
  0xf0   : > { %p4064_p2 = por %p4063_p13, %p4062_p11 }
  0xf2   : > { %p4065_p6 = pnand %p4064_p2, %p4058_p5 }
  0xf4   : > { %4068 = shalt.err (!%p4065_p6)
}
  0xf5   : > { %s4069_s18 = scalar_lea.vmem %s680_s24, 16  ;;  %s4255_s6 = smov [#allocation16]  }
  0xf6   : > { %p4070_p8 = scmp.ne.s32.totalorder %s680_s24, %s4069_s18  ;;  %s4074_s13 = sshll.u32 %s4255_s6, 4  ;;  %s4075_s13 = int_to_ptr.vmem [resolvable:$false] %s4074_s13 }
  0xf7   : > { %s4076_s1 = scalar_lea.vmem %s4075_s13, 32  ;;  %p4077_p1 = scmp.lt.s32.totalorder %s680_s24, %s4075_s13 }
  0xf8   : > { %p4072_p7 = pnand %p4070_p8, %p5621_p10  ;;  %p4078_p4 = scmp.lt.s32.totalorder %s4076_s1, %s4069_s18 }
  0xfa   : > { %p4073_p9 = pneg %p4072_p7  ;;  %p4079_p12 = por %p4078_p4, %p4077_p1 }
  0xfc   : > { %p4080_p0 = pnand %p4079_p12, %p4073_p9 }
  0xfe   : > { %4083 = shalt.err (!%p4080_p0)
}
  0xff   : > { %p5622_p3 = scmp.ne.s32.totalorder %s5611_s30, 0  ;;  %s4653_s14 = scalar_lea.hbm %s5538_s11, %s4489_s0 }
 0x100   : > { %s706_s7 = scalar_lea.vmem [#allocation19], %s4486_s27  ;;  %s4084_s22 = scalar_lea.hbm %s4653_s14, 16 }
 0x101   : > { %3640 = dma.hbm_to_vmem [thread:$0]  (!%p5622_p3), %s4628_s3, 16, %s680_s24, %s4517_s19  }
 0x102   : > { %s713_s10 = sshll.u32 %s706_s7, 4  ;;  %p4085_p5 = scmp.ne.s32.totalorder %s4653_s14, %s4084_s22  ;;  %s714_s10 = int_to_ptr.vmem [resolvable:$true] %s713_s10 }
 0x103   : > { %s4089_s19 = scalar_lea.hbm %s5538_s11, 32  ;;  %p4090_p2 = scmp.lt.u32.totalorder %s4653_s14, %s5538_s11 }
 0x104   : > { %p4087_p11 = pnand %p4085_p5, %p5621_p10  ;;  %p4091_p6 = scmp.lt.u32.totalorder %s4089_s19, %s4084_s22 }
 0x105   : > { %p4093_p7 = scmp.lt.u32.totalorder %s4084_s22, %s4653_s14 }
 0x106   : > { %p4088_p13 = pneg %p4087_p11  ;;  %p4092_p8 = por %p4091_p6, %p4090_p2 }
 0x108   : > { %p4094_p9 = por %p4093_p7, %p4092_p8 }
 0x10a   : > { %p4095_p1 = pnand %p4094_p9, %p4088_p13 }
 0x10c   : > { %4098 = shalt.err (!%p4095_p1)
}
 0x10d   : > { %s4099_s2 = scalar_lea.vmem %s714_s10, 16  ;;  %s4256_s20 = smov [#allocation19]  }
 0x10e   : > { %p4100_p4 = scmp.ne.s32.totalorder %s714_s10, %s4099_s2  ;;  %s4104_s23 = sshll.u32 %s4256_s20, 4  ;;  %s4105_s23 = int_to_ptr.vmem [resolvable:$false] %s4104_s23 }
 0x10f   : > { %s4106_s4 = scalar_lea.vmem %s4105_s23, 32  ;;  %p4107_p5 = scmp.lt.s32.totalorder %s714_s10, %s4105_s23 }
 0x110   : > { %p4102_p12 = pnand %p4100_p4, %p5621_p10  ;;  %p4108_p11 = scmp.lt.s32.totalorder %s4106_s4, %s4099_s2 }
 0x112   : > { %p4103_p0 = pneg %p4102_p12  ;;  %p4109_p3 = por %p4108_p11, %p4107_p5 }
 0x114   : > { %p4110_p2 = pnand %p4109_p3, %p4103_p0 }
 0x116   : > { %4113 = shalt.err (!%p4110_p2)
}
 0x117   : > { %p5623_p6 = scmp.ne.s32.totalorder %s5611_s30, 0  ;;  %s4678_s13 = scalar_lea.hbm %s5539_s12, %s4489_s0 }
 0x118   : > { %s723_s1 = scalar_lea.vmem [#allocation20], %s4486_s27  ;;  %s721_s8 = scalar_lea.sflag [#allocation21], %s4486_s27 }
 0x119   : > { %3646 = dma.hbm_to_vmem [thread:$0]  (!%p5623_p6), %s4653_s14, 16, %s714_s10, %s4550_s15  }
 0x11a   : > { %s730_s17 = sshll.u32 %s723_s1, 4  ;;  %s4114_s7 = scalar_lea.hbm %s4678_s13, 16  ;;  %s731_s17 = int_to_ptr.vmem [resolvable:$true] %s730_s17 }
 0x11b   : > { %p4115_p3 = scmp.ne.s32.totalorder %s4678_s13, %s4114_s7  ;;  %s4119_s14 = scalar_lea.hbm %s5539_s12, 32 }
 0x11c   : > { %p4120_p7 = scmp.lt.u32.totalorder %s4678_s13, %s5539_s12  ;;  %p4121_p9 = scmp.lt.u32.totalorder %s4119_s14, %s4114_s7 }
 0x11d   : > { %p4117_p13 = pnand %p4115_p3, %p5621_p10  ;;  %p4123_p4 = scmp.lt.u32.totalorder %s4114_s7, %s4678_s13 }
 0x11e   : > { %p4122_p1 = por %p4121_p9, %p4120_p7 }
 0x11f   : > { %p4118_p8 = pneg %p4117_p13 }
 0x120   : > { %p4124_p12 = por %p4123_p4, %p4122_p1 }
 0x122   : > { %p4125_p0 = pnand %p4124_p12, %p4118_p8 }
 0x124   : > { %4128 = shalt.err (!%p4125_p0)
}
 0x125   : > { %s4129_s27 = scalar_lea.vmem %s731_s17, 16  ;;  %s4257_s29 = smov [#allocation20]  }
 0x126   : > { %p4130_p5 = scmp.ne.s32.totalorder %s731_s17, %s4129_s27  ;;  %s4134_s21 = sshll.u32 %s4257_s29, 4  ;;  %s4135_s21 = int_to_ptr.vmem [resolvable:$false] %s4134_s21 }
 0x127   : > { %s4136_s19 = scalar_lea.vmem %s4135_s21, 32  ;;  %p4137_p3 = scmp.lt.s32.totalorder %s731_s17, %s4135_s21 }
 0x128   : > { %p4132_p11 = pnand %p4130_p5, %p5621_p10  ;;  %p4138_p13 = scmp.lt.s32.totalorder %s4136_s19, %s4129_s27 }
 0x12a   : > { %p4133_p2 = pneg %p4132_p11  ;;  %p4139_p6 = por %p4138_p13, %p4137_p3 }
 0x12c   : > { %p4140_p7 = pnand %p4139_p6, %p4133_p2 }
 0x12e   : > { %4143 = shalt.err (!%p4140_p7)
}
 0x12f   : > { %p5624_p9 = scmp.ne.s32.totalorder %s5611_s30, 0  ;;  %p5625_p8 = scmp.ne.s32.totalorder %s5602_s25, 0 }
 0x130   : > { %s5626_s3 = sld [smem:[#allocation35_spill]] (!%p5625_p8) }
 0x131   : > { %3649 = dma.hbm_to_vmem [thread:$0]  (!%p5624_p9), %s4678_s13, 16, %s731_s17, %s721_s8  }
 0x132   : > { %745 = sbr.rel (%p5625_p8) target bundleno = 2181 (0x885), region = 92 }
 0x136   : > { %p5627_p1 = scmp.eq.s32.totalorder (!%p5625_p8), %s5626_s3, 0 }
 0x139   : > { %4195 = dma.done.wait (%p5627_p1), [#allocation6], 256   ;;  %p5628_p10 = pmov %p5627_p1 }
 0x13a   : > { %p5629_p4 = pmov %p5627_p1 }
 0x13b   : > { %4197 = vsyncadd (%p5628_p10), [#allocation6], 4294967040 }
 0x13c   : > { %4199 = dma.done.wait (%p5629_p4), [#allocation9], 144   ;;  %p5630_p12 = pmov %p5627_p1 }
 0x13d   : > { %p5631_p6 = pmov %p5627_p1 }
 0x13e   : > { %4201 = vsyncadd (%p5630_p12), [#allocation9], 4294967152 }
 0x13f   : > { %4203 = dma.done.wait (%p5631_p6), [#allocation12], 32   ;;  %p5632_p0 = pmov %p5627_p1 }
 0x140   : > { %s5633_s25 = sld [smem:[#allocation30_spill]]  ;;  %s767_s16 = sand.u32 1, %s5626_s3  }
 0x141   : > { %4205 = vsyncadd (%p5632_p0), [#allocation12], 4294967264  ;;  %s5634_s30 = sld [smem:[#allocation36_spill]]  ;;  %s768_s2 = scalar_lea.sflag [#allocation15], %s767_s16 }
 0x146   : > { %s4715_s24 = sand.u32 1, %s5633_s25  }
 0x147   : > { %s770_s20 = scalar_lea.vmem [#allocation14], %s4715_s24  ;;  %p5635_p5 = scmp.ne.s32.totalorder %s5634_s30, 0 }
 0x149   : > { %4207 = dma.done.wait (%p5635_p5), %s768_s2, 32  }
 0x14a   : > { %4209 = vsyncadd (%p5635_p5), %s768_s2, 4294967264  ;;  %s778_s23 = scalar_lea.vmem [#allocation16], %s4715_s24  ;;  %s784_s4 = scalar_lea.sflag [#allocation18], %s767_s16 }
 0x14b   : > { %s786_s18 = scalar_lea.vmem [#allocation17], %s4715_s24 }
 0x14c   : > { %4211 = dma.done.wait (%p5635_p5), %s784_s4, 32  }
 0x14d   : > { %4213 = vsyncadd (%p5635_p5), %s784_s4, 4294967264  ;;  %s794_s6 = scalar_lea.vmem [#allocation19], %s4715_s24  ;;  %s800_s13 = scalar_lea.sflag [#allocation21], %s4715_s24 }
 0x14e   : > { %s802_s1 = scalar_lea.vmem [#allocation20], %s4715_s24 }
 0x14f   : > { %4215 = dma.done.wait (%p5635_p5), %s800_s13, 16  }
 0x150   : > { %4217 = vsyncadd (%p5635_p5), %s800_s13, 4294967280  ;;  %s5636_s17 = sld [smem:[#allocation32_spill]]  ;;  %s5637_s14 = sld [smem:[#allocation48_spill]]  ;;  %v4754_v1 = vld [vmem:[#allocation5] sm:$0xff]  ;;  %v4756_v2 = vld [vmem:[#allocation5 + $0x8] sm:$0xff] }
 0x151   : > { %s5638_s29 = sld [smem:[#allocation44_spill]]  ;;  %s5639_s25 = sld [smem:[#allocation46_spill]] }
 0x156   : > { %p896_p11 = scmp.lt.s32.totalorder %s5636_s17, 1  ;;  %p3386_p2 = scmp.ne.s32.totalorder %s5636_s17, 0 }
 0x157   : > { %v923_v3 = vld [vmem:[#allocation8] sm:$0x7f] (!%p3386_p2)  ;;  %vm938_vm0 = vcmask (!%p3386_p2), 1046528   ;;  %s5640_s4 = sld [smem:[#allocation39_spill]] (!%p3386_p2)  ;;  %vm931_vm1 = vcmask (!%p3386_p2), 56320   ;;  %v1021_v6 = vlaneseq (!%p3386_p2)  ;;  %vm1017_vm2 = vcmask (!%p3386_p2), 261120  }
 0x158   : > { %s4737_s8 = scalar_select %p896_p11, %s5636_s17, 1 }
 0x159   : > { %920 = sbr.rel (%p3386_p2) target bundleno = 567 (0x237), region = 136  ;;  %3487 = vmatprep.subr.msk.mxu0 (!%p3386_p2), %vm938_vm0, %v923_v3  ;;  %v1022_v7 = vshrl.u32 (!%p3386_p2), %v1021_v6, 7  ;;  %v3391_v32 = vld [vmem:[#allocation13] ss:$0 sm:$0xff] (!%p3386_p2)  ;;  %v3392_v34 = vld [vmem:[#allocation11] ss:$0 sm:$0xff] (!%p3386_p2) }
 0x15a   : > { %s3447_s7 = sshll.u32 %s4737_s8, 5  ;;  %s908_s10 = scalar_lea.vmem %s5637_s14, %s4737_s8  ;;  %3488 = vmatpush3.msk.msra.mxu0 (!%p3386_p2), %vm938_vm0, %v923_v3 }
 0x15b   : > { %s4747_s21 = scalar_lea.vmem %s5638_s29, %s3447_s7  ;;  %s4752_s30 = scalar_lea.vmem %s5639_s25, %s3447_s7  ;;  %v1037_v8 = vsub.s32 (!%p3386_p2), 2, %v1022_v7  ;;  %v1023_v9 = vsub.s32 (!%p3386_p2), 0, %v1022_v7  ;;  %v1044_v10 = vsub.s32 (!%p3386_p2), 3, %v1022_v7  ;;  %v1030_v11 = vsub.s32 (!%p3386_p2), 1, %v1022_v7 }
 0x15c   : > { %v1058_v16 = vsub.s32 (!%p3386_p2), 5, %v1022_v7  ;;  %v1051_v17 = vsub.s32 (!%p3386_p2), 4, %v1022_v7  ;;  %v1072_v20 = vsub.s32 (!%p3386_p2), 7, %v1022_v7  ;;  %v1065_v21 = vsub.s32 (!%p3386_p2), 6, %v1022_v7 }
 0x15d   : > { %v921_v4 = vld [vmem:[%s5640_s4] sm:$0xff] (!%p3386_p2)  ;;  %v922_v5 = vld [vmem:[%s5640_s4 + $0x8] sm:$0xff] (!%p3386_p2)  ;;  %v1038_v12 = vrot.slane (!%p3386_p2), %v4754_v1, %v1037_v8  ;;  %v1024_v13 = vrot.slane (!%p3386_p2), %v4754_v1, %v1023_v9  ;;  %v1045_v14 = vrot.slane (!%p3386_p2), %v4754_v1, %v1044_v10  ;;  %v1031_v15 = vrot.slane (!%p3386_p2), %v4754_v1, %v1030_v11 }
 0x15e   : > { %3489 = vmatprep.mubr.msk.f32.mxu0 (!%p3386_p2), %vm931_vm1, %v921_v4  ;;  %v1059_v18 = vrot.slane (!%p3386_p2), %v4754_v1, %v1058_v16  ;;  %v1052_v19 = vrot.slane (!%p3386_p2), %v4754_v1, %v1051_v17  ;;  %v1073_v22 = vrot.slane (!%p3386_p2), %v4754_v1, %v1072_v20  ;;  %v1066_v23 = vrot.slane (!%p3386_p2), %v4754_v1, %v1065_v21 }
 0x15f   : > { %3490 = vmatmul.mubr.msk.f32.vlgmr.msra.gmra.mrb[0].mxu0 (!%p3386_p2), %vm931_vm1, %v922_v5  ;;  %1040 = vbcast.lane.b32.xlu1 (!%p3386_p2), %v1038_v12, 256  ;;  %v1087_v24 = vrot.slane (!%p3386_p2), %v4756_v2, %v1030_v11  ;;  %v1080_v25 = vrot.slane (!%p3386_p2), %v4756_v2, %v1023_v9  ;;  %v1101_v26 = vrot.slane (!%p3386_p2), %v4756_v2, %v1044_v10 }
 0x160   : > { %1026 = vbcast.lane.b32.xlu0 %v1024_v13, 256  ;;  %v1094_v27 = vrot.slane %v4756_v2, %v1037_v8  ;;  %v1115_v28 = vrot.slane %v4756_v2, %v1058_v16  ;;  %v1108_v29 = vrot.slane %v4756_v2, %v1051_v17  ;;  %v1129_v30 = vrot.slane %v4756_v2, %v1072_v20  ;;  %v3387_v20 = vld [vmem:[#allocation10] ss:$0 sm:$0xff] }
 0x161   : > { %v1122_v31 = vrot.slane %v4756_v2, %v1065_v21 }
 0x163   : > { %1047 = vbcast.lane.b32.xlu1 %v1045_v14, 256 }
 0x164   : > { %1033 = vbcast.lane.b32.xlu0 %v1031_v15, 256 }
 0x167   : > { %1061 = vbcast.lane.b32.xlu1 %v1059_v18, 256 }
 0x168   : > { %1054 = vbcast.lane.b32.xlu0 %v1052_v19, 256 }
 0x16b   : > { %1075 = vbcast.lane.b32.xlu1 %v1073_v22, 256 }
 0x16c   : > { %1068 = vbcast.lane.b32.xlu0 %v1066_v23, 256 }
 0x16f   : > { %1089 = vbcast.lane.b32.xlu1 %v1087_v24, 256 }
 0x170   : > { %1082 = vbcast.lane.b32.xlu0 %v1080_v25, 256 }
 0x173   : > { %1103 = vbcast.lane.b32.xlu1 %v1101_v26, 256 }
 0x174   : > { %1096 = vbcast.lane.b32.xlu0 %v1094_v27, 256 }
 0x177   : > { %1117 = vbcast.lane.b32.xlu1 %v1115_v28, 256 }
 0x178   : > { %1110 = vbcast.lane.b32.xlu0 %v1108_v29, 256 }
 0x17b   : > { %1131 = vbcast.lane.b32.xlu1 %v1129_v30, 256 }
 0x17c   : > { %1124 = vbcast.lane.b32.xlu0 %v1122_v31, 256 }
 0x1d1   : > { %v1041_v33 = vpop.permute.xlu1 %1040 }
 0x1d2   : > { %v1027_v35 = vpop.permute.xlu0 %1026  ;;  %v1142_v36 = vmul.f32 %v3391_v32, %v1041_v33 }
 0x1d3   : > { %v1140_v37 = vmul.f32 %v3391_v32, %v1027_v35 }
 0x1d4   : > { %v1164_v38 = vadd.f32 %v3392_v34, %v1142_v36 }
 0x1d5   : > { %v1162_v39 = vadd.f32 %v3392_v34, %v1140_v37  ;;  %v1048_v40 = vpop.permute.xlu1 %1047 }
 0x1d6   : > { %v1034_v41 = vpop.permute.xlu0 %1033  ;;  %1180 = vst.msk [vmem:[#allocation3 + $0x10] sm:$0xff] %vm1017_vm2, %v1164_v38  ;;  %v1143_v42 = vmul.f32 %v3391_v32, %v1048_v40 }
 0x1d7   : > { %1178 = vst.msk [vmem:[#allocation3] sm:$0xff] %vm1017_vm2, %v1162_v39  ;;  %v1141_v43 = vmul.f32 %v3391_v32, %v1034_v41 }
 0x1d8   : > { %v1165_v44 = vadd.f32 %v3392_v34, %v1143_v42 }
 0x1d9   : > { %v1163_v45 = vadd.f32 %v3392_v34, %v1141_v43  ;;  %v1062_v46 = vpop.permute.xlu1 %1061 }
 0x1da   : > { %v1055_v47 = vpop.permute.xlu0 %1054  ;;  %1181 = vst.msk [vmem:[#allocation3 + $0x18] sm:$0xff] %vm1017_vm2, %v1165_v44  ;;  %v1145_v48 = vmul.f32 %v3391_v32, %v1062_v46 }
 0x1db   : > { %1179 = vst.msk [vmem:[#allocation3 + $0x8] sm:$0xff] %vm1017_vm2, %v1163_v45  ;;  %v1144_v49 = vmul.f32 %v3391_v32, %v1055_v47 }
 0x1dc   : > { %v1167_v50 = vadd.f32 %v3392_v34, %v1145_v48 }
 0x1dd   : > { %v1166_v51 = vadd.f32 %v3392_v34, %v1144_v49  ;;  %v1076_v52 = vpop.permute.xlu1 %1075 }
 0x1de   : > { %v1069_v53 = vpop.permute.xlu0 %1068  ;;  %1183 = vst.msk [vmem:[#allocation3 + $0x28] sm:$0xff] %vm1017_vm2, %v1167_v50  ;;  %v1147_v54 = vmul.f32 %v3391_v32, %v1076_v52 }
 0x1df   : > { %1182 = vst.msk [vmem:[#allocation3 + $0x20] sm:$0xff] %vm1017_vm2, %v1166_v51  ;;  %v1146_v55 = vmul.f32 %v3391_v32, %v1069_v53 }
 0x1e0   : > { %v1169_v56 = vadd.f32 %v3392_v34, %v1147_v54 }
 0x1e1   : > { %v1168_v57 = vadd.f32 %v3392_v34, %v1146_v55  ;;  %v1090_v58 = vpop.permute.xlu1 %1089 }
 0x1e2   : > { %v1083_v59 = vpop.permute.xlu0 %1082  ;;  %1185 = vst.msk [vmem:[#allocation3 + $0x38] sm:$0xff] %vm1017_vm2, %v1169_v56  ;;  %v1149_v60 = vmul.f32 %v3391_v32, %v1090_v58 }
 0x1e3   : > { %1184 = vst.msk [vmem:[#allocation3 + $0x30] sm:$0xff] %vm1017_vm2, %v1168_v57  ;;  %v1148_v61 = vmul.f32 %v3391_v32, %v1083_v59 }
 0x1e4   : > { %v1171_v62 = vadd.f32 %v3392_v34, %v1149_v60 }
 0x1e5   : > { %v1170_v63 = vadd.f32 %v3392_v34, %v1148_v61  ;;  %v1104_v0 = vpop.permute.xlu1 %1103 }
 0x1e6   : > { %v1097_v3 = vpop.permute.xlu0 %1096  ;;  %1187 = vst.msk [vmem:[#allocation3 + $0x48] sm:$0xff] %vm1017_vm2, %v1171_v62  ;;  %v1151_v4 = vmul.f32 %v3391_v32, %v1104_v0 }
 0x1e7   : > { %1186 = vst.msk [vmem:[#allocation3 + $0x40] sm:$0xff] %vm1017_vm2, %v1170_v63  ;;  %v1150_v5 = vmul.f32 %v3391_v32, %v1097_v3 }
 0x1e8   : > { %v1173_v6 = vadd.f32 %v3392_v34, %v1151_v4 }
 0x1e9   : > { %v1172_v7 = vadd.f32 %v3392_v34, %v1150_v5  ;;  %v1118_v8 = vpop.permute.xlu1 %1117 }
 0x1ea   : > { %v1111_v9 = vpop.permute.xlu0 %1110  ;;  %1189 = vst.msk [vmem:[#allocation3 + $0x58] sm:$0xff] %vm1017_vm2, %v1173_v6  ;;  %v1153_v10 = vmul.f32 %v3391_v32, %v1118_v8 }
 0x1eb   : > { %1188 = vst.msk [vmem:[#allocation3 + $0x50] sm:$0xff] %vm1017_vm2, %v1172_v7  ;;  %v1152_v11 = vmul.f32 %v3391_v32, %v1111_v9 }
 0x1ec   : > { %v1175_v12 = vadd.f32 %v3392_v34, %v1153_v10 }
 0x1ed   : > { %v1174_v13 = vadd.f32 %v3392_v34, %v1152_v11  ;;  %v1132_v14 = vpop.permute.xlu1 %1131 }
 0x1ee   : > { %v1125_v15 = vpop.permute.xlu0 %1124  ;;  %1191 = vst.msk [vmem:[#allocation3 + $0x68] sm:$0xff] %vm1017_vm2, %v1175_v12  ;;  %v1155_v16 = vmul.f32 %v3391_v32, %v1132_v14 }
 0x1ef   : > { %1190 = vst.msk [vmem:[#allocation3 + $0x60] sm:$0xff] %vm1017_vm2, %v1174_v13  ;;  %v1154_v17 = vmul.f32 %v3391_v32, %v1125_v15 }
 0x1f0   : > { %v1177_v18 = vadd.f32 %v3392_v34, %v1155_v16 }
 0x1f1   : > { %v1176_v19 = vadd.f32 %v3392_v34, %v1154_v17 }
 0x1f2   : > { %1193 = vst.msk [vmem:[#allocation3 + $0x78] sm:$0xff] %vm1017_vm2, %v1177_v18 }
 0x1f3   : > { %1192 = vst.msk [vmem:[#allocation3 + $0x70] sm:$0xff] %vm1017_vm2, %v1176_v19 }
 0x232   : > { %v3491_v21 = vpop.f32.mrb[0].mxu0 }
 0x233   : > { %v1014_v22 = vadd.f32 %v3491_v21, %v3387_v20  ;;  %v1008_v23 = vpop.f32.mrb[1].mxu0 }
 0x234   : > { %v1009_v24 = vadd.f32 %v3387_v20, %v1008_v23 }
 0x235   : > { %1019 = vst.msk [vmem:[#allocation2 + $0x8] sm:$0xff] %vm1017_vm2, %v1014_v22 }
 0x236   : > { %1018 = vst.msk [vmem:[#allocation2] sm:$0xff] %vm1017_vm2, %v1009_v24 }
 0x237 PF: > { %v1212_v25 = vld [vmem:[%s4747_s21] sm:$0xff]  ;;  %v1213_v26 = vld [vmem:[%s4747_s21 + $0x8] sm:$0xff]  ;;  %vm1223_vm3 = vcmask 261120   ;;  %v5578_v28 = vlaneseq  ;;  %v1214_v31 = vld [vmem:[%s4747_s21 + $0x10] sm:$0xff]  ;;  %v4258_v15 = vmov 1966171168  }
 0x238   : > { %v1305_v27 = vld [vmem:[%s4752_s30] sm:$0xff]  ;;  %v3553_v29 = vpack.c.bf16 %v1213_v26, %v1212_v25  ;;  %v1306_v30 = vld [vmem:[%s4752_s30 + $0x8] sm:$0xff]  ;;  %v1215_v32 = vld [vmem:[%s4747_s21 + $0x18] sm:$0xff]  ;;  %v1513_v16 = vunpack.c.l.s4 %v4258_v15  ;;  %s4261_s17 = smov 32   ;;  %vm2121_vm4 = vcmask 785920   ;;  %vm2250_vm5 = vcmask 1041409  }
 0x239   : > { %v3561_v33 = vpack.c.bf16 %v1306_v30, %v1305_v27  ;;  %v3557_v34 = vpack.c.bf16 %v1215_v32, %v1214_v31  ;;  %v1307_v35 = vld [vmem:[%s4752_s30 + $0x10] sm:$0xff]  ;;  %v1308_v36 = vld [vmem:[%s4752_s30 + $0x18] sm:$0xff]  ;;  %v4808_v38 = vshrl.u32 %v5578_v28, 7  ;;  %v1202_v40 = vld [vmem:[#allocation3 + $0x30] sm:$0xff]  ;;  %vm2252_vm6 = vcmask 1042434   ;;  %s5642_s24 = sld [smem:[#allocation32_spill]] }
 0x23a   : > { %3554 = vmatprep.subr.bf16.mxu0 %v3553_v29  ;;  %v3565_v39 = vpack.c.bf16 %v1308_v36, %v1307_v35  ;;  %3520 = vmatprep.mubr.msk.f32.mxu1 %vm1223_vm3, %v1202_v40  ;;  %v1203_v46 = vld [vmem:[#allocation3 + $0x38] sm:$0xff]  ;;  %v1204_v47 = vld [vmem:[#allocation3 + $0x40] sm:$0xff]  ;;  %v1205_v52 = vld [vmem:[#allocation3 + $0x48] sm:$0xff]  ;;  %v1514_v17 = vunpack.c.0.s8 %v1513_v16  ;;  %vm2254_vm7 = vcmask 1043459   ;;  %vm2256_vm8 = vcmask 1044484  }
 0x23b   : > { %3580 = vmatprep.subr.bf16.mxu1 %v3561_v33  ;;  %3556 = vmatpush3.bf16.msra.mxu0 %v3553_v29  ;;  %v4812_v41 = vsub.s32 0, %v4808_v38  ;;  %v1922_v42 = vsub.s32 1, %v4808_v38  ;;  %v1929_v49 = vsub.s32 2, %v4808_v38  ;;  %v1196_v50 = vld [vmem:[#allocation3] sm:$0xff]  ;;  %v1206_v53 = vld [vmem:[#allocation3 + $0x50] sm:$0xff]  ;;  %v1936_v55 = vsub.s32 3, %v4808_v38 }
 0x23c   : > { %3582 = vmatpush3.bf16.msra.mxu1 %v3561_v33  ;;  %3558 = vmatprep.subr.bf16.mxu0 %v3557_v34  ;;  %v1195_v45 = vld [vmem:[#allocation2 + $0x8] sm:$0xff]  ;;  %v1197_v57 = vld [vmem:[#allocation3 + $0x8] sm:$0xff]  ;;  %v1198_v59 = vld [vmem:[#allocation3 + $0x10] sm:$0xff]  ;;  %v1943_v62 = vsub.s32 4, %v4808_v38  ;;  %v1950_v7 = vsub.s32 5, %v4808_v38  ;;  %v1957_v12 = vsub.s32 6, %v4808_v38  ;;  %v4861_v20 = vsub.s32 %v1514_v17, %v4808_v38 }
 0x23d   : > { %v1194_v37 = vld [vmem:[#allocation2] sm:$0xff]  ;;  %3581 = vmatprep.subr.bf16.mxu1 %v3565_v39  ;;  %v1916_v43 = vrot.slane %v4754_v1, %v4812_v41  ;;  %v1923_v44 = vrot.slane %v4754_v1, %v1922_v42  ;;  %v1972_v48 = vrot.slane %v4756_v2, %v4812_v41  ;;  %v1979_v51 = vrot.slane %v4756_v2, %v1922_v42  ;;  %v1207_v58 = vld [vmem:[#allocation3 + $0x58] sm:$0xff]  ;;  %v1208_v60 = vld [vmem:[#allocation3 + $0x60] sm:$0xff] }
 0x23e   : > { %3500 = vmatprep.mubr.msk.f32.mxu0 %vm1223_vm3, %v1194_v37  ;;  %v1930_v54 = vrot.slane %v4754_v1, %v1929_v49  ;;  %v1986_v56 = vrot.slane %v4756_v2, %v1929_v49  ;;  %v1937_v61 = vrot.slane %v4754_v1, %v1936_v55  ;;  %v1993_v63 = vrot.slane %v4756_v2, %v1936_v55  ;;  %v1199_v0 = vld [vmem:[#allocation3 + $0x18] sm:$0xff]  ;;  %v1209_v3 = vld [vmem:[#allocation3 + $0x68] sm:$0xff]  ;;  %v1200_v4 = vld [vmem:[#allocation3 + $0x20] sm:$0xff] }
 0x23f   : > { %3560 = vmatpush3.bf16.msra.mxu0 %v3557_v34  ;;  %1918 = vbcast.lane.b32.xlu0 %v1916_v43, 256  ;;  %v1210_v5 = vld [vmem:[#allocation3 + $0x70] sm:$0xff]  ;;  %v1944_v6 = vrot.slane %v4754_v1, %v1943_v62  ;;  %v2000_v8 = vrot.slane %v4756_v2, %v1943_v62  ;;  %v1201_v9 = vld [vmem:[#allocation3 + $0x28] sm:$0xff]  ;;  %v1211_v10 = vld [vmem:[#allocation3 + $0x78] sm:$0xff]  ;;  %v1951_v11 = vrot.slane %v4754_v1, %v1950_v7  ;;  %vm2258_vm9 = vcmask 1045509   ;;  %p3433_p3 = scmp.ne.s32.totalorder %s5642_s24, 1 }
 0x240   : > { %3583 = vmatpush3.bf16.msra.mxu1 %v3565_v39  ;;  %3562 = vmatprep.subr.bf16.mxu0 %v3561_v33  ;;  %v2007_v13 = vrot.slane %v4756_v2, %v1950_v7  ;;  %v1958_v14 = vrot.slane %v4754_v1, %v1957_v12  ;;  %v3393_v18 = vld [vmem:[%s770_s20] ss:$0 sm:$0xff]  ;;  %s4259_s20 = smov 64   ;;  %vm2260_vm10 = vcmask 1046534   ;;  %vm2262_vm11 = vcmask 1047559   ;;  %s5645_s30 = sld [smem:[#allocation51_spill]] (!%p3433_p3) }
 0x241   : > { %1925 = vbcast.lane.b32.xlu1 %v1923_v44, 256  ;;  %v4858_v19 = vld [vmem:[%s778_s23] ss:$0 sm:$0xff]  ;;  %s4260_s23 = smov 96   ;;  %vm4263_vm12 = vmmov (!%p3433_p3), 0   ;;  %vm2938_vm13 = vcmask (!%p3433_p3), 130048  }
 0x242   : > { %3501 = vmatmul.mubr.msk.f32.vlgmr.msra.gmra.mrb[0].mxu0 %vm1223_vm3, %v1195_v45  ;;  %vm3090_vm14 = vcmask (!%p3433_p3), 57344   ;;  %vm3073_vm15 = vcmask (!%p3433_p3), 0   ;;  %s5648_s7 = sld [smem:[#allocation52_spill]] (!%p3433_p3) }
 0x243   : > { %3521 = vmatmul.mubr.msk.f32.vlgmr.msra.gmra.mrb[0].mxu1 %vm1223_vm3, %v1203_v46  ;;  %3564 = vmatpush3.bf16.msra.mxu0 %v3561_v33 }
 0x244   : > { %3523 = vmatprep.mubr.msk.f32.mxu1 %vm1223_vm3, %v1204_v47  ;;  %3566 = vmatprep.subr.bf16.mxu0 %v3565_v39 }
 0x245   : > { %3511 = vmatprep.mubr.msk.f32.mxu0 %vm1223_vm3, %v1196_v50  ;;  %1974 = vbcast.lane.b32.xlu0 %v1972_v48, 256 }
 0x246   : > { %1981 = vbcast.lane.b32.xlu1 %v1979_v51, 256 }
 0x247   : > { %3524 = vmatmul.mubr.msk.f32.gmra.mrb[2].mxu1 %vm1223_vm3, %v1205_v52  ;;  %3568 = vmatpush3.bf16.msra.mxu0 %v3565_v39 }
 0x248   : > { %3526 = vmatprep.mubr.msk.f32.mxu1 %vm1223_vm3, %v1206_v53 }
 0x249   : > { %1932 = vbcast.lane.b32.xlu0 %v1930_v54, 256 }
 0x24a   : > { %3512 = vmatmul.mubr.msk.f32.vlgmr.msra.gmra.mrb[2].mxu0 %vm1223_vm3, %v1197_v57  ;;  %1988 = vbcast.lane.b32.xlu1 %v1986_v56, 256 }
 0x24b   : > { %3527 = vmatmul.mubr.msk.f32.gmra.mrb[4].mxu1 %vm1223_vm3, %v1207_v58  ;;  %3514 = vmatprep.mubr.msk.f32.mxu0 %vm1223_vm3, %v1198_v59 }
 0x24c   : > { %3529 = vmatprep.mubr.msk.f32.mxu1 %vm1223_vm3, %v1208_v60 }
 0x24d   : > { %1939 = vbcast.lane.b32.xlu0 %v1937_v61, 256 }
 0x24e   : > { %3515 = vmatmul.mubr.msk.f32.gmra.mrb[4].mxu0 %vm1223_vm3, %v1199_v0  ;;  %1995 = vbcast.lane.b32.xlu1 %v1993_v63, 256 }
 0x24f   : > { %3530 = vmatmul.mubr.msk.f32.gmra.mrb[6].mxu1 %vm1223_vm3, %v1209_v3  ;;  %3517 = vmatprep.mubr.msk.f32.mxu0 %vm1223_vm3, %v1200_v4 }
 0x250   : > { %3532 = vmatprep.mubr.msk.f32.mxu1 %vm1223_vm3, %v1210_v5 }
 0x251   : > { %1946 = vbcast.lane.b32.xlu0 %v1944_v6, 256 }
 0x252   : > { %3518 = vmatmul.mubr.msk.f32.gmra.mrb[6].mxu0 %vm1223_vm3, %v1201_v9  ;;  %2002 = vbcast.lane.b32.xlu1 %v2000_v8, 256 }
 0x253   : > { %3533 = vmatmul.mubr.msk.f32.gmra.mrb[8].mxu1 %vm1223_vm3, %v1211_v10 }
 0x255   : > { %1953 = vbcast.lane.b32.xlu0 %v1951_v11, 256 }
 0x256   : > { %2009 = vbcast.lane.b32.xlu1 %v2007_v13, 256 }
 0x259   : > { %1960 = vbcast.lane.b32.xlu0 %v1958_v14, 256 }
 0x315   : > { %v3502_v21 = vpop.f32.mrb[0].mxu0 }
 0x316   : > { %v4863_v22 = vadd.f32 %v3502_v21, %v3393_v18  ;;  %v3522_v23 = vpop.f32.mrb[0].mxu1  ;;  %v1296_v24 = vpop.f32.mrb[1].mxu0 }
 0x317   : > { %v1466_v25 = vadd.f32 %v3522_v23, %v4858_v19  ;;  %v1460_v26 = vpop.f32.mrb[1].mxu1  ;;  %v4867_v29 = vadd.f32 %v3393_v18, %v1296_v24 }
 0x318   : > { %v1461_v27 = vadd.f32 %v4858_v19, %v1460_v26  ;;  %v1567_v30 = vrot.slane %v4863_v22, %v4861_v20  ;;  %v1560_v48 = vcombine.high %v4863_v22, %v4863_v22 }
 0x319   : > { %1767 = vrot.lane.b32.xlu1 %v1466_v25, %s4259_s20  ;;  %v1518_v39 = vrot.slane %v4867_v29, %v4861_v20  ;;  %v1511_v63 = vcombine.high %v4867_v29, %v4867_v29 }
 0x31a   : > { %v3525_v31 = vpop.f32.mrb[2].mxu1  ;;  %1765 = vrot.lane.b32.xlu0 %v1461_v27, %s4259_s20  ;;  %v1575_v32 = vcombine.high %v1567_v30, %v1567_v30  ;;  %v1583_v33 = vrot.slane %v1567_v30, %v4861_v20  ;;  %v1574_v56 = vrot.slane %v1560_v48, %v4861_v20 }
 0x31b   : > { %v1476_v34 = vadd.f32 %v3525_v31, %v4858_v19  ;;  %v1470_v35 = vpop.f32.mrb[3].mxu1  ;;  %v1534_v47 = vrot.slane %v1518_v39, %v4861_v20  ;;  %v1526_v62 = vcombine.high %v1518_v39, %v1518_v39  ;;  %v1525_v13 = vrot.slane %v1511_v63, %v4861_v20 }
 0x31c   : > { %v1471_v36 = vadd.f32 %v4858_v19, %v1470_v35  ;;  %v1597_v37 = vrot.slane %v1575_v32, %v4861_v20  ;;  %v1644_v43 = vrot.slane %v1583_v33, %v4812_v41  ;;  %v1605_v55 = vcombine.high %v1583_v33, %v1583_v33 }
 0x31d   : > { %1771 = vrot.lane.b32.xlu1 %v1476_v34, %s4259_s20  ;;  %v3513_v40 = vpop.f32.mrb[2].mxu0  ;;  %v1612_v54 = vrot.slane %v1534_v47, %v4812_v41  ;;  %v1556_v61 = vcombine.high %v1534_v47, %v1534_v47  ;;  %v1590_v4 = vrot.slane %v1574_v56, %v4861_v20  ;;  %v1576_v9 = vcombine.high %v1574_v56, %v1574_v56 }
 0x31e   : > { %1769 = vrot.lane.b32.xlu0 %v1471_v36, %s4259_s20  ;;  %v1648_v42 = vrot.slane %v1597_v37, %v4812_v41  ;;  %v3528_v44 = vpop.f32.mrb[4].mxu1  ;;  %v1430_v45 = vpop.f32.mrb[3].mxu0  ;;  %v1436_v49 = vadd.f32 %v3513_v40, %v4858_v19  ;;  %v1652_v3 = vrot.slane %v1605_v55, %v4812_v41  ;;  %v1607_v8 = vcombine.high %v1597_v37, %v1597_v37 }
 0x31f   : > { %v1480_v46 = vpop.f32.mrb[5].mxu1  ;;  %v1486_v57 = vadd.f32 %v3528_v44, %v4858_v19  ;;  %v1620_v7 = vrot.slane %v1556_v61, %v4812_v41  ;;  %v1660_v10 = vrot.slane %v1590_v4, %v4812_v41  ;;  %v1548_v11 = vrot.slane %v1526_v62, %v4861_v20  ;;  %v1919_v44 = vpop.permute.xlu0 %1918 }
 0x320   : > { %v1656_v14 = vrot.slane %v1607_v8, %v4812_v41  ;;  %v1604_v15 = vrot.slane %v1576_v9, %v4861_v20  ;;  %v1541_v17 = vrot.slane %v1525_v13, %v4861_v20  ;;  %v1527_v23 = vcombine.high %v1525_v13, %v1525_v13 }
 0x321   : > { %1691 = vrot.lane.b32.xlu1 %v1648_v42, %s4260_s23  ;;  %v3516_v50 = vpop.f32.mrb[4].mxu0  ;;  %v1616_v16 = vrot.slane %v1548_v11, %v4812_v41  ;;  %v1558_v21 = vcombine.high %v1548_v11, %v1548_v11  ;;  %v1431_v27 = vadd.f32 %v4858_v19, %v1430_v45  ;;  %v1481_v32 = vadd.f32 %v4858_v19, %v1480_v46 }
 0x322   : > { %1689 = vrot.lane.b32.xlu0 %v1644_v43, %s4260_s23  ;;  %v1440_v51 = vpop.f32.mrb[5].mxu0  ;;  %v3531_v52 = vpop.f32.mrb[6].mxu1  ;;  %v1664_v18 = vrot.slane %v1604_v15, %v4812_v41  ;;  %v1628_v24 = vrot.slane %v1541_v17, %v4812_v41  ;;  %v1555_v26 = vrot.slane %v1527_v23, %v4861_v20  ;;  %v1608_v31 = vcombine.high %v1604_v15, %v1604_v15 }
 0x323   : > { %v4889_v53 = vpop.f32.mrb[7].mxu1  ;;  %v1624_v25 = vrot.slane %v1558_v21, %v4812_v41  ;;  %v1606_v33 = vcombine.high %v1590_v4, %v1590_v4  ;;  %v1557_v36 = vcombine.high %v1541_v17, %v1541_v17  ;;  %v1446_v37 = vadd.f32 %v3516_v50, %v4858_v19  ;;  %v1975_v50 = vpop.permute.xlu0 %1974 }
 0x324   : > { %v1632_v30 = vrot.slane %v1555_v26, %v4812_v41  ;;  %v1672_v34 = vrot.slane %v1608_v31, %v4812_v41  ;;  %v1496_v40 = vadd.f32 %v3531_v52, %v4858_v19  ;;  %v1441_v42 = vadd.f32 %v4858_v19, %v1440_v51 }
 0x325   : > { %1755 = vrot.lane.b32.xlu1 %v1436_v49, %s4259_s20  ;;  %v4895_v58 = vpop.f32.mrb[6].mxu0  ;;  %v1668_v35 = vrot.slane %v1606_v33, %v4812_v41  ;;  %v1636_v39 = vrot.slane %v1557_v36, %v4812_v41  ;;  %v1559_v43 = vcombine.high %v1555_v26, %v1555_v26  ;;  %v1491_v45 = vadd.f32 %v4858_v19, %v4889_v53 }
 0x326   : > { %1673 = vrot.lane.b32.xlu0 %v1612_v54, %s4260_s23  ;;  %v4898_v59 = vpop.f32.mrb[8].mxu1  ;;  %v1450_v60 = vpop.f32.mrb[7].mxu0  ;;  %v1964_v46 = vsub.s32 7, %v4808_v38  ;;  %v1456_v48 = vadd.f32 %v4895_v58, %v4858_v19  ;;  %v2025_v52 = vmul.f32 %v1919_v44, %v4867_v29 }
 0x327   : > { %v1500_v0 = vpop.f32.mrb[9].mxu1  ;;  %v4905_v5 = vadd.f32 %v4858_v19, %v1450_v60  ;;  %v1640_v47 = vrot.slane %v1559_v43, %v4812_v41  ;;  %v1506_v51 = vadd.f32 %v4898_v59, %v4858_v19  ;;  %v1933_v53 = vpop.permute.xlu0 %1932  ;;  %v2014_v41 = vrot.slane %v4756_v2, %v1957_v12 }
 0x328   : > { %v4908_v6 = vadd.f32 %v4858_v19, %v1500_v0  ;;  %v1965_v49 = vrot.slane %v4754_v1, %v1964_v46  ;;  %v1926_v54 = vpop.permute.xlu1 %1925  ;;  %v2033_v1 = vmul.f32 %v1975_v50, %v4863_v22  ;;  %v2021_v55 = vrot.slane %v4756_v2, %v1964_v46 }
 0x329   : > { %1775 = vrot.lane.b32.xlu1 %v1486_v57, %s4259_s20  ;;  %v2027_v57 = vmul.f32 %v1933_v53, %v4867_v29  ;;  %v2026_v12 = vmul.f32 %v1926_v54, %v4867_v29 }
 0x32a   : > { %1693 = vrot.lane.b32.xlu0 %v1652_v3, %s4260_s23 }
 0x32b   : > { %v1940_v19 = vpop.permute.xlu0 %1939 }
 0x32c   : > { %v1982_v56 = vpop.permute.xlu1 %1981  ;;  %v2028_v58 = vmul.f32 %v1940_v19, %v4867_v29 }
 0x32d   : > { %1677 = vrot.lane.b32.xlu1 %v1620_v7, %s4260_s23  ;;  %v2034_v2 = vmul.f32 %v1982_v56, %v4863_v22 }
 0x32e   : > { %1697 = vrot.lane.b32.xlu0 %v1660_v10, %s4260_s23 }
 0x32f   : > { %v1947_v59 = vpop.permute.xlu0 %1946 }
 0x330   : > { %v1989_v60 = vpop.permute.xlu1 %1988  ;;  %v2029_v61 = vmul.f32 %v1947_v59, %v4867_v29 }
 0x331   : > { %1695 = vrot.lane.b32.xlu1 %v1656_v14, %s4260_s23  ;;  %v2035_v63 = vmul.f32 %v1989_v60, %v4863_v22 }
 0x332   : > { %1675 = vrot.lane.b32.xlu0 %v1616_v16, %s4260_s23 }
 0x333   : > { %v1954_v62 = vpop.permute.xlu0 %1953 }
 0x334   : > { %v1996_v0 = vpop.permute.xlu1 %1995  ;;  %v2030_v3 = vmul.f32 %v1954_v62, %v4867_v29 }
 0x335   : > { %1699 = vrot.lane.b32.xlu1 %v1664_v18, %s4260_s23  ;;  %v2036_v4 = vmul.f32 %v1996_v0, %v4863_v22 }
 0x336   : > { %1681 = vrot.lane.b32.xlu0 %v1628_v24, %s4260_s23 }
 0x337   : > { %v4994_v10 = vpop.permute.xlu0 %1960 }
 0x338   : > { %v2003_v7 = vpop.permute.xlu1 %2002 }
 0x339   : > { %1679 = vrot.lane.b32.xlu1 %v1624_v25, %s4260_s23  ;;  %v2037_v8 = vmul.f32 %v2003_v7, %v4863_v22 }
 0x33a   : > { %1753 = vrot.lane.b32.xlu0 %v1431_v27, %s4259_s20 }
 0x33c   : > { %v4992_v9 = vpop.permute.xlu1 %2009 }
 0x33d   : > { %1683 = vrot.lane.b32.xlu1 %v1632_v30, %s4260_s23 }
 0x33e   : > { %1773 = vrot.lane.b32.xlu0 %v1481_v32, %s4259_s20 }
 0x341   : > { %1703 = vrot.lane.b32.xlu1 %v1672_v34, %s4260_s23 }
 0x342   : > { %1701 = vrot.lane.b32.xlu0 %v1668_v35, %s4260_s23 }
 0x345   : > { %1759 = vrot.lane.b32.xlu1 %v1446_v37, %s4259_s20 }
 0x346   : > { %1685 = vrot.lane.b32.xlu0 %v1636_v39, %s4260_s23 }
 0x349   : > { %1779 = vrot.lane.b32.xlu1 %v1496_v40, %s4259_s20 }
 0x34a   : > { %1757 = vrot.lane.b32.xlu0 %v1441_v42, %s4259_s20 }
 0x34d   : > { %1687 = vrot.lane.b32.xlu1 %v1640_v47, %s4260_s23 }
 0x34e   : > { %1777 = vrot.lane.b32.xlu0 %v1491_v45, %s4259_s20 }
 0x351   : > { %1763 = vrot.lane.b32.xlu1 %v1456_v48, %s4259_s20 }
 0x352   : > { %1967 = vbcast.lane.b32.xlu0 %v1965_v49, 256 }
 0x355   : > { %1783 = vrot.lane.b32.xlu1 %v1506_v51, %s4259_s20 }
 0x356   : > { %2057 = vrot.lane.b32.xlu0 %v2025_v52, %s4261_s17 }
 0x359   : > { %2016 = vbcast.lane.b32.xlu1 %v2014_v41, 256 }
 0x35a   : > { %2073 = vrot.lane.b32.xlu0 %v2033_v1, %s4261_s17 }
 0x35d   : > { %2023 = vbcast.lane.b32.xlu1 %v2021_v55, 256 }
 0x35e   : > { %2061 = vrot.lane.b32.xlu0 %v2027_v57, %s4261_s17 }
 0x361   : > { %2059 = vrot.lane.b32.xlu1 %v2026_v12, %s4261_s17 }
 0x362   : > { %2063 = vrot.lane.b32.xlu0 %v2028_v58, %s4261_s17 }
 0x365   : > { %2075 = vrot.lane.b32.xlu1 %v2034_v2, %s4261_s17 }
 0x366   : > { %2065 = vrot.lane.b32.xlu0 %v2029_v61, %s4261_s17 }
 0x369   : > { %2077 = vrot.lane.b32.xlu1 %v2035_v63, %s4261_s17 }
 0x36a   : > { %2067 = vrot.lane.b32.xlu0 %v2030_v3, %s4261_s17 }
 0x36d   : > { %2079 = vrot.lane.b32.xlu1 %v2036_v4, %s4261_s17 }
 0x36e   : > { %1761 = vrot.lane.b32.xlu0 %v4905_v5, %s4259_s20 }
 0x371   : > { %2081 = vrot.lane.b32.xlu1 %v2037_v8, %s4261_s17 }
 0x372   : > { %1781 = vrot.lane.b32.xlu0 %v4908_v6, %s4259_s20 }
 0x38b   : > { %v1768_v11 = vpop.permute.xlu1 %1767 }
 0x38c   : > { %v1766_v13 = vpop.permute.xlu0 %1765 }
 0x38f   : > { %v1772_v14 = vpop.permute.xlu1 %1771 }
 0x390   : > { %v1770_v15 = vpop.permute.xlu0 %1769 }
 0x393   : > { %v1692_v16 = vpop.permute.xlu1 %1691 }
 0x394   : > { %v1730_v17 = vadd.f32 %v1692_v16, %v4863_v22  ;;  %v1690_v18 = vpop.permute.xlu0 %1689 }
 0x395   : > { %v1729_v5 = vadd.f32 %v1690_v18, %v4863_v22 }
 0x396   : > { %v4998_v21 = vadd.f32 %v1772_v14, %v1730_v17 }
 0x397   : > { %v5000_v23 = vadd.f32 %v1770_v15, %v1729_v5  ;;  %v1756_v24 = vpop.permute.xlu1 %1755 }
 0x398   : > { %v1674_v6 = vpop.permute.xlu0 %1673  ;;  %2360 = vrot.lane.b32.xlu1 %v4998_v21, %s4259_s20 }
 0x399   : > { %2358 = vrot.lane.b32.xlu0 %v5000_v23, %s4259_s20  ;;  %v1721_v39 = vadd.f32 %v1674_v6, %v4867_v29 }
 0x39b   : > { %v1776_v25 = vpop.permute.xlu1 %1775 }
 0x39c   : > { %v1694_v26 = vpop.permute.xlu0 %1693 }
 0x39d   : > { %v1731_v45 = vadd.f32 %v1694_v26, %v4863_v22 }
 0x39f   : > { %v1678_v27 = vpop.permute.xlu1 %1677 }
 0x3a0   : > { %v1698_v30 = vpop.permute.xlu0 %1697  ;;  %v1723_v41 = vadd.f32 %v1678_v27, %v4867_v29 }
 0x3a1   : > { %v1733_v61 = vadd.f32 %v1698_v30, %v4863_v22 }
 0x3a3   : > { %v1696_v31 = vpop.permute.xlu1 %1695 }
 0x3a4   : > { %v1676_v32 = vpop.permute.xlu0 %1675  ;;  %v1732_v34 = vadd.f32 %v1696_v31, %v4863_v22 }
 0x3a5   : > { %v1722_v33 = vadd.f32 %v1676_v32, %v4867_v29 }
 0x3a6   : > { %v5015_v40 = vadd.f32 %v1776_v25, %v1732_v34 }
 0x3a7   : > { %v5008_v35 = vadd.f32 %v1756_v24, %v1722_v33  ;;  %v1700_v36 = vpop.permute.xlu1 %1699 }
 0x3a8   : > { %v5010_v37 = vpop.permute.xlu0 %1681  ;;  %v1734_v53 = vadd.f32 %v1700_v36, %v4863_v22 }
 0x3a9   : > { %2344 = vrot.lane.b32.xlu1 %v5008_v35, %s4259_s20 }
 0x3ab   : > { %v1680_v42 = vpop.permute.xlu1 %1679 }
 0x3ac   : > { %v1754_v43 = vpop.permute.xlu0 %1753  ;;  %v1724_v57 = vadd.f32 %v1680_v42, %v4867_v29 }
 0x3ad   : > { %v5017_v44 = vadd.f32 %v1754_v43, %v1721_v39  ;;  %2364 = vrot.lane.b32.xlu1 %v5015_v40, %s4259_s20 }
 0x3af   : > { %2342 = vrot.lane.b32.xlu0 %v5017_v44, %s4259_s20  ;;  %v1684_v46 = vpop.permute.xlu1 %1683  ;;  %v3413_v39 = vmul.f32 -1.442695, %v5017_v44 }
 0x3b0   : > { %v1774_v47 = vpop.permute.xlu0 %1773  ;;  %v1726_v4 = vadd.f32 %v1684_v46, %v4867_v29 }
 0x3b1   : > { %v5024_v48 = vadd.f32 %v1774_v47, %v1731_v45  ;;  %3728 = vpow2.f32 %v3413_v39 }
 0x3b3   : > { %2362 = vrot.lane.b32.xlu0 %v5024_v48, %s4259_s20  ;;  %v1704_v49 = vpop.permute.xlu1 %1703 }
 0x3b4   : > { %v1702_v50 = vpop.permute.xlu0 %1701  ;;  %v1736_v14 = vadd.f32 %v1704_v49, %v4863_v22  ;;  %v3421_v49 = vmul.f32 -1.442695, %v5000_v23 }
 0x3b5   : > { %v1735_v33 = vadd.f32 %v1702_v50, %v4863_v22 }
 0x3b7   : > { %v1760_v51 = vpop.permute.xlu1 %1759 }
 0x3b8   : > { %v1686_v52 = vpop.permute.xlu0 %1685  ;;  %v5040_v58 = vadd.f32 %v1760_v51, %v1724_v57  ;;  %v3424_v57 = vmul.f32 -1.442695, %v5015_v40 }
 0x3b9   : > { %v1727_v19 = vadd.f32 %v1686_v52, %v4867_v29 }
 0x3ba   : > { %v3416_v46 = vmul.f32 -1.442695, %v5040_v58 }
 0x3bb   : > { %v1780_v54 = vpop.permute.xlu1 %1779  ;;  %v5043_v2 = vadd.f32 %v1766_v13, %v1727_v19  ;;  %v2031_v13 = vmul.f32 %v4994_v10, %v4867_v29  ;;  %v2038_v10 = vmul.f32 %v4992_v9, %v4863_v22  ;;  %v1725_v9 = vadd.f32 %v5010_v37, %v4867_v29  ;;  %v3729_v51 = vpop.eup %3728 }
 0x3bc   : > { %v5030_v1 = vadd.f32 %v1780_v54, %v1734_v53  ;;  %v1758_v55 = vpop.permute.xlu0 %1757  ;;  %v3414_v37 = vmul.f32 -1.442695, %v5008_v35  ;;  %v1865_v53 = vadd.f32 1.0, %v3729_v51  ;;  %v3422_v54 = vmul.f32 -1.442695, %v4998_v21 }
 0x3bd   : > { %v5033_v56 = vadd.f32 %v1758_v55, %v1723_v41 }
 0x3be   : > { %2368 = vrot.lane.b32.xlu1 %v5030_v1, %s4259_s20  ;;  %3730 = vpow2.f32 %v3414_v37 }
 0x3bf   : > { %2346 = vrot.lane.b32.xlu0 %v5033_v56, %s4259_s20  ;;  %v1688_v12 = vpop.permute.xlu1 %1687  ;;  %v3415_v43 = vmul.f32 -1.442695, %v5033_v56 }
 0x3c0   : > { %v1728_v59 = vadd.f32 %v1688_v12, %v4867_v29  ;;  %v1778_v60 = vpop.permute.xlu0 %1777  ;;  %v3423_v12 = vmul.f32 -1.442695, %v5024_v48 }
 0x3c1   : > { %v5052_v3 = vadd.f32 %v1778_v60, %v1733_v61  ;;  %3732 = vpow2.f32 %v3415_v43 }
 0x3c2   : > { %2348 = vrot.lane.b32.xlu1 %v5040_v58, %s4259_s20  ;;  %v5050_v63 = vadd.f32 %v1768_v11, %v1728_v59  ;;  %3734 = vpow2.f32 %v3416_v46 }
 0x3c3   : > { %2354 = vrot.lane.b32.xlu0 %v5043_v2, %s4259_s20  ;;  %v1764_v62 = vpop.permute.xlu1 %1763 }
 0x3c4   : > { %v1968_v0 = vpop.permute.xlu0 %1967  ;;  %v5059_v7 = vadd.f32 %v1764_v62, %v1726_v4  ;;  %v3425_v62 = vmul.f32 -1.442695, %v5052_v3  ;;  %v3420_v37 = vmul.f32 -1.442695, %v5050_v63 }
 0x3c5   : > { %v2032_v17 = vmul.f32 %v1968_v0, %v4867_v29 }
 0x3c6   : > { %2356 = vrot.lane.b32.xlu1 %v5050_v63, %s4259_s20  ;;  %v3418_v52 = vmul.f32 -1.442695, %v5059_v7 }
 0x3c7   : > { %2366 = vrot.lane.b32.xlu0 %v5052_v3, %s4259_s20  ;;  %v1784_v11 = vpop.permute.xlu1 %1783 }
 0x3c8   : > { %v5061_v8 = vpop.permute.xlu0 %2057  ;;  %v5069_v15 = vadd.f32 %v1784_v11, %v1736_v14  ;;  %v3731_v41 = vpop.eup %3730 }
 0x3c9   : > { %v1866_v60 = vadd.f32 1.0, %v3731_v41 }
 0x3ca   : > { %2352 = vrot.lane.b32.xlu1 %v5059_v7, %s4259_s20 }
 0x3cb   : > { %2069 = vrot.lane.b32.xlu0 %v2031_v13, %s4261_s17  ;;  %v2017_v18 = vpop.permute.xlu1 %2016  ;;  %v3733_v19 = vpop.eup %3732 }
 0x3cc   : > { %v5071_v16 = vpop.permute.xlu0 %2073  ;;  %v2039_v24 = vmul.f32 %v2017_v18, %v4863_v22  ;;  %v3735_v59 = vpop.eup %3734  ;;  %v1867_v61 = vadd.f32 1.0, %v3733_v19 }
 0x3cd   : > { %v1868_v4 = vadd.f32 1.0, %v3735_v59 }
 0x3ce   : > { %2372 = vrot.lane.b32.xlu1 %v5069_v15, %s4259_s20 }
 0x3cf   : > { %2071 = vrot.lane.b32.xlu0 %v2032_v17, %s4261_s17  ;;  %v2024_v25 = vpop.permute.xlu1 %2023 }
 0x3d0   : > { %v5079_v5 = vpop.permute.xlu0 %2061  ;;  %v2040_v26 = vmul.f32 %v2024_v25, %v4863_v22  ;;  %v3419_v25 = vmul.f32 -1.442695, %v5043_v2 }
 0x3d2   : > { %2083 = vrot.lane.b32.xlu1 %v2038_v10, %s4261_s17 }
 0x3d3   : > { %v5104_v42 = vpop.permute.xlu1 %2059 }
 0x3d4   : > { %v5083_v6 = vpop.permute.xlu0 %2063 }
 0x3d6   : > { %2085 = vrot.lane.b32.xlu1 %v2039_v24, %s4261_s17 }
 0x3d7   : > { %v5108_v45 = vpop.permute.xlu1 %2075 }
 0x3d8   : > { %v5087_v27 = vpop.permute.xlu0 %2065 }
 0x3da   : > { %2087 = vrot.lane.b32.xlu1 %v2040_v26, %s4261_s17 }
 0x3db   : > { %v5113_v50 = vpop.permute.xlu1 %2077 }
 0x3dc   : > { %v5090_v30 = vpop.permute.xlu0 %2067 }
 0x3df   : > { %v5117_v55 = vpop.permute.xlu1 %2079 }
 0x3e0   : > { %v1762_v31 = vpop.permute.xlu0 %1761 }
 0x3e1   : > { %v5094_v32 = vadd.f32 %v1762_v31, %v1725_v9 }
 0x3e3   : > { %2350 = vrot.lane.b32.xlu0 %v5094_v32, %s4259_s20  ;;  %v3417_v47 = vmul.f32 -1.442695, %v5094_v32  ;;  %v5122_v13 = vpop.permute.xlu1 %2081 }
 0x3e4   : > { %v1782_v34 = vpop.permute.xlu0 %1781 }
 0x3e5   : > { %v5099_v36 = vadd.f32 %v1782_v34, %v1735_v33  ;;  %3736 = vpow2.f32 %v3417_v47 }
 0x3e6   : > { %3738 = vpow2.f32 %v3421_v49 }
 0x3e7   : > { %2370 = vrot.lane.b32.xlu0 %v5099_v36, %s4259_s20  ;;  %3740 = vpow2.f32 %v3418_v52 }
 0x3e8   : > { %3742 = vrcp.f32 %v1865_v53  ;;  %v3426_v53 = vmul.f32 -1.442695, %v5030_v1 }
 0x3e9   : > { %3744 = vpow2.f32 %v3422_v54 }
 0x3ea   : > { %3746 = vpow2.f32 %v3424_v57 }
 0x3eb   : > { %3748 = vpow2.f32 %v3423_v12 }
 0x3ec   : > { %3750 = vrcp.f32 %v1866_v60 }
 0x3ed   : > { %3752 = vrcp.f32 %v1867_v61 }
 0x3ee   : > { %3754 = vpow2.f32 %v3425_v62  ;;  %v3427_v62 = vmul.f32 -1.442695, %v5099_v36 }
 0x3ef   : > { %v3737_v0 = vpop.eup %3736  ;;  %3756 = vrcp.f32 %v1868_v4 }
 0x3f0   : > { %v3739_v11 = vpop.eup %3738  ;;  %v1869_v14 = vadd.f32 1.0, %v3737_v0 }
 0x3f1   : > { %v3741_v17 = vpop.eup %3740  ;;  %v1873_v18 = vadd.f32 1.0, %v3739_v11 }
 0x3f2   : > { %v3743_v26 = vpop.eup %3742  ;;  %v1870_v9 = vadd.f32 1.0, %v3741_v17  ;;  %3758 = vrcp.f32 %v1869_v14 }
 0x3f3   : > { %v3745_v31 = vpop.eup %3744  ;;  %3760 = vrcp.f32 %v1873_v18  ;;  %v2105_v47 = vmul.f32 %v3743_v26, %v5061_v8 }
 0x3f4   : > { %v3747_v39 = vpop.eup %3746  ;;  %3762 = vpow2.f32 %v3419_v25  ;;  %v1874_v51 = vadd.f32 1.0, %v3745_v31 }
 0x3f5   : > { %v3749_v46 = vpop.eup %3748  ;;  %3764 = vrcp.f32 %v1870_v9  ;;  %v1876_v57 = vadd.f32 1.0, %v3747_v39  ;;  %v2122_v12 = vsel %vm2121_vm4, %v2105_v47, 0.0 }
 0x3f6   : > { %v3751_v49 = vpop.eup %3750  ;;  %3766 = vpow2.f32 %v3420_v37  ;;  %v1875_v8 = vadd.f32 1.0, %v3749_v46  ;;  %v2123_v11 = vrot.slane %v2122_v12, 4 }
 0x3f7   : > { %v3753_v52 = vpop.eup %3752  ;;  %v2106_v59 = vmul.f32 %v3751_v49, %v5104_v42  ;;  %3768 = vrcp.f32 %v1874_v51 }
 0x3f8   : > { %v3755_v41 = vpop.eup %3754  ;;  %v2107_v61 = vmul.f32 %v3753_v52, %v5079_v5  ;;  %3770 = vpow2.f32 %v3426_v53 }
 0x3f9   : > { %v3757_v19 = vpop.eup %3756  ;;  %v1877_v4 = vadd.f32 1.0, %v3755_v41  ;;  %v2129_v42 = vsel %vm2121_vm4, %v2106_v59, 0.0  ;;  %3772 = vrcp.f32 %v1876_v57 }
 0x3fa   : > { %v2108_v14 = vmul.f32 %v3757_v19, %v5083_v6  ;;  %3774 = vrcp.f32 %v1875_v8  ;;  %v2136_v26 = vsel %vm2121_vm4, %v2107_v61, 0.0  ;;  %v2130_v39 = vrot.slane %v2129_v42, 4 }
 0x3fb   : > { %3776 = vpow2.f32 %v3427_v62  ;;  %v2137_v46 = vrot.slane %v2136_v26, 4 }
 0x3fc   : > { %v3759_v0 = vpop.eup %3758  ;;  %3778 = vrcp.f32 %v1877_v4  ;;  %v2143_v37 = vsel %vm2121_vm4, %v2108_v14, 0.0  ;;  %v2131_v57 = vadd.f32 %v2130_v39, %v2129_v42 }
 0x3fd   : > { %v3761_v18 = vpop.eup %3760  ;;  %v2109_v9 = vmul.f32 %v3759_v0, %v5087_v27  ;;  %v2144_v51 = vrot.slane %v2143_v37, 4  ;;  %v2138_v8 = vadd.f32 %v2137_v46, %v2136_v26 }
 0x3fe   : > { %v3763_v25 = vpop.eup %3762  ;;  %v2113_v5 = vmul.f32 %v3761_v18, %v5071_v16  ;;  %v2132_v42 = vrot.slane %v2131_v57, 2 }
 0x3ff   : > { %v3765_v6 = vpop.eup %3764  ;;  %v2150_v41 = vsel %vm2121_vm4, %v2109_v9, 0.0  ;;  %v2145_v4 = vadd.f32 %v2144_v51, %v2143_v37  ;;  %v2139_v9 = vrot.slane %v2138_v8, 2 }
 0x400   : > { %v3767_v47 = vpop.eup %3766  ;;  %v2178_v49 = vsel %vm2121_vm4, %v2113_v5, 0.0  ;;  %v2110_v52 = vmul.f32 %v3765_v6, %v5090_v30  ;;  %v2151_v62 = vrot.slane %v2150_v41, 4 }
 0x401   : > { %v1872_v59 = vadd.f32 1.0, %v3767_v47  ;;  %v2146_v51 = vrot.slane %v2145_v4, 2 }
 0x402   : > { %v2157_v30 = vsel %vm2121_vm4, %v2110_v52, 0.0  ;;  %v2152_v47 = vadd.f32 %v2151_v62, %v2150_v41 }
 0x403   : > { %v2158_v37 = vrot.slane %v2157_v30, 4 }
 0x40a   : > { %v2361_v10 = vpop.permute.xlu1 %2360 }
 0x40b   : > { %v5124_v24 = vpop.permute.xlu0 %2358  ;;  %v2417_v54 = vsel %vm1223_vm3, %v2361_v10, 0.0  ;;  %v3428_v10 = vmul.f32 -1.442695, %v5069_v15 }
 0x40d   : > { %3780 = vpow2.f32 %v3428_v10 }
 0x41b   : > { %v5127_v33 = vpop.permute.xlu1 %2344 }
 0x41f   : > { %v2365_v60 = vpop.permute.xlu1 %2364 }
 0x420   : > { %v2423_v17 = vsel %vm1223_vm3, %v2365_v60, 0.0  ;;  %v2179_v60 = vrot.slane %v2178_v49, 4 }
 0x421   : > { %v2343_v34 = vpop.permute.xlu0 %2342 }
 0x422   : > { %v2390_v43 = vsel %vm1223_vm3, %v2343_v34, 0.0  ;;  %v2124_v34 = vadd.f32 %v2123_v11, %v2122_v12  ;;  %v2180_v26 = vadd.f32 %v2179_v60, %v2178_v49  ;;  %v2133_v49 = vadd.f32 %v2132_v42, %v2131_v57 }
 0x423   : > { %2391 = vadd.xlane.f32.xlu0 %v2390_v43  ;;  %v1871_v43 = vadd.f32 1.0, %v3763_v25  ;;  %v2153_v60 = vrot.slane %v2152_v47, 2 }
 0x424   : > { %v2125_v19 = vrot.slane %v2124_v34, 2 }
 0x425   : > { %v5145_v31 = vpop.permute.xlu0 %2362  ;;  %3782 = vrcp.f32 %v1871_v43 }
 0x426   : > { %v2126_v10 = vadd.f32 %v2125_v19, %v2124_v34  ;;  %3784 = vrcp.f32 %v1872_v59  ;;  %v2140_v19 = vadd.f32 %v2139_v9, %v2138_v8 }
 0x427   : > { %2418 = vadd.xlane.f32.xlu0 %v2417_v54  ;;  %v3769_v54 = vpop.eup %3768 }
 0x428   : > { %v3771_v12 = vpop.eup %3770  ;;  %v2114_v25 = vmul.f32 %v3769_v54, %v5108_v45  ;;  %v2181_v54 = vrot.slane %v2180_v26, 2 }
 0x429   : > { %v3773_v0 = vpop.eup %3772  ;;  %v1878_v18 = vadd.f32 1.0, %v3771_v12  ;;  %v2159_v12 = vadd.f32 %v2158_v37, %v2157_v30 }
 0x42a   : > { %v2116_v43 = vmul.f32 %v3773_v0, %v5117_v55  ;;  %v5168_v30 = vadd.f32 %v2181_v54, %v2180_v26 }
 0x42b   : > { %2424 = vadd.xlane.f32.xlu0 %v2423_v17  ;;  %v3775_v17 = vpop.eup %3774  ;;  %3786 = vrcp.f32 %v1878_v18  ;;  %v2134_v18 = vrot.slane %v2133_v49, 1 }
 0x42c   : > { %v3777_v5 = vpop.eup %3776  ;;  %v2115_v6 = vmul.f32 %v3775_v17, %v5113_v50  ;;  %v2183_v54 = vrot.slane %v5168_v30, 1 }
 0x42d   : > { %v3779_v39 = vpop.eup %3778  ;;  %v1879_v50 = vadd.f32 1.0, %v3777_v5  ;;  %v2141_v5 = vrot.slane %v2140_v19, 1 }
 0x42e   : > { %v2117_v34 = vmul.f32 %v3779_v39, %v5122_v13  ;;  %v2192_v55 = vsel %vm2121_vm4, %v2115_v6, 0.0  ;;  %v2199_v13 = vsel %vm2121_vm4, %v2116_v43, 0.0  ;;  %v2160_v6 = vrot.slane %v2159_v12, 2 }
 0x42f   : > { %v2193_v8 = vrot.slane %v2192_v55, 4  ;;  %3788 = vrcp.f32 %v1879_v50  ;;  %v2200_v9 = vrot.slane %v2199_v13, 4  ;;  %v2154_v43 = vadd.f32 %v2153_v60, %v2152_v47 }
 0x430   : > { %v2369_v16 = vpop.permute.xlu1 %2368  ;;  %v2206_v57 = vsel %vm2121_vm4, %v2117_v34, 0.0  ;;  %v2135_v50 = vadd.f32 %v2134_v18, %v2133_v49  ;;  %v2161_v47 = vadd.f32 %v2160_v6, %v2159_v12 }
 0x431   : > { %v2347_v27 = vpop.permute.xlu0 %2346  ;;  %v2429_v53 = vsel %vm1223_vm3, %v2369_v16, 0.0  ;;  %v3781_v16 = vpop.eup %3780  ;;  %v2194_v26 = vadd.f32 %v2193_v8, %v2192_v55 }
 0x432   : > { %2430 = vadd.xlane.f32.xlu0 %v2429_v53  ;;  %v2396_v14 = vsel %vm1223_vm3, %v2347_v27, 0.0  ;;  %v2185_v27 = vsel %vm2121_vm4, %v2114_v25, 0.0  ;;  %v2127_v53 = vrot.slane %v2126_v10, 1  ;;  %v1880_v41 = vadd.f32 1.0, %v3781_v16  ;;  %v3783_v62 = vpop.eup %3782 }
 0x433   : > { %v2186_v0 = vrot.slane %v2185_v27, 4  ;;  %v3785_v16 = vpop.eup %3784 }
 0x434   : > { %v2349_v61 = vpop.permute.xlu1 %2348  ;;  %v2128_v25 = vadd.f32 %v2127_v53, %v2126_v10  ;;  %3790 = vrcp.f32 %v1880_v41 }
 0x435   : > { %v5153_v11 = vpop.permute.xlu0 %2354  ;;  %v2399_v45 = vsel %vm1223_vm3, %v2349_v61, 0.0  ;;  %v2147_v61 = vadd.f32 %v2146_v51, %v2145_v4  ;;  %v2207_v4 = vrot.slane %v2206_v57, 4 }
 0x436   : > { %2397 = vadd.xlane.f32.xlu0 %v2396_v14  ;;  %v2251_v8 = vsel %vm2250_vm5, %v2135_v50, %v2128_v25 }
 0x437   : > { %v2148_v10 = vrot.slane %v2147_v61, 1  ;;  %v2208_v60 = vadd.f32 %v2207_v4, %v2206_v57  ;;  %v2162_v4 = vrot.slane %v2161_v47, 1 }
 0x438   : > { %v2357_v46 = vpop.permute.xlu1 %2356 }
 0x439   : > { %v5160_v52 = vpop.permute.xlu0 %2366  ;;  %v2411_v17 = vsel %vm1223_vm3, %v2357_v46, 0.0  ;;  %v2187_v46 = vadd.f32 %v2186_v0, %v2185_v27  ;;  %v2155_v0 = vrot.slane %v2154_v43, 1 }
 0x43a   : > { %2400 = vadd.xlane.f32.xlu0 %v2399_v45 }
 0x43c   : > { %v2353_v59 = vpop.permute.xlu1 %2352 }
 0x43d   : > { %v2070_v14 = vpop.permute.xlu0 %2069  ;;  %v2405_v45 = vsel %vm1223_vm3, %v2353_v59, 0.0 }
 0x43e   : > { %v2111_v42 = vmul.f32 %v3783_v62, %v2070_v14  ;;  %2412 = vadd.xlane.f32.xlu0 %v2411_v17  ;;  %v2142_v62 = vadd.f32 %v2141_v5, %v2140_v19  ;;  %v2201_v14 = vadd.f32 %v2200_v9, %v2199_v13  ;;  %v2188_v19 = vrot.slane %v2187_v46, 2 }
 0x43f   : > { %v2195_v13 = vrot.slane %v2194_v26, 2 }
 0x440   : > { %v2164_v39 = vsel %vm2121_vm4, %v2111_v42, 0.0  ;;  %v2373_v37 = vpop.permute.xlu1 %2372  ;;  %v3787_v42 = vpop.eup %3786  ;;  %v2202_v5 = vrot.slane %v2201_v14, 2 }
 0x441   : > { %v2165_v51 = vrot.slane %v2164_v39, 4  ;;  %v2072_v34 = vpop.permute.xlu0 %2071  ;;  %v2435_v55 = vsel %vm1223_vm3, %v2373_v37, 0.0  ;;  %v3789_v6 = vpop.eup %3788  ;;  %v2196_v50 = vadd.f32 %v2195_v13, %v2194_v26 }
 0x442   : > { %v2112_v53 = vmul.f32 %v3785_v16, %v2072_v34  ;;  %2406 = vadd.xlane.f32.xlu0 %v2405_v45  ;;  %v2149_v16 = vadd.f32 %v2148_v10, %v2147_v61  ;;  %v2156_v34 = vadd.f32 %v2155_v0, %v2154_v43  ;;  %v2253_v45 = vsel %vm2252_vm6, %v2142_v62, %v2251_v8 }
 0x443   : > { %v2166_v17 = vadd.f32 %v2165_v51, %v2164_v39  ;;  %v2189_v61 = vadd.f32 %v2188_v19, %v2187_v46  ;;  %v2163_v8 = vadd.f32 %v2162_v4, %v2161_v47 }
 0x444   : > { %v2171_v27 = vsel %vm2121_vm4, %v2112_v53, 0.0  ;;  %v2084_v41 = vpop.permute.xlu1 %2083  ;;  %v2209_v53 = vrot.slane %v2208_v60, 2 }
 0x445   : > { %v2167_v59 = vrot.slane %v2166_v17, 2  ;;  %v2172_v49 = vrot.slane %v2171_v27, 4  ;;  %v2118_v18 = vmul.f32 %v3787_v42, %v2084_v41  ;;  %v3791_v41 = vpop.eup %3790  ;;  %v2190_v26 = vrot.slane %v2189_v61, 1 }
 0x446   : > { %2436 = vadd.xlane.f32.xlu0 %v2435_v55  ;;  %v2210_v28 = vadd.f32 %v2209_v53, %v2208_v60 }
 0x447   : > { %v2168_v9 = vadd.f32 %v2167_v59, %v2166_v17  ;;  %v2173_v12 = vadd.f32 %v2172_v49, %v2171_v27  ;;  %v2213_v57 = vsel %vm2121_vm4, %v2118_v18, 0.0  ;;  %v2203_v17 = vadd.f32 %v2202_v5, %v2201_v14 }
 0x448   : > { %v2214_v39 = vrot.slane %v2213_v57, 4  ;;  %v2086_v51 = vpop.permute.xlu1 %2085  ;;  %v2255_v49 = vsel %vm2254_vm7, %v2149_v16, %v2253_v45  ;;  %v2197_v14 = vrot.slane %v2196_v50, 1  ;;  %v2191_v60 = vadd.f32 %v2190_v26, %v2189_v61 }
 0x449   : > { %v2169_v37 = vrot.slane %v2168_v9, 1  ;;  %v2174_v42 = vrot.slane %v2173_v12, 2  ;;  %v2119_v25 = vmul.f32 %v3789_v6, %v2086_v51  ;;  %v2257_v62 = vsel %vm2256_vm8, %v2156_v34, %v2255_v49 }
 0x44a   : > { %v2215_v10 = vadd.f32 %v2214_v39, %v2213_v57  ;;  %v2259_v16 = vsel %vm2258_vm9, %v2163_v8, %v2257_v62  ;;  %v2211_v34 = vrot.slane %v2210_v28, 1 }
 0x44b   : > { %v2175_v27 = vadd.f32 %v2174_v42, %v2173_v12  ;;  %v2220_v59 = vsel %vm2121_vm4, %v2119_v25, 0.0  ;;  %v2170_v18 = vadd.f32 %v2169_v37, %v2168_v9  ;;  %v2204_v9 = vrot.slane %v2203_v17, 1 }
 0x44c   : > { %v2216_v55 = vrot.slane %v2215_v10, 2  ;;  %v2221_v43 = vrot.slane %v2220_v59, 4  ;;  %v2088_v0 = vpop.permute.xlu1 %2087  ;;  %v2198_v37 = vadd.f32 %v2197_v14, %v2196_v50  ;;  %v2184_v42 = vadd.f32 %v2183_v54, %v5168_v30 }
 0x44d   : > { %v2176_v6 = vrot.slane %v2175_v27, 1  ;;  %v2120_v46 = vmul.f32 %v3791_v41, %v2088_v0  ;;  %v2261_v51 = vsel %vm2260_vm10, %v2170_v18, %v2259_v16  ;;  %v2205_v25 = vadd.f32 %v2204_v9, %v2203_v17 }
 0x44e   : > { %v2217_v19 = vadd.f32 %v2216_v55, %v2215_v10  ;;  %v2222_v13 = vadd.f32 %v2221_v43, %v2220_v59  ;;  %v2264_v59 = vsel %vm2250_vm5, %v2191_v60, %v2184_v42  ;;  %v2420_v17 = vsel %vm1223_vm3, %v5145_v31, 0.0 }
 0x44f   : > { %v2227_v5 = vsel %vm2121_vm4, %v2120_v46, 0.0  ;;  %v2177_v12 = vadd.f32 %v2176_v6, %v2175_v27  ;;  %v2212_v27 = vadd.f32 %v2211_v34, %v2210_v28  ;;  %v2265_v61 = vsel %vm2252_vm6, %v2198_v37, %v2264_v59 }
 0x450   : > { %v2223_v57 = vrot.slane %v2222_v13, 2  ;;  %v2228_v39 = vrot.slane %v2227_v5, 4  ;;  %v2218_v4 = vrot.slane %v2217_v19, 1  ;;  %v2266_v43 = vsel %vm2254_vm7, %v2205_v25, %v2265_v61 }
 0x451   : > { %v2263_v47 = vsel %vm2262_vm11, %v2177_v12, %v2261_v51  ;;  %v2267_v50 = vsel %vm2256_vm8, %v2212_v27, %v2266_v43  ;;  %v2414_v28 = vsel %vm1223_vm3, %v5124_v24, 0.0  ;;  %v2393_v6 = vsel %vm1223_vm3, %v5127_v33, 0.0 }
 0x452   : > { %v2224_v45 = vadd.f32 %v2223_v57, %v2222_v13  ;;  %v2229_v53 = vadd.f32 %v2228_v39, %v2227_v5  ;;  %2271 = vrot.lane.b32.xlu1 %v2263_v47, %s4259_s20  ;;  %v2219_v49 = vadd.f32 %v2218_v4, %v2217_v19  ;;  %v2408_v46 = vsel %vm1223_vm3, %v5153_v11, 0.0 }
 0x453   : > { %v2426_v19 = vsel %vm1223_vm3, %v5160_v52, 0.0 }
 0x454   : > { %v2225_v10 = vrot.slane %v2224_v45, 1  ;;  %v2230_v41 = vrot.slane %v2229_v53, 2  ;;  %v2268_v8 = vsel %vm2258_vm9, %v2219_v49, %v2267_v50 }
 0x455   : > { %v2351_v26 = vpop.permute.xlu0 %2350 }
 0x456   : > { %v2231_v18 = vadd.f32 %v2230_v41, %v2229_v53  ;;  %v2226_v55 = vadd.f32 %v2225_v10, %v2224_v45  ;;  %v2402_v24 = vsel %vm1223_vm3, %v2351_v26, 0.0 }
 0x458   : > { %v2232_v0 = vrot.slane %v2231_v18, 1  ;;  %v2269_v30 = vsel %vm2260_vm10, %v2226_v55, %v2268_v8 }
 0x459   : > { %v2371_v13 = vpop.permute.xlu0 %2370 }
 0x45a   : > { %v2233_v62 = vadd.f32 %v2232_v0, %v2231_v18  ;;  %v2432_v31 = vsel %vm1223_vm3, %v2371_v13, 0.0 }
 0x45c   : > { %v2270_v54 = vsel %vm2262_vm11, %v2233_v62, %v2269_v30 }
 0x45d   : > { %2273 = vrot.lane.b32.xlu0 %v2270_v54, %s4259_s20 }
 0x476   : > { %2415 = vadd.xlane.f32.xlu1 %v2414_v28 }
 0x47a   : > { %2421 = vadd.xlane.f32.xlu1 %v2420_v17 }
 0x47e   : > { %2394 = vadd.xlane.f32.xlu1 %v2393_v6 }
 0x482   : > { %2409 = vadd.xlane.f32.xlu1 %v2408_v46 }
 0x486   : > { %2427 = vadd.xlane.f32.xlu1 %v2426_v19 }
 0x48a   : > { %2403 = vadd.xlane.f32.xlu1 %v2402_v24 }
 0x48e   : > { %2433 = vadd.xlane.f32.xlu1 %v2432_v31 }
 0x4b0   : > { %v2392_v14 = vpop.xlane.xlu0 %2391 }
 0x4b1   : > { %v2438_v45 = vmul.f32 0.03125, %v2392_v14 }
 0x4b4   : > { %v2419_v5 = vpop.xlane.xlu0 %2418 }
 0x4b5   : > { %v2447_v53 = vmul.f32 0.03125, %v2419_v5 }
 0x4b7   : > { %v5227_v42 = vsub.f32 %v4998_v21, %v2447_v53 }
 0x4b8   : > { %v2425_v33 = vpop.xlane.xlu0 %2424 }
 0x4b9   : > { %v2449_v18 = vmul.f32 0.03125, %v2425_v33 }
 0x4bb   : > { %v5252_v50 = vsub.f32 %v5015_v40, %v2449_v18 }
 0x4bd   : > { %v2481_v40 = vmul.f32 %v5252_v50, %v5252_v50 }
 0x4bf   : > { %v2431_v12 = vpop.xlane.xlu0 %2430 }
 0x4c0   : > { %v2451_v62 = vmul.f32 0.03125, %v2431_v12 }
 0x4c2   : > { %v5266_v17 = vsub.f32 %v5030_v1, %v2451_v62 }
 0x4c3   : > { %v2398_v16 = vpop.xlane.xlu0 %2397 }
 0x4c4   : > { %v2272_v9 = vpop.permute.xlu1 %2271  ;;  %v2440_v27 = vmul.f32 0.03125, %v2398_v16  ;;  %v2483_v24 = vmul.f32 %v5266_v17, %v5266_v17 }
 0x4c5   : > { %v5210_v11 = vadd.f32 %v2272_v9, %v4867_v29  ;;  %v5222_v29 = vsub.f32 %v5017_v44, %v2438_v45 }
 0x4c6   : > { %v5243_v55 = vsub.f32 %v5033_v56, %v2440_v27 }
 0x4c7   : > { %v2401_v57 = vpop.xlane.xlu0 %2400  ;;  %v2281_v52 = vsel %vm1223_vm3, %v5210_v11, 0.0  ;;  %v2470_v37 = vmul.f32 %v5222_v29, %v5222_v29 }
 0x4c8   : > { %2282 = vadd.xlane.f32.xlu0 %v2281_v52  ;;  %v2472_v8 = vmul.f32 %v5243_v55, %v5243_v55 }
 0x4cb   : > { %v2413_v39 = vpop.xlane.xlu0 %2412 }
 0x4cc   : > { %v2445_v1 = vmul.f32 0.03125, %v2413_v39 }
 0x4ce   : > { %v5290_v5 = vsub.f32 %v5050_v63, %v2445_v1 }
 0x4cf   : > { %v2407_v51 = vpop.xlane.xlu0 %2406 }
 0x4d0   : > { %v2443_v33 = vmul.f32 0.03125, %v2407_v51 }
 0x4d3   : > { %v5214_v34 = vpop.xlane.xlu0 %2436 }
 0x4d4   : > { %v2453_v63 = vmul.f32 0.03125, %v5214_v34 }
 0x4d6   : > { %v5312_v39 = vsub.f32 %v5069_v15, %v2453_v63 }
 0x4d7   : > { %v2274_v47 = vpop.permute.xlu0 %2273 }
 0x4d8   : > { %v5217_v60 = vadd.f32 %v2274_v47, %v4863_v22  ;;  %v2479_v22 = vmul.f32 %v5227_v42, %v5227_v42 }
 0x4da   : > { %v2284_v4 = vsel %vm1223_vm3, %v5217_v60, 0.0 }
 0x4db   : > { %2285 = vadd.xlane.f32.xlu1 %v2284_v4 }
 0x4ec   : > { %2502 = vrot.lane.b32.xlu1 %v2470_v37, %s4259_s20 }
 0x4f0   : > { %2520 = vrot.lane.b32.xlu1 %v2479_v22, %s4259_s20 }
 0x503   : > { %v2416_v25 = vpop.xlane.xlu1 %2415 }
 0x504   : > { %v2446_v10 = vmul.f32 0.03125, %v2416_v25 }
 0x506   : > { %v5234_v41 = vsub.f32 %v5000_v23, %v2446_v10 }
 0x507   : > { %v2422_v44 = vpop.xlane.xlu1 %2421 }
 0x508   : > { %v2478_v59 = vmul.f32 %v5234_v41, %v5234_v41  ;;  %v2448_v49 = vmul.f32 0.03125, %v2422_v44 }
 0x50a   : > { %v5239_v21 = vsub.f32 %v5024_v48, %v2448_v49  ;;  %2518 = vrot.lane.b32.xlu0 %v2478_v59, %s4259_s20 }
 0x50b   : > { %v2395_v61 = vpop.xlane.xlu1 %2394 }
 0x50c   : > { %v2480_v23 = vmul.f32 %v5239_v21, %v5239_v21  ;;  %v2439_v43 = vmul.f32 0.03125, %v2395_v61 }
 0x50e   : > { %v5248_v0 = vsub.f32 %v5008_v35, %v2439_v43  ;;  %2522 = vrot.lane.b32.xlu0 %v2480_v23, %s4259_s20  ;;  %v2441_v35 = vmul.f32 0.03125, %v2401_v57  ;;  %v5302_v57 = vsub.f32 %v5059_v7, %v2443_v33  ;;  %v2485_v7 = vmul.f32 %v5312_v39, %v5312_v39 }
 0x50f   : > { %v2410_v48 = vpop.xlane.xlu1 %2409 }
 0x510   : > { %v2471_v56 = vmul.f32 %v5248_v0, %v5248_v0  ;;  %v2444_v30 = vmul.f32 0.03125, %v2410_v48 }
 0x512   : > { %v5259_v54 = vsub.f32 %v5043_v2, %v2444_v30  ;;  %2506 = vrot.lane.b32.xlu0 %v2472_v8, %s4259_s20  ;;  %2504 = vrot.lane.b32.xlu1 %v2471_v56, %s4259_s20  ;;  %v5276_v2 = vsub.f32 %v5040_v58, %v2441_v35 }
 0x513   : > { %v2428_v28 = vpop.xlane.xlu1 %2427 }
 0x514   : > { %v2476_v6 = vmul.f32 %v5259_v54, %v5259_v54  ;;  %v2450_v46 = vmul.f32 0.03125, %v2428_v28  ;;  %v2473_v58 = vmul.f32 %v5276_v2, %v5276_v2 }
 0x516   : > { %v5271_v26 = vsub.f32 %v5052_v3, %v2450_v46  ;;  %2524 = vrot.lane.b32.xlu1 %v2481_v40, %s4259_s20  ;;  %2514 = vrot.lane.b32.xlu0 %v2476_v6, %s4259_s20 }
 0x517   : > { %v2404_v19 = vpop.xlane.xlu1 %2403 }
 0x518   : > { %v2482_v13 = vmul.f32 %v5271_v26, %v5271_v26  ;;  %v2442_v31 = vmul.f32 0.03125, %v2404_v19 }
 0x51a   : > { %v5283_v14 = vsub.f32 %v5094_v32, %v2442_v31  ;;  %2528 = vrot.lane.b32.xlu1 %v2483_v24, %s4259_s20  ;;  %2526 = vrot.lane.b32.xlu0 %v2482_v13, %s4259_s20  ;;  %v2477_v32 = vmul.f32 %v5290_v5, %v5290_v5 }
 0x51b   : > { %v2434_v3 = vpop.xlane.xlu1 %2433 }
 0x51c   : > { %v2474_v12 = vmul.f32 %v5283_v14, %v5283_v14  ;;  %v2452_v16 = vmul.f32 0.03125, %v2434_v3  ;;  %v3432_v3 = vld [vmem:[%s908_s10] ss:$0 sm:$0xff] }
 0x51e   : > { %v5295_v9 = vsub.f32 %v5099_v36, %v2452_v16  ;;  %2508 = vrot.lane.b32.xlu1 %v2473_v58, %s4259_s20  ;;  %2510 = vrot.lane.b32.xlu0 %v2474_v12, %s4259_s20  ;;  %v2475_v36 = vmul.f32 %v5302_v57, %v5302_v57  ;;  %v3431_v58 = vld [vmem:[%s802_s1] ss:$0 sm:$0xff]  ;;  %s5643_s1 = sld [smem:[#allocation49_spill]] (!%p3433_p3) }
 0x520   : > { %v2484_v52 = vmul.f32 %v5295_v9, %v5295_v9 }
 0x522   : > { %2516 = vrot.lane.b32.xlu1 %v2477_v32, %s4259_s20  ;;  %2530 = vrot.lane.b32.xlu0 %v2484_v52, %s4259_s20 }
 0x524   : > { %s5644_s8 = smov (!%p3433_p3), %s5643_s1 }
 0x526   : > { %2512 = vrot.lane.b32.xlu1 %v2475_v36, %s4259_s20 }
 0x52a   : > { %2532 = vrot.lane.b32.xlu1 %v2485_v7, %s4259_s20 }
 0x555   : > { %v2283_v53 = vpop.xlane.xlu0 %2282 }
 0x556   : > { %v2288_v33 = vmul.f32 0.03125, %v2283_v53 }
 0x558   : > { %v5344_v12 = vsub.f32 %v5210_v11, %v2288_v33 }
 0x55a   : > { %v2292_v32 = vmul.f32 %v5344_v12, %v5344_v12 }
 0x55c   : > { %v2294_v52 = vsel %vm1223_vm3, %v2292_v32, 0.0 }
 0x568   : > { %v2286_v51 = vpop.xlane.xlu1 %2285 }
 0x569   : > { %v2289_v16 = vmul.f32 0.03125, %v2286_v51 }
 0x56b   : > { %v5349_v63 = vsub.f32 %v5217_v60, %v2289_v16 }
 0x56c   : > { %v2503_v34 = vpop.permute.xlu1 %2502 }
 0x56d   : > { %v2550_v47 = vsel %vm1223_vm3, %v2503_v34, 0.0  ;;  %v2293_v36 = vmul.f32 %v5349_v63, %v5349_v63 }
 0x56e   : > { %2551 = vadd.xlane.f32.xlu0 %v2550_v47 }
 0x56f   : > { %v2297_v7 = vsel %vm1223_vm3, %v2293_v36, 0.0 }
 0x570   : > { %v2521_v4 = vpop.permute.xlu1 %2520 }
 0x571   : > { %v2577_v45 = vsel %vm1223_vm3, %v2521_v4, 0.0 }
 0x572   : > { %2578 = vadd.xlane.f32.xlu0 %v2577_v45 }
 0x57c   : > { %v2519_v37 = vpop.permute.xlu0 %2518 }
 0x57d   : > { %v2574_v15 = vsel %vm1223_vm3, %v2519_v37, 0.0 }
 0x57e   : > { %2575 = vadd.xlane.f32.xlu1 %v2574_v15 }
 0x580   : > { %v2523_v22 = vpop.permute.xlu0 %2522 }
 0x581   : > { %v2580_v25 = vsel %vm1223_vm3, %v2523_v22, 0.0 }
 0x582   : > { %2581 = vadd.xlane.f32.xlu1 %v2580_v25 }
 0x584   : > { %v2507_v10 = vpop.permute.xlu0 %2506  ;;  %v2505_v44 = vpop.permute.xlu1 %2504 }
 0x585   : > { %v2556_v27 = vsel %vm1223_vm3, %v2507_v10, 0.0  ;;  %v2553_v59 = vsel %vm1223_vm3, %v2505_v44, 0.0 }
 0x586   : > { %2557 = vadd.xlane.f32.xlu1 %v2556_v27  ;;  %2554 = vadd.xlane.f32.xlu0 %v2553_v59 }
 0x588   : > { %v2515_v49 = vpop.permute.xlu0 %2514  ;;  %v2525_v18 = vpop.permute.xlu1 %2524 }
 0x589   : > { %v2568_v61 = vsel %vm1223_vm3, %v2515_v49, 0.0  ;;  %v2583_v23 = vsel %vm1223_vm3, %v2525_v18, 0.0 }
 0x58a   : > { %2569 = vadd.xlane.f32.xlu1 %v2568_v61  ;;  %2584 = vadd.xlane.f32.xlu0 %v2583_v23 }
 0x58c   : > { %v2527_v43 = vpop.permute.xlu0 %2526  ;;  %v2529_v48 = vpop.permute.xlu1 %2528 }
 0x58d   : > { %v2586_v62 = vsel %vm1223_vm3, %v2527_v43, 0.0  ;;  %v2589_v8 = vsel %vm1223_vm3, %v2529_v48, 0.0 }
 0x58e   : > { %2587 = vadd.xlane.f32.xlu1 %v2586_v62  ;;  %2590 = vadd.xlane.f32.xlu0 %v2589_v8 }
 0x590   : > { %v2511_v56 = vpop.permute.xlu0 %2510  ;;  %v2509_v30 = vpop.permute.xlu1 %2508 }
 0x591   : > { %v2562_v35 = vsel %vm1223_vm3, %v2511_v56, 0.0  ;;  %v2559_v28 = vsel %vm1223_vm3, %v2509_v30, 0.0 }
 0x592   : > { %2563 = vadd.xlane.f32.xlu1 %v2562_v35  ;;  %2560 = vadd.xlane.f32.xlu0 %v2559_v28 }
 0x594   : > { %v2531_v40 = vpop.permute.xlu0 %2530  ;;  %v2517_v6 = vpop.permute.xlu1 %2516 }
 0x595   : > { %v2592_v46 = vsel %vm1223_vm3, %v2531_v40, 0.0  ;;  %v2571_v19 = vsel %vm1223_vm3, %v2517_v6, 0.0 }
 0x596   : > { %2593 = vadd.xlane.f32.xlu1 %v2592_v46  ;;  %2572 = vadd.xlane.f32.xlu0 %v2571_v19 }
 0x598   : > { %v2513_v24 = vpop.permute.xlu1 %2512 }
 0x599   : > { %v2565_v1 = vsel %vm1223_vm3, %v2513_v24, 0.0 }
 0x59a   : > { %2566 = vadd.xlane.f32.xlu0 %v2565_v1 }
 0x59c   : > { %v2533_v13 = vpop.permute.xlu1 %2532 }
 0x59d   : > { %v2595_v31 = vsel %vm1223_vm3, %v2533_v13, 0.0 }
 0x59e   : > { %2596 = vadd.xlane.f32.xlu0 %v2595_v31 }
 0x5a7   : > { %2667 = vrot.lane.b32.xlu1 %v3431_v58, %s4259_s20 }
 0x5b4   : > { %2691 = vrot.lane.b32.xlu0 %v3432_v3, %s4259_s20 }
 0x5cb   : > { %2295 = vadd.xlane.f32.xlu1 %v2294_v52 }
 0x5d3   : > { %2298 = vadd.xlane.f32.xlu0 %v2297_v7 }
 0x5fb   : > { %v2552_v34 = vpop.xlane.xlu0 %2551 }
 0x5fc   : > { %v2598_v53 = vmul.f32 0.03125, %v2552_v34 }
 0x5fe   : > { %v2614_v10 = vadd.f32 1e-05, %v2598_v53 }
 0x5ff   : > { %v2579_v11 = vpop.xlane.xlu0 %2578 }
 0x600   : > { %v2607_v37 = vmul.f32 0.03125, %v2579_v11  ;;  %3792 = vrsqrt.f32 %v2614_v10 }
 0x602   : > { %v2623_v27 = vadd.f32 1e-05, %v2607_v37 }
 0x604   : > { %3794 = vrsqrt.f32 %v2623_v27 }
 0x60a   : > { %v3793_v31 = vpop.eup %3792 }
 0x60b   : > { %v2576_v47 = vpop.xlane.xlu1 %2575  ;;  %v2646_v37 = vmul.f32 %v3793_v31, %v5222_v29 }
 0x60c   : > { %v2606_v15 = vmul.f32 0.03125, %v2576_v47 }
 0x60e   : > { %v2622_v49 = vadd.f32 1e-05, %v2606_v15  ;;  %v3795_v16 = vpop.eup %3794 }
 0x60f   : > { %v2582_v4 = vpop.xlane.xlu1 %2581  ;;  %v2655_v27 = vmul.f32 %v3795_v16, %v5227_v42 }
 0x610   : > { %v2608_v25 = vmul.f32 0.03125, %v2582_v4  ;;  %3796 = vrsqrt.f32 %v2622_v49 }
 0x612   : > { %v2624_v23 = vadd.f32 1e-05, %v2608_v25 }
 0x613   : > { %v2555_v51 = vpop.xlane.xlu0 %2554  ;;  %v2558_v45 = vpop.xlane.xlu1 %2557 }
 0x614   : > { %v2599_v44 = vmul.f32 0.03125, %v2555_v51  ;;  %3798 = vrsqrt.f32 %v2624_v23  ;;  %v2600_v6 = vmul.f32 0.03125, %v2558_v45 }
 0x616   : > { %v2615_v48 = vadd.f32 1e-05, %v2599_v44  ;;  %v2616_v58 = vadd.f32 1e-05, %v2600_v6 }
 0x617   : > { %v2585_v60 = vpop.xlane.xlu0 %2584  ;;  %v2570_v22 = vpop.xlane.xlu1 %2569 }
 0x618   : > { %v2609_v59 = vmul.f32 0.03125, %v2585_v60  ;;  %v2604_v8 = vmul.f32 0.03125, %v2570_v22  ;;  %3800 = vrsqrt.f32 %v2615_v48 }
 0x61a   : > { %v2625_v62 = vadd.f32 1e-05, %v2609_v59  ;;  %v2620_v40 = vadd.f32 1e-05, %v2604_v8  ;;  %v3797_v52 = vpop.eup %3796 }
 0x61b   : > { %v2591_v18 = vpop.xlane.xlu0 %2590  ;;  %v2588_v61 = vpop.xlane.xlu1 %2587  ;;  %v2654_v53 = vmul.f32 %v3797_v52, %v5234_v41 }
 0x61c   : > { %v2611_v43 = vmul.f32 0.03125, %v2591_v18  ;;  %v2610_v28 = vmul.f32 0.03125, %v2588_v61  ;;  %3802 = vrsqrt.f32 %v2625_v62 }
 0x61e   : > { %v2627_v35 = vadd.f32 1e-05, %v2611_v43  ;;  %v2626_v19 = vadd.f32 1e-05, %v2610_v28  ;;  %v3799_v34 = vpop.eup %3798 }
 0x61f   : > { %v2561_v56 = vpop.xlane.xlu0 %2560  ;;  %v2564_v30 = vpop.xlane.xlu1 %2563  ;;  %v2656_v44 = vmul.f32 %v3799_v34, %v5239_v21 }
 0x620   : > { %3804 = vrsqrt.f32 %v2627_v35  ;;  %v2601_v24 = vmul.f32 0.03125, %v2561_v56  ;;  %v2602_v13 = vmul.f32 0.03125, %v2564_v30 }
 0x621   : > { %3806 = vrsqrt.f32 %v2620_v40 }
 0x622   : > { %3808 = vrsqrt.f32 %v2626_v19  ;;  %v2617_v32 = vadd.f32 1e-05, %v2601_v24  ;;  %v2618_v36 = vadd.f32 1e-05, %v2602_v13  ;;  %v3801_v47 = vpop.eup %3800 }
 0x623   : > { %v2573_v46 = vpop.xlane.xlu0 %2572  ;;  %v2594_v1 = vpop.xlane.xlu1 %2593  ;;  %3810 = vrsqrt.f32 %v2616_v58  ;;  %v2647_v49 = vmul.f32 %v3801_v47, %v5248_v0 }
 0x624   : > { %v2612_v3 = vmul.f32 0.03125, %v2594_v1  ;;  %v2605_v7 = vmul.f32 0.03125, %v2573_v46  ;;  %3812 = vrsqrt.f32 %v2617_v32 }
 0x625   : > { %3814 = vrsqrt.f32 %v2618_v36 }
 0x626   : > { %v2628_v11 = vadd.f32 1e-05, %v2612_v3  ;;  %v3803_v45 = vpop.eup %3802  ;;  %v2621_v15 = vadd.f32 1e-05, %v2605_v7 }
 0x627   : > { %v2567_v33 = vpop.xlane.xlu0 %2566  ;;  %v5355_v4 = vpop.permute.xlu1 %2667  ;;  %v2657_v41 = vmul.f32 %v3803_v45, %v5252_v50 }
 0x628   : > { %v2603_v60 = vmul.f32 0.03125, %v2567_v33  ;;  %v2678_v25 = vmul.f32 %v5355_v4, %v2654_v53  ;;  %v2670_v10 = vmul.f32 %v5355_v4, %v2646_v37  ;;  %3816 = vrsqrt.f32 %v2628_v11 }
 0x629   : > { %v2680_v23 = vmul.f32 %v5355_v4, %v2656_v44  ;;  %v2679_v43 = vmul.f32 %v5355_v4, %v2655_v27  ;;  %3818 = vrsqrt.f32 %v2621_v15  ;;  %v2671_v35 = vmul.f32 %v5355_v4, %v2647_v49 }
 0x62a   : > { %v3805_v22 = vpop.eup %3804  ;;  %v2619_v21 = vadd.f32 1e-05, %v2603_v60  ;;  %v2681_v28 = vmul.f32 %v5355_v4, %v2657_v41 }
 0x62b   : > { %v2597_v51 = vpop.xlane.xlu0 %2596  ;;  %v3807_v29 = vpop.eup %3806  ;;  %v2659_v42 = vmul.f32 %v3805_v22, %v5266_v17 }
 0x62c   : > { %v2613_v48 = vmul.f32 0.03125, %v2597_v51  ;;  %v3809_v62 = vpop.eup %3808  ;;  %v2652_v30 = vmul.f32 %v3807_v29, %v5259_v54  ;;  %3820 = vrsqrt.f32 %v2619_v21 }
 0x62d   : > { %v3811_v40 = vpop.eup %3810  ;;  %v2683_v6 = vmul.f32 %v5355_v4, %v2659_v42  ;;  %v2658_v46 = vmul.f32 %v3809_v62, %v5271_v26 }
 0x62e   : > { %v2629_v17 = vadd.f32 1e-05, %v2613_v48  ;;  %v3813_v19 = vpop.eup %3812  ;;  %v2676_v58 = vmul.f32 %v5355_v4, %v2652_v30  ;;  %v2648_v3 = vmul.f32 %v3811_v40, %v5243_v55  ;;  %v3429_v40 = vld [vmem:[%s786_s18] ss:$0 sm:$0xff] }
 0x62f   : > { %v5363_v59 = vpop.permute.xlu0 %2691  ;;  %v3815_v31 = vpop.eup %3814  ;;  %v2682_v16 = vmul.f32 %v5355_v4, %v2658_v46  ;;  %v2649_v32 = vmul.f32 %v3813_v19, %v5276_v2 }
 0x630   : > { %v2702_v18 = vadd.f32 %v5363_v59, %v2678_v25  ;;  %v2694_v61 = vadd.f32 %v5363_v59, %v2670_v10  ;;  %v2704_v0 = vadd.f32 %v5363_v59, %v2680_v23  ;;  %v2703_v50 = vadd.f32 %v5363_v59, %v2679_v43 }
 0x631   : > { %v2695_v54 = vadd.f32 %v5363_v59, %v2671_v35  ;;  %v2705_v13 = vadd.f32 %v5363_v59, %v2681_v28  ;;  %3822 = vrsqrt.f32 %v2629_v17  ;;  %v2700_v26 = vadd.f32 %v5363_v59, %v2676_v58 }
 0x632   : > { %v2724_v8 = vmax.f32 %v2702_v18, 0.0  ;;  %v2716_v56 = vmax.f32 %v2694_v61, 0.0  ;;  %v2726_v24 = vmax.f32 %v2704_v0, 0.0  ;;  %v2725_v1 = vmax.f32 %v2703_v50, 0.0  ;;  %v3817_v33 = vpop.eup %3816 }
 0x633   : > { %v2717_v52 = vmax.f32 %v2695_v54, 0.0  ;;  %v2727_v36 = vmax.f32 %v2705_v13, 0.0  ;;  %v2707_v7 = vadd.f32 %v5363_v59, %v2683_v6  ;;  %v2650_v34 = vmul.f32 %v3815_v31, %v5283_v14  ;;  %v3819_v47 = vpop.eup %3818 }
 0x634   : > { %2764 = vrot.lane.b32.xlu0 %v2724_v8, %s4259_s20  ;;  %2748 = vrot.lane.b32.xlu1 %v2716_v56, %s4259_s20  ;;  %v2672_v55 = vmul.f32 %v5355_v4, %v2648_v3  ;;  %v2722_v11 = vmax.f32 %v2700_v26, 0.0  ;;  %v2706_v51 = vadd.f32 %v5363_v59, %v2682_v16  ;;  %v2673_v45 = vmul.f32 %v5355_v4, %v2649_v32  ;;  %v3830_v32 = vld [vmem:[#allocation3 + $0x40] sm:$0xff] }
 0x635   : > { %v2660_v2 = vmul.f32 %v3817_v33, %v5295_v9  ;;  %v2729_v53 = vmax.f32 %v2707_v7, 0.0  ;;  %v2674_v15 = vmul.f32 %v5355_v4, %v2650_v34  ;;  %v2653_v14 = vmul.f32 %v3819_v47, %v5290_v5  ;;  %v3829_v33 = vld [vmem:[#allocation2 + $0x8] sm:$0xff]  ;;  %v3832_v47 = vld [vmem:[#allocation3 + $0x50] sm:$0xff] }
 0x636   : > { %v2696_v37 = vadd.f32 %v5363_v59, %v2672_v55  ;;  %v3821_v60 = vpop.eup %3820  ;;  %v2728_v22 = vmax.f32 %v2706_v51, 0.0  ;;  %v2697_v25 = vadd.f32 %v5363_v59, %v2673_v45 }
 0x637   : > { %v2684_v10 = vmul.f32 %v5355_v4, %v2660_v2  ;;  %v2698_v9 = vadd.f32 %v5363_v59, %v2674_v15  ;;  %v2677_v27 = vmul.f32 %v5355_v4, %v2653_v14  ;;  %v2651_v49 = vmul.f32 %v3821_v60, %v5302_v57  ;;  %v3835_v15 = vld [vmem:[#allocation3 + $0x58] sm:$0xff] }
 0x638   : > { %2768 = vrot.lane.b32.xlu0 %v2726_v24, %s4259_s20  ;;  %2766 = vrot.lane.b32.xlu1 %v2725_v1, %s4259_s20  ;;  %v2718_v44 = vmax.f32 %v2696_v37, 0.0  ;;  %v2719_v5 = vmax.f32 %v2697_v25, 0.0  ;;  %v3828_v1 = vld [vmem:[#allocation2] sm:$0xff] }
 0x639   : > { %v2708_v29 = vadd.f32 %v5363_v59, %v2684_v10  ;;  %v2720_v18 = vmax.f32 %v2698_v9, 0.0  ;;  %v2701_v61 = vadd.f32 %v5363_v59, %v2677_v27  ;;  %v2675_v23 = vmul.f32 %v5355_v4, %v2651_v49  ;;  %v3836_v25 = vld [vmem:[#allocation3 + $0x30] sm:$0xff] }
 0x63b   : > { %v3823_v41 = vpop.eup %3822  ;;  %v2730_v57 = vmax.f32 %v2708_v29, 0.0  ;;  %v2723_v21 = vmax.f32 %v2701_v61, 0.0  ;;  %v2699_v48 = vadd.f32 %v5363_v59, %v2675_v23  ;;  %v3839_v29 = vld [vmem:[#allocation3 + $0x10] sm:$0xff] }
 0x63c   : > { %2750 = vrot.lane.b32.xlu0 %v2717_v52, %s4259_s20  ;;  %2770 = vrot.lane.b32.xlu1 %v2727_v36, %s4259_s20  ;;  %v2661_v43 = vmul.f32 %v3823_v41, %v5312_v39  ;;  %v3831_v36 = vld [vmem:[#allocation3] sm:$0xff] }
 0x63d   : > { %v2721_v62 = vmax.f32 %v2699_v48, 0.0  ;;  %v3838_v41 = vld [vmem:[#allocation3 + $0x60] sm:$0xff] }
 0x63e   : > { %v2685_v42 = vmul.f32 %v5355_v4, %v2661_v43  ;;  %v3840_v43 = vld [vmem:[#allocation3 + $0x20] sm:$0xff] }
 0x640   : > { %2760 = vrot.lane.b32.xlu0 %v2722_v11, %s4259_s20  ;;  %2774 = vrot.lane.b32.xlu1 %v2729_v53, %s4259_s20  ;;  %v2709_v8 = vadd.f32 %v5363_v59, %v2685_v42  ;;  %v3430_v59 = vld [vmem:[%s794_s6] ss:$0 sm:$0xff]  ;;  %v3833_v11 = vld [vmem:[#allocation3 + $0x48] sm:$0xff] }
 0x641   : > { %v3834_v53 = vld [vmem:[#allocation3 + $0x8] sm:$0xff] }
 0x642   : > { %v2731_v39 = vmax.f32 %v2709_v8, 0.0  ;;  %v3842_v8 = vld [vmem:[#allocation3 + $0x70] sm:$0xff] }
 0x644   : > { %2772 = vrot.lane.b32.xlu0 %v2728_v22, %s4259_s20  ;;  %2752 = vrot.lane.b32.xlu1 %v2718_v44, %s4259_s20  ;;  %v3837_v44 = vld [vmem:[#allocation3 + $0x68] sm:$0xff] }
 0x648   : > { %2756 = vrot.lane.b32.xlu0 %v2720_v18, %s4259_s20  ;;  %2754 = vrot.lane.b32.xlu1 %v2719_v5, %s4259_s20 }
 0x64c   : > { %2776 = vrot.lane.b32.xlu0 %v2730_v57, %s4259_s20  ;;  %2762 = vrot.lane.b32.xlu1 %v2723_v21, %s4259_s20  ;;  %v3841_v21 = vld [vmem:[#allocation3 + $0x18] sm:$0xff] }
 0x650   : > { %2758 = vrot.lane.b32.xlu1 %v2721_v62, %s4259_s20 }
 0x654   : > { %2778 = vrot.lane.b32.xlu1 %v2731_v39, %s4259_s20  ;;  %s5646_s20 = sld [smem:[#allocation50_spill]] (!%p3433_p3) }
 0x658   : > { %v2296_v56 = vpop.xlane.xlu1 %2295 }
 0x659   : > { %v2300_v0 = vmul.f32 0.03125, %v2296_v56  ;;  %v3843_v56 = vld [vmem:[#allocation3 + $0x38] sm:$0xff] }
 0x65b   : > { %v2302_v50 = vadd.f32 1e-05, %v2300_v0 }
 0x65d   : > { %3824 = vrsqrt.f32 %v2302_v50 }
 0x660   : > { %v2299_v30 = vpop.xlane.xlu0 %2298 }
 0x661   : > { %v2301_v4 = vmul.f32 0.03125, %v2299_v30  ;;  %v3844_v30 = vld [vmem:[#allocation3 + $0x28] sm:$0xff] }
 0x663   : > { %v2303_v35 = vadd.f32 1e-05, %v2301_v4 }
 0x665   : > { %3826 = vrsqrt.f32 %v2303_v35 }
 0x667   : > { %v3825_v28 = vpop.eup %3824 }
 0x668   : > { %v2306_v17 = vmul.f32 %v3825_v28, %v5344_v12  ;;  %v3845_v28 = vld [vmem:[#allocation3 + $0x78] sm:$0xff] }
 0x66a   : > { %v2314_v6 = vmul.f32 %v3429_v40, %v2306_v17  ;;  %v2834_v17 = vld [vmem:[%s5643_s1] sm:$0xff] (!%p3433_p3) }
 0x66c   : > { %v2322_v46 = vadd.f32 %v3430_v59, %v2314_v6  ;;  %v2836_v6 = vld [vmem:[%s5644_s8 + $0x10] sm:$0xff] (!%p3433_p3) }
 0x66e   : > { %v2710_v19 = vmax.f32 %v2322_v46, 0.0 }
 0x66f   : > { %v3827_v24 = vpop.eup %3826 }
 0x670   : > { %v2712_v54 = vadd.f32 %v3828_v1, %v2710_v19  ;;  %v2307_v13 = vmul.f32 %v3827_v24, %v5349_v63  ;;  %v2837_v19 = vld [vmem:[%s5644_s8 + $0x18] sm:$0xff] (!%p3433_p3) }
 0x671   : > { %v3573_v1 = vpack.c.bf16 (!%p3433_p3), %v2837_v19, %v2836_v6 }
 0x672   : > { %2714 = vst.msk [vmem:[#allocation2] sm:$0xff] %vm1223_vm3, %v2712_v54  ;;  %v2315_v31 = vmul.f32 %v3429_v40, %v2307_v13  ;;  %v2963_v13 = vld [vmem:[%s5645_s30] sm:$0xff] (!%p3433_p3) }
 0x674   : > { %v2323_v58 = vadd.f32 %v3430_v59, %v2315_v31  ;;  %v2835_v59 = vld [vmem:[%s5644_s8 + $0x8] sm:$0xff] (!%p3433_p3) }
 0x675   : > { %v3569_v46 = vpack.c.bf16 (!%p3433_p3), %v2835_v59, %v2834_v17  ;;  %v2964_v31 = vld [vmem:[%s5645_s30 + $0x8] sm:$0xff] (!%p3433_p3) }
 0x676   : > { %v2711_v3 = vmax.f32 %v2323_v58, 0.0  ;;  %v4262_v58 = vmov (!%p3433_p3), 0.0|0.0  }
 0x677   : > { %3570 = vmatprep.subr.bf16.mxu0 (!%p3433_p3), %v3569_v46  ;;  %3577 = vmatprep.subr.bf16.mxu1 (!%p3433_p3), %v4262_v58 }
 0x678   : > { %v2713_v26 = vadd.f32 %v3829_v33, %v2711_v3  ;;  %3572 = vmatpush3.bf16.msra.mxu0 (!%p3433_p3), %v3569_v46  ;;  %v3578_v3 = vpack.c.bf16 (!%p3433_p3), %v2964_v31, %v2963_v13  ;;  %v4264_v33 = vmov (!%p3433_p3), 0.0  }
 0x679   : > { %v2832_v24 = vld [vmem:[#allocation2] sm:$0xff] (!%p3433_p3)  ;;  %3574 = vmatprep.subr.bf16.mxu0 (!%p3433_p3), %v3573_v1  ;;  %3550 = vmatprep.mubr.msk.f32.mxu1 (!%p3433_p3), %vm4263_vm12, %v4264_v33 }
 0x67a   : > { %2715 = vst.msk [vmem:[#allocation2 + $0x8] sm:$0xff] %vm1223_vm3, %v2713_v26  ;;  %3543 = vmatprep.mubr.msk.f32.mxu0 (!%p3433_p3), %vm1223_vm3, %v2832_v24  ;;  %3579 = vmatpush3.bf16.msra.mxu1 (!%p3433_p3), %v3578_v3  ;;  %v3434_v26 = vld [vmem:[%s5646_s20] ss:$0 sm:$0xff] (!%p3433_p3) }
 0x67c   : > { %3576 = vmatpush3.bf16.msra.mxu0 (!%p3433_p3), %v3573_v1 }
 0x681   : > { %v2833_v54 = vld [vmem:[#allocation2 + $0x8] sm:$0xff] (!%p3433_p3) }
 0x682   : > { %3544 = vmatmul.mubr.msk.f32.vlgmr.msra.gmra.mrb[0].mxu0 (!%p3433_p3), %vm1223_vm3, %v2833_v54 }
 0x6a6   : > { %v2765_v12 = vpop.permute.xlu0 %2764  ;;  %v2749_v16 = vpop.permute.xlu1 %2748 }
 0x6a7   : > { %v2804_v52 = vadd.f32 %v3830_v32, %v2765_v12  ;;  %v2796_v7 = vadd.f32 %v3831_v36, %v2749_v16 }
 0x6a9   : > { %2820 = vst.msk [vmem:[#allocation3 + $0x40] sm:$0xff] %vm1223_vm3, %v2804_v52  ;;  %2812 = vst.msk [vmem:[#allocation3] sm:$0xff] %vm1223_vm3, %v2796_v7 }
 0x6aa   : > { %v2769_v63 = vpop.permute.xlu0 %2768  ;;  %v2767_v34 = vpop.permute.xlu1 %2766 }
 0x6ab   : > { %v2806_v55 = vadd.f32 %v3832_v47, %v2769_v63  ;;  %v2805_v51 = vadd.f32 %v3833_v11, %v2767_v34 }
 0x6ad   : > { %2822 = vst.msk [vmem:[#allocation3 + $0x50] sm:$0xff] %vm1223_vm3, %v2806_v55  ;;  %2821 = vst.msk [vmem:[#allocation3 + $0x48] sm:$0xff] %vm1223_vm3, %v2805_v51 }
 0x6ae   : > { %v2751_v45 = vpop.permute.xlu0 %2750  ;;  %v2771_v2 = vpop.permute.xlu1 %2770 }
 0x6af   : > { %v2797_v37 = vadd.f32 %v3834_v53, %v2751_v45  ;;  %v2807_v14 = vadd.f32 %v3835_v15, %v2771_v2 }
 0x6b1   : > { %2813 = vst.msk [vmem:[#allocation3 + $0x8] sm:$0xff] %vm1223_vm3, %v2797_v37  ;;  %2823 = vst.msk [vmem:[#allocation3 + $0x58] sm:$0xff] %vm1223_vm3, %v2807_v14 }
 0x6b2   : > { %v2761_v60 = vpop.permute.xlu0 %2760  ;;  %v2775_v22 = vpop.permute.xlu1 %2774 }
 0x6b3   : > { %v2802_v10 = vadd.f32 %v3836_v25, %v2761_v60  ;;  %v2809_v9 = vadd.f32 %v3837_v44, %v2775_v22 }
 0x6b5   : > { %2818 = vst.msk [vmem:[#allocation3 + $0x30] sm:$0xff] %vm1223_vm3, %v2802_v10  ;;  %2825 = vst.msk [vmem:[#allocation3 + $0x68] sm:$0xff] %vm1223_vm3, %v2809_v9 }
 0x6b6   : > { %v2773_v27 = vpop.permute.xlu0 %2772  ;;  %v2753_v49 = vpop.permute.xlu1 %2752 }
 0x6b7   : > { %v2808_v5 = vadd.f32 %v3838_v41, %v2773_v27  ;;  %v2798_v18 = vadd.f32 %v3839_v29, %v2753_v49 }
 0x6b9   : > { %2824 = vst.msk [vmem:[#allocation3 + $0x60] sm:$0xff] %vm1223_vm3, %v2808_v5  ;;  %2814 = vst.msk [vmem:[#allocation3 + $0x10] sm:$0xff] %vm1223_vm3, %v2798_v18  ;;  %v5647_v18 = vlaneseq (!%p3433_p3) }
 0x6ba   : > { %v2757_v61 = vpop.permute.xlu0 %2756  ;;  %v2755_v23 = vpop.permute.xlu1 %2754 }
 0x6bb   : > { %v2800_v57 = vadd.f32 %v3840_v43, %v2757_v61  ;;  %v2799_v48 = vadd.f32 %v3841_v21, %v2755_v23  ;;  %v3079_v61 = vand.u32 (!%p3433_p3), 127, %v5647_v18 }
 0x6bd   : > { %2816 = vst.msk [vmem:[#allocation3 + $0x20] sm:$0xff] %vm1223_vm3, %v2800_v57  ;;  %2815 = vst.msk [vmem:[#allocation3 + $0x18] sm:$0xff] %vm1223_vm3, %v2799_v48  ;;  %v3082_v23 = vsub.s32 (!%p3433_p3), %v3079_v61, %v4808_v38 }
 0x6be   : > { %v2777_v42 = vpop.permute.xlu0 %2776  ;;  %v2763_v62 = vpop.permute.xlu1 %2762 }
 0x6bf   : > { %v2810_v39 = vadd.f32 %v3842_v8, %v2777_v42  ;;  %v2803_v0 = vadd.f32 %v3843_v56, %v2763_v62  ;;  %v3439_v8 = vld [vmem:[#allocation4] ss:$0 sm:$0xff] (!%p3433_p3) }
 0x6c1   : > { %2826 = vst.msk [vmem:[#allocation3 + $0x70] sm:$0xff] %vm1223_vm3, %v2810_v39  ;;  %2819 = vst.msk [vmem:[#allocation3 + $0x38] sm:$0xff] %vm1223_vm3, %v2803_v0 }
 0x6c2   : > { %v2759_v50 = vpop.permute.xlu1 %2758 }
 0x6c3   : > { %v2801_v4 = vadd.f32 %v3844_v30, %v2759_v50  ;;  %2831 = sbr.rel (%p3433_p3) target bundleno = 2146 (0x862), region = 140 }
 0x6c5   : > { %2817 = vst.msk [vmem:[#allocation3 + $0x28] sm:$0xff] %vm1223_vm3, %v2801_v4 }
 0x6c6   : > { %v2779_v35 = vpop.permute.xlu1 %2778 }
 0x6c7   : > { %v2811_v40 = vadd.f32 %v3845_v28, %v2779_v35 }
 0x6c9   : > { %2827 = vst.msk [vmem:[#allocation3 + $0x78] sm:$0xff] %vm1223_vm3, %v2811_v40 }
 0x755   : > { %v3545_v12 = vpop.f32.mrb[0].mxu0 }
 0x756   : > { %v2923_v16 = vadd.f32 %v3545_v12, %v3434_v26  ;;  %v2917_v32 = vpop.f32.mrb[1].mxu0 }
 0x757   : > { %v2918_v52 = vadd.f32 %v3434_v26, %v2917_v32 }
 0x758   : > { %v3438_v36 = vmul.f32 -1.442695, %v2923_v16 }
 0x759   : > { %v3437_v7 = vmul.f32 -1.442695, %v2918_v52 }
 0x75a   : > { %3846 = vpow2.f32 %v3438_v36 }
 0x75b   : > { %3848 = vpow2.f32 %v3437_v7 }
 0x764   : > { %v3847_v63 = vpop.eup %3846 }
 0x765   : > { %v3849_v34 = vpop.eup %3848  ;;  %v2933_v47 = vadd.f32 1.0, %v3847_v63 }
 0x766   : > { %v2932_v55 = vadd.f32 1.0, %v3849_v34 }
 0x767   : > { %3850 = vrcp.f32 %v2933_v47 }
 0x768   : > { %3852 = vrcp.f32 %v2932_v55 }
 0x771   : > { %v3851_v11 = vpop.eup %3850 }
 0x772   : > { %v3853_v51 = vpop.eup %3852  ;;  %v2946_v45 = vsel %vm2938_vm13, %v3851_v11, 0.0 }
 0x773   : > { %v2939_v2 = vsel %vm2938_vm13, %v3853_v51, 0.0  ;;  %v2947_v53 = vrot.slane %v2946_v45, 4 }
 0x774   : > { %2956 = vadd.xlane.f32.xlu0 %v2939_v2  ;;  %v2940_v37 = vrot.slane %v2939_v2, 4 }
 0x775   : > { %v2948_v15 = vadd.f32 %v2947_v53, %v2946_v45 }
 0x776   : > { %v2941_v14 = vadd.f32 %v2940_v37, %v2939_v2 }
 0x777   : > { %v2949_v60 = vrot.slane %v2948_v15, 2 }
 0x778   : > { %v2942_v22 = vrot.slane %v2941_v14, 2  ;;  %2958 = vadd.xlane.f32.xlu0 %v2946_v45 }
 0x779   : > { %v2950_v25 = vadd.f32 %v2949_v60, %v2948_v15 }
 0x77a   : > { %v2943_v10 = vadd.f32 %v2942_v22, %v2941_v14 }
 0x77b   : > { %v2951_v44 = vrot.slane %v2950_v25, 1 }
 0x77c   : > { %v2944_v9 = vrot.slane %v2943_v10, 1 }
 0x77d   : > { %v2952_v27 = vadd.f32 %v2951_v44, %v2950_v25 }
 0x77e   : > { %v2945_v49 = vadd.f32 %v2944_v9, %v2943_v10 }
 0x77f   : > { %v2955_v41 = vmul.f32 0.125, %v2952_v27 }
 0x780   : > { %v2954_v5 = vmul.f32 0.125, %v2945_v49 }
 0x782   : > { %v2974_v29 = vsel %vm2250_vm5, %v2955_v41, %v2954_v5 }
 0x783   : > { %3551 = vmatmul.mubr.msk.f32.vlgmr.msra.gmra.mrb[0].mxu1 %vm2938_vm13, %v2974_v29 }
 0x801   : > { %v2957_v43 = vpop.xlane.xlu0 %2956 }
 0x802   : > { %v2961_v57 = vmul.f32 0.0625, %v2957_v43 }
 0x804   : > { %v3083_v21 = vrot.slane %v2961_v57, %v3082_v23 }
 0x805   : > { %v2959_v48 = vpop.xlane.xlu0 %2958 }
 0x806   : > { %3091 = vst.msk [vmem:[#allocation22] sm:$0x1] %vm3090_vm14, %v3083_v21  ;;  %v2962_v42 = vmul.f32 0.0625, %v2959_v48 }
 0x808   : > { %v3087_v62 = vrot.slane %v2962_v42, %v3082_v23 }
 0x80a   : > { %3092 = vst.msk [vmem:[#allocation22 + $0x1] sm:$0x1] %vm3090_vm14, %v3087_v62 }
 0x856   : > { %v3043_v39 = vpop.f32.mrb[0].mxu1 }
 0x857   : > { %v3044_v56 = vadd.f32 %v3439_v8, %v3043_v39  ;;  %v3552_v0 = vpop.f32.mrb[1].mxu1 }
 0x859   : > { %v3047_v50 = vmax.f32 %v3044_v56, 0.0 }
 0x85b   : > { %v3055_v30 = vrot.slane %v3047_v50, %v4861_v20 }
 0x85d   : > { %v3056_v4 = vcombine.high %v3055_v30, %v3055_v30  ;;  %v3063_v38 = vrot.slane %v3055_v30, %v4861_v20 }
 0x85f   : > { %v3070_v35 = vrot.slane %v3056_v4, %v4861_v20  ;;  %3074 = vst.msk [vmem:[%s5648_s7] sm:$0x1] %vm3073_vm15, %v3063_v38 }
 0x861   : > { %3075 = vst.msk [vmem:[%s5648_s7 + $0x1] sm:$0x1] %vm3073_vm15, %v3070_v35 }
 0x862 PF: > { %s5649_s24 = sld [smem:[#allocation35_spill]]  ;;  %s4265_s18 = smov [#allocation22]  }
 0x863   : > { %s3110_s6 = sshll.u32 %s4265_s18, 4  ;;  %s3111_s6 = int_to_ptr.vmem [resolvable:$true] %s3110_s6 }
 0x864   : > { %s4144_s1 = scalar_lea.vmem %s3111_s6, 32  ;;  %p4151_p1 = scmp.lt.s32.totalorder %s3111_s6, %s3111_s6 }
 0x865   : > { %p4145_p7 = scmp.ne.s32.totalorder %s3111_s6, %s4144_s1  ;;  %p4152_p10 = scmp.lt.s32.totalorder %s4144_s1, %s4144_s1 }
 0x867   : > { %p4153_p4 = por %p4152_p10, %p4151_p1 }
 0x868   : > { %p3661_p13 = scmp.eq.s32.totalorder %s5649_s24, 1 }
 0x86a   : > { %p4146_p9 = pnand %p4145_p7, %p3661_p13 }
 0x86c   : > { %p4147_p8 = pneg %p4146_p9 }
 0x86e   : > { %p4154_p12 = pnand %p4153_p4, %p4147_p8 }
 0x870   : > { %4157 = shalt.err (!%p4154_p12)
}
 0x871   : > { %s5650_s27 = sld [smem:[#allocation53_spill]] }
 0x877   : > { %s4158_s29 = scalar_lea.hbm %s5650_s27, 32 }
 0x878   : > { %p4159_p6 = scmp.ne.s32.totalorder %s5650_s27, %s4158_s29  ;;  %p4164_p11 = scmp.lt.u32.totalorder %s4158_s29, %s5650_s27 }
 0x87a   : > { %p4160_p0 = pnand %p4159_p6, %p3661_p13 }
 0x87c   : > { %p4161_p5 = pneg %p4160_p0 }
 0x87e   : > { %p4166_p2 = pnand %p4164_p11, %p4161_p5 }
 0x880   : > { %4169 = shalt.err (!%p4166_p2)
}
 0x881   : > { %s4266_s16 = smov 16   ;;  %s4267_s2 = smov 1  }
 0x882   : > { %3615 = dma.vmem_to_hbm [thread:$0]  (%p3661_p13), %s3111_s6, 32, %s5650_s27, [#allocation7], %s4266_s16, %s4266_s16, %s4267_s2  }
 0x883   : > { %4219 = dma.done.wait (%p3661_p13), [#allocation7], 32  }
 0x884   : > { %4221 = vsyncadd (%p3661_p13), [#allocation7], 4294967264 }
 0x885 PF: > { %s5651_s20 = sld [smem:[#allocation34_spill]]  ;;  %s5653_s21 = sld [smem:[#allocation31_spill]] }
 0x886   : > { %s5654_s1 = sld [smem:[#allocation38_spill]]  ;;  %s5655_s22 = sld [smem:[#allocation33_spill]] }
 0x887   : > { %s5656_s17 = sld [smem:[#allocation37_spill]] }
 0x88b   : > { %s45_s2 = sadd.s32 1, %s5651_s20   ;;  %s5652_s20 = sld [smem:[#allocation30_spill]] }
 0x88c   : > { %p42_p3 = scmp.ge.s32.totalorder %s45_s2, 4  }
 0x88e   :  { %44 = sbr.rel (!%p42_p3) target bundleno = 28 (0x1c), region = 232 }
 0x895   :  { %3133 = vsyncpa [#allocation6], 1 }
 0x896   :  { %3135 = vsyncpa [#allocation6 + $0x1], 1 }
 0x897   :  { %3136 = vsyncpa [#allocation9], 1 }
 0x898   :  { %3137 = vsyncpa [#allocation12], 1 }
 0x899   :  { %3138 = vsyncpa [#allocation15], 1 }
 0x89a   :  { %3140 = vsyncpa [#allocation15 + $0x1], 1 }
 0x89b   :  { %3141 = vsyncpa [#allocation18], 1 }
 0x89c   :  { %3143 = vsyncpa [#allocation18 + $0x1], 1 }
 0x89d   :  { %3144 = vsyncpa [#allocation21], 1 }
 0x89e   :  { %3146 = vsyncpa [#allocation21 + $0x1], 1 }
 0x89f   :  { %3147 = vsyncpa [#allocation7], 1 }
 0x8a0   :  { %3149 = vsyncpa [#allocation7 + $0x1], 1 }

</bundles_post_ra>
